<compile_context>
chip_gen: v7x
topology: tpu7x:2x2x1
jax: 0.10.0
libtpu: 0.0.40
codegen_flags: <defaults>
</compile_context>

<pallas_src>
import functools

import jax
import jax.numpy as jnp
import numpy as np
from jax.experimental import pallas as pl
from jax.experimental.pallas import tpu as pltpu

SLOT = 128  # lane width of one im2col tap slot (== vreg lane count)


def _convgru_kernel(hx_ref, h_ref, w1_ref, w2_ref, b1_ref, b2_ref, out_ref,
                    patch_ref, hrpad_ref, *, Bblk, D, Ch, K, Np):
    p = K // 2
    M = Bblk * D * D
    KKS = K * K * SLOT

    # One-time zero of the padded h*reset scratch: only the halo must be zero
    # and it is never written with non-zero data; the interior is rewritten
    # every step.  Scratch persists across grid steps and may hold stale VMEM
    # (possibly NaN) before step 0, hence the guard instead of a per-step fill.
    @pl.when(pl.program_id(0) == 0)
    def _init():
        hrpad_ref[...] = jnp.zeros((Bblk, D + 2 * p, D + 2 * p, SLOT), jnp.float32)

    # ---- pass 1: im2col into 128-lane-aligned tap slots ----------------------
    # hx is channel-ordered [h | x | 0-pad] padded to SLOT lanes + spatial halo
    # in the wrapper, so every tap copy is a full-lane, slot-aligned, unmasked
    # store (bf16 cast fused into the copy); the patch stays 3-D spatial so no
    # per-tap reshape / relayout copy is materialized.  Every patch lane is
    # rewritten each step before use, so no stale-VMEM init is needed for it.
    for t in range(K * K):
        dy, dx = t // K, t % K
        patch_ref[:, :, :, t * SLOT:(t + 1) * SLOT] = (
            hx_ref[:, dy:dy + D, dx:dx + D, :].astype(jnp.bfloat16))

    patch = patch_ref[...].reshape(M, KKS)        # free merge of leading dims (D % 8 == 0)

    # ---- matmul #1: fused [update | reset | out_x] lanes, ONE MXU op ---------
    g_pre = jnp.dot(patch, w1_ref[...], preferred_element_type=jnp.float32)   # (M, Np)
    gates = jax.nn.sigmoid(g_pre + b1_ref[...])   # [0,Ch)=update, [Ch,2Ch)=reset, rest junk

    h_full = h_ref[...].reshape(M, Np)            # f32; lanes [Ch, Np) are exactly 0

    # reset rotated down to lanes [0, Ch); junk lanes are annihilated by h_full's
    # zero pad, so hr_full == [h*reset | 0 ... 0] at full lane width.
    reset_rot = jnp.concatenate([gates[:, Ch:], gates[:, :Ch]], axis=1)
    hr_full = h_full * reset_rot                  # (M, Np) f32

    # ---- pass 2: overwrite each tap slot with [h*reset | 0] ------------------
    # w2 has zero rows at the x / pad positions, so clobbering them with zeros
    # is free, keeps every store full-lane & unmasked, and re-establishes the
    # zero pad-lane invariant of the patch for the next step.
    hrpad_ref[:, p:p + D, p:p + D, :] = hr_full.reshape(Bblk, D, D, SLOT)
    for t in range(K * K):
        dy, dx = t // K, t % K
        patch_ref[:, :, :, t * SLOT:(t + 1) * SLOT] = (
            hrpad_ref[:, dy:dy + D, dx:dx + D, :].astype(jnp.bfloat16))

    # ---- matmul #2: h*reset contribution of the out gate ---------------------
    o_h = jnp.dot(patch_ref[...].reshape(M, KKS), w2_ref[...],
                  preferred_element_type=jnp.float32)          # lanes [0,Ch) valid

    # The out-gate x contribution rode along in matmul #1's spare lanes; rotate
    # its pre-activation down to lanes [0, Ch) and add before tanh.
    o_x = jnp.concatenate([g_pre[:, 2 * Ch:], g_pre[:, :2 * Ch]], axis=1)
    out_g = jnp.tanh(o_h + o_x + b2_ref[...])     # lanes [0,Ch) valid, rest bounded junk

    # ---- blend h*(1-u) + out*u, fully lane-dense (junk sliced off outside) ----
    out_ref[...] = (h_full + gates * (out_g - h_full)).reshape(Bblk, D * D, Np)


def _pick_batch_block(B, D, K):
    """Largest divisor of B leaving >=2 grid steps (v7x megacore), VMEM-capped."""
    per_elem = D * D * K * K * SLOT * 2           # bf16 im2col patch bytes / batch elem
    cap = max(1, (4 << 20) // per_elem)           # keep the patch under ~4 MiB
    blk = 1
    for cand in range(1, B + 1):
        if B % cand == 0 and cand <= cap and B // cand >= 2:
            blk = cand
    return blk


def conv_gru_cell_pallas(x_nchw, h_nchw, params, kernel_size):
    """Pallas ConvGRUCell.forward. x: (B, Cin, D, D), h: (B, Ch, D, D) NCHW."""
    B, Cin, D, _ = x_nchw.shape
    Ch = params["w_update"].shape[0]
    if h_nchw is None:
        h_nchw = jnp.zeros((B, Ch, D, D), x_nchw.dtype)
    K = kernel_size
    p = K // 2
    C1 = Cin + Ch
    Np = 128                                       # lane-dense epilogue / output width

    assert C1 <= SLOT and 3 * Ch <= Np, "TODO(synk): channel tiling for large Cin/Ch"

    Bblk = _pick_batch_block(B, D, K)

    def slot_weights(w, use_x, use_h):
        # (Ch, C1, K, K) OIHW, in-channels = [x | h]  ->  (K*K*SLOT, Ch) rows,
        # tap-major with slot layout [h(Ch) | x(Cin) | 0-pad] matching the patch.
        w_t = jnp.transpose(w, (2, 3, 1, 0))       # (K, K, C1, Ch)
        wx = w_t[:, :, :Cin, :]
        wh = w_t[:, :, Cin:, :]
        if not use_x:
            wx = jnp.zeros_like(wx)
        if not use_h:
            wh = jnp.zeros_like(wh)
        pad = jnp.zeros((K, K, SLOT - C1, Ch), w.dtype)
        return jnp.concatenate([wh, wx, pad], axis=2).reshape(K * K * SLOT, Ch)

    # Matmul #1 columns: [update | reset | out_x | 0-pad]; matmul #2: [out_h | 0].
    w1 = jnp.concatenate([slot_weights(params["w_update"], True, True),
                          slot_weights(params["w_reset"], True, True),
                          slot_weights(params["w_out"], True, False)], axis=1)
    w1 = jnp.pad(w1, ((0, 0), (0, Np - 3 * Ch))).astype(jnp.bfloat16)
    w2 = jnp.pad(slot_weights(params["w_out"], False, True),
                 ((0, 0), (0, Np - Ch))).astype(jnp.bfloat16)
    b1 = jnp.pad(jnp.concatenate([params["b_update"], params["b_reset"]]),
                 (0, Np - 2 * Ch)).astype(jnp.float32)[None, :]
    b2 = jnp.pad(params["b_out"], (0, Np - Ch)).astype(jnp.float32)[None, :]

    # Conv operand: NHWC [h || x], channel-padded to SLOT lanes and spatially
    # "same"-padded once in the wrapper (so pass-1 tap stores are full-lane and
    # the kernel never zero-fills a padded x/h buffer).
    x = jnp.transpose(x_nchw, (0, 2, 3, 1)).astype(jnp.float32)
    h = jnp.transpose(h_nchw, (0, 2, 3, 1)).astype(jnp.float32)
    hx_pad = jnp.pad(jnp.concatenate([h, x], axis=-1),
                     ((0, 0), (p, p), (p, p), (0, SLOT - C1)))
    # Blend / h*reset operand stays f32, channel-padded to Np lanes (pad == 0).
    h_pad = jnp.pad(h, ((0, 0), (0, 0), (0, 0), (0, Np - Ch)))

    kernel = functools.partial(_convgru_kernel, Bblk=Bblk, D=D, Ch=Ch, K=K, Np=Np)

    out_flat = pl.pallas_call(
        kernel,
        out_shape=jax.ShapeDtypeStruct((B, D * D, Np), jnp.float32),
        grid_spec=pltpu.PrefetchScalarGridSpec(
            num_scalar_prefetch=0,
            grid=(B // Bblk,),
            in_specs=[
                pl.BlockSpec((Bblk, D + 2 * p, D + 2 * p, SLOT), lambda b: (b, 0, 0, 0)),
                pl.BlockSpec((Bblk, D, D, Np), lambda b: (b, 0, 0, 0)),
                pl.BlockSpec((K * K * SLOT, Np), lambda b: (0, 0)),
                pl.BlockSpec((K * K * SLOT, Np), lambda b: (0, 0)),
                pl.BlockSpec((1, Np), lambda b: (0, 0)),
                pl.BlockSpec((1, Np), lambda b: (0, 0)),
            ],
            out_specs=pl.BlockSpec((Bblk, D * D, Np), lambda b: (b, 0, 0)),
            scratch_shapes=[
                pltpu.VMEM((Bblk, D, D, K * K * SLOT), jnp.bfloat16),          # im2col patch
                pltpu.VMEM((Bblk, D + 2 * p, D + 2 * p, SLOT), jnp.float32),   # padded h*reset
            ],
        ),
        compiler_params=pltpu.CompilerParams(
            dimension_semantics=("parallel",)),
    )(hx_pad, h_pad, w1, w2, b1, b2)

    out = out_flat[:, :, :Ch].reshape(B, D, D, Ch)
    return jnp.transpose(out, (0, 3, 1, 2))                   # back to NCHW


def init_params(key, input_size, hidden_size, kernel_size):
    """Deterministic init matching nn.init.orthogonal_ (rows orthonormal) + zero bias."""
    C1 = input_size + hidden_size
    fan_in = C1 * kernel_size * kernel_size
    keys = jax.random.split(key, 3)

    def orthogonal(k):
        a = jax.random.normal(k, (fan_in, hidden_size), jnp.float32)
        q, _ = jnp.linalg.qr(a)               # (fan_in, hidden): orthonormal cols
        return q.T.reshape(hidden_size, C1, kernel_size, kernel_size)

    return {
        "w_reset": orthogonal(keys[0]),
        "w_update": orthogonal(keys[1]),
        "w_out": orthogonal(keys[2]),
        "b_reset": jnp.zeros((hidden_size,), jnp.float32),
        "b_update": jnp.zeros((hidden_size,), jnp.float32),
        "b_out": jnp.zeros((hidden_size,), jnp.float32),
    }


def conv_gru_cell_ref(x, h, params, kernel_size):
    """Pure-JAX f32 reference of the PyTorch forward (NCHW)."""
    p = kernel_size // 2

    def conv(inp, w, b):
        y = jax.lax.conv_general_dilated(
            inp, w, window_strides=(1, 1), padding=[(p, p), (p, p)],
            dimension_numbers=("NCHW", "OIHW", "NCHW"))
        return y + b[None, :, None, None]

    combined = jnp.concatenate([x, h], axis=1)
    update = jax.nn.sigmoid(conv(combined, params["w_update"], params["b_update"]))
    reset = jax.nn.sigmoid(conv(combined, params["w_reset"], params["b_reset"]))
    out = jnp.tanh(conv(jnp.concatenate([x, h * reset], axis=1),
                        params["w_out"], params["b_out"]))
    return h * (1.0 - update) + out * update


if __name__ == "__main__":
    B, Cin, D, Ch, K = 2, 4, 16, 32, 3
    key = jax.random.PRNGKey(0)
    kx, kh, kp = jax.random.split(key, 3)
    x = jax.random.normal(kx, (B, Cin, D, D), jnp.float32)
    h = jax.random.normal(kh, (B, Ch, D, D), jnp.float32)
    params = init_params(kp, Cin, Ch, K)

    new_state = conv_gru_cell_pallas(x, h, params, K)
    jax.block_until_ready(new_state)

    # Kernel uses bf16 MXU operands (f32 accumulation), so compare against the
    # full-f32 reference with a bf16-appropriate tolerance.
    ref = conv_gru_cell_ref(x, h, params, K)
    np.testing.assert_allclose(np.asarray(new_state), np.asarray(ref),
                               rtol=5e-2, atol=5e-2)
    print("KERNEL_OK")
</pallas_src>

<mosaic_0001>
module attributes {stable_mosaic.version = 11 : i64} {
  func.func @_convgru_kernel(%arg0: i32, %arg1: memref<1x18x18x128xf32, #tpu.memory_space<vmem>>, %arg2: memref<1x16x16x128xf32, #tpu.memory_space<vmem>>, %arg3: memref<1152x128xbf16, #tpu.memory_space<vmem>>, %arg4: memref<1152x128xbf16, #tpu.memory_space<vmem>>, %arg5: memref<1x128xf32, #tpu.memory_space<vmem>>, %arg6: memref<1x128xf32, #tpu.memory_space<vmem>>, %arg7: memref<1x256x128xf32, #tpu.memory_space<vmem>>, %arg8: memref<1x16x16x1152xbf16, #tpu.memory_space<vmem>>, %arg9: memref<1x18x18x128xf32, #tpu.memory_space<vmem>>) attributes {dimension_semantics = [#tpu.dimension_semantics<parallel>], iteration_bounds = array<i64: 2>, scalar_prefetch = 0 : i64, scratch_operands = 2 : i64, tpu.core_type = #tpu.core_type<tc>, window_params = [{transform_indices = @transform_0, window_bounds = array<i64: 1, 18, 18, 128>}, {transform_indices = @transform_1, window_bounds = array<i64: 1, 16, 16, 128>}, {pipeline_mode = #tpu.pipeline_mode<synchronous>, transform_indices = @transform_2, window_bounds = array<i64: 1152, 128>}, {pipeline_mode = #tpu.pipeline_mode<synchronous>, transform_indices = @transform_3, window_bounds = array<i64: 1152, 128>}, {pipeline_mode = #tpu.pipeline_mode<synchronous>, transform_indices = @transform_4, window_bounds = array<i64: 1, 128>}, {pipeline_mode = #tpu.pipeline_mode<synchronous>, transform_indices = @transform_5, window_bounds = array<i64: 1, 128>}, {transform_indices = @transform_6, window_bounds = array<i64: 1, 256, 128>}]} {
    %c0_i32 = arith.constant 0 : i32
    %0 = arith.cmpi eq, %arg0, %c0_i32 : i32
    %1 = arith.extui %0 : i1 to i32
    %c0_i32_0 = arith.constant 0 : i32
    %2 = arith.cmpi ne, %1, %c0_i32_0 : i32
    scf.if %2 {
      %cst_163 = arith.constant 0.000000e+00 : f32
      %94 = vector.broadcast %cst_163 : f32 to vector<1x18x18x128xf32>
      %c0_164 = arith.constant 0 : index
      %c0_165 = arith.constant 0 : index
      %c0_166 = arith.constant 0 : index
      %c0_167 = arith.constant 0 : index
      %95 = vector.load %arg9[%c0_164, %c0_165, %c0_166, %c0_167] : memref<1x18x18x128xf32, #tpu.memory_space<vmem>>, vector<1x18x18x128xf32>
      tpu.vector_store %arg9[%c0_164, %c0_165, %c0_166, %c0_167], %94 {strides = array<i32>} : memref<1x18x18x128xf32, #tpu.memory_space<vmem>>, vector<1x18x18x128xf32>,
    } else {
    }
    %c0 = arith.constant 0 : index
    %c0_1 = arith.constant 0 : index
    %c0_2 = arith.constant 0 : index
    %c0_3 = arith.constant 0 : index
    %3 = vector.load %arg1[%c0, %c0_1, %c0_2, %c0_3] : memref<1x18x18x128xf32, #tpu.memory_space<vmem>>, vector<1x16x16x128xf32>
    %4 = arith.truncf %3 : vector<1x16x16x128xf32> to vector<1x16x16x128xbf16>
    %c0_4 = arith.constant 0 : index
    %c0_5 = arith.constant 0 : index
    %c0_6 = arith.constant 0 : index
    %c0_7 = arith.constant 0 : index
    %5 = vector.load %arg8[%c0_4, %c0_5, %c0_6, %c0_7] : memref<1x16x16x1152xbf16, #tpu.memory_space<vmem>>, vector<1x16x16x128xbf16>
    tpu.vector_store %arg8[%c0_4, %c0_5, %c0_6, %c0_7], %4 {strides = array<i32>} : memref<1x16x16x1152xbf16, #tpu.memory_space<vmem>>, vector<1x16x16x128xbf16>,
    %c0_8 = arith.constant 0 : index
    %c0_9 = arith.constant 0 : index
    %c1 = arith.constant 1 : index
    %c0_10 = arith.constant 0 : index
    %6 = vector.load %arg1[%c0_8, %c0_9, %c1, %c0_10] : memref<1x18x18x128xf32, #tpu.memory_space<vmem>>, vector<1x16x16x128xf32>
    %7 = arith.truncf %6 : vector<1x16x16x128xf32> to vector<1x16x16x128xbf16>
    %c0_11 = arith.constant 0 : index
    %c0_12 = arith.constant 0 : index
    %c0_13 = arith.constant 0 : index
    %c128 = arith.constant 128 : index
    %8 = vector.load %arg8[%c0_11, %c0_12, %c0_13, %c128] : memref<1x16x16x1152xbf16, #tpu.memory_space<vmem>>, vector<1x16x16x128xbf16>
    tpu.vector_store %arg8[%c0_11, %c0_12, %c0_13, %c128], %7 {strides = array<i32>} : memref<1x16x16x1152xbf16, #tpu.memory_space<vmem>>, vector<1x16x16x128xbf16>,
    %c0_14 = arith.constant 0 : index
    %c0_15 = arith.constant 0 : index
    %c2 = arith.constant 2 : index
    %c0_16 = arith.constant 0 : index
    %9 = vector.load %arg1[%c0_14, %c0_15, %c2, %c0_16] : memref<1x18x18x128xf32, #tpu.memory_space<vmem>>, vector<1x16x16x128xf32>
    %10 = arith.truncf %9 : vector<1x16x16x128xf32> to vector<1x16x16x128xbf16>
    %c0_17 = arith.constant 0 : index
    %c0_18 = arith.constant 0 : index
    %c0_19 = arith.constant 0 : index
    %c256 = arith.constant 256 : index
    %11 = vector.load %arg8[%c0_17, %c0_18, %c0_19, %c256] : memref<1x16x16x1152xbf16, #tpu.memory_space<vmem>>, vector<1x16x16x128xbf16>
    tpu.vector_store %arg8[%c0_17, %c0_18, %c0_19, %c256], %10 {strides = array<i32>} : memref<1x16x16x1152xbf16, #tpu.memory_space<vmem>>, vector<1x16x16x128xbf16>,
    %c0_20 = arith.constant 0 : index
    %c1_21 = arith.constant 1 : index
    %c0_22 = arith.constant 0 : index
    %c0_23 = arith.constant 0 : index
    %12 = vector.load %arg1[%c0_20, %c1_21, %c0_22, %c0_23] : memref<1x18x18x128xf32, #tpu.memory_space<vmem>>, vector<1x16x16x128xf32>
    %13 = arith.truncf %12 : vector<1x16x16x128xf32> to vector<1x16x16x128xbf16>
    %c0_24 = arith.constant 0 : index
    %c0_25 = arith.constant 0 : index
    %c0_26 = arith.constant 0 : index
    %c384 = arith.constant 384 : index
    %14 = vector.load %arg8[%c0_24, %c0_25, %c0_26, %c384] : memref<1x16x16x1152xbf16, #tpu.memory_space<vmem>>, vector<1x16x16x128xbf16>
    tpu.vector_store %arg8[%c0_24, %c0_25, %c0_26, %c384], %13 {strides = array<i32>} : memref<1x16x16x1152xbf16, #tpu.memory_space<vmem>>, vector<1x16x16x128xbf16>,
    %c0_27 = arith.constant 0 : index
    %c1_28 = arith.constant 1 : index
    %c1_29 = arith.constant 1 : index
    %c0_30 = arith.constant 0 : index
    %15 = vector.load %arg1[%c0_27, %c1_28, %c1_29, %c0_30] : memref<1x18x18x128xf32, #tpu.memory_space<vmem>>, vector<1x16x16x128xf32>
    %16 = arith.truncf %15 : vector<1x16x16x128xf32> to vector<1x16x16x128xbf16>
    %c0_31 = arith.constant 0 : index
    %c0_32 = arith.constant 0 : index
    %c0_33 = arith.constant 0 : index
    %c512 = arith.constant 512 : index
    %17 = vector.load %arg8[%c0_31, %c0_32, %c0_33, %c512] : memref<1x16x16x1152xbf16, #tpu.memory_space<vmem>>, vector<1x16x16x128xbf16>
    tpu.vector_store %arg8[%c0_31, %c0_32, %c0_33, %c512], %16 {strides = array<i32>} : memref<1x16x16x1152xbf16, #tpu.memory_space<vmem>>, vector<1x16x16x128xbf16>,
    %c0_34 = arith.constant 0 : index
    %c1_35 = arith.constant 1 : index
    %c2_36 = arith.constant 2 : index
    %c0_37 = arith.constant 0 : index
    %18 = vector.load %arg1[%c0_34, %c1_35, %c2_36, %c0_37] : memref<1x18x18x128xf32, #tpu.memory_space<vmem>>, vector<1x16x16x128xf32>
    %19 = arith.truncf %18 : vector<1x16x16x128xf32> to vector<1x16x16x128xbf16>
    %c0_38 = arith.constant 0 : index
    %c0_39 = arith.constant 0 : index
    %c0_40 = arith.constant 0 : index
    %c640 = arith.constant 640 : index
    %20 = vector.load %arg8[%c0_38, %c0_39, %c0_40, %c640] : memref<1x16x16x1152xbf16, #tpu.memory_space<vmem>>, vector<1x16x16x128xbf16>
    tpu.vector_store %arg8[%c0_38, %c0_39, %c0_40, %c640], %19 {strides = array<i32>} : memref<1x16x16x1152xbf16, #tpu.memory_space<vmem>>, vector<1x16x16x128xbf16>,
    %c0_41 = arith.constant 0 : index
    %c2_42 = arith.constant 2 : index
    %c0_43 = arith.constant 0 : index
    %c0_44 = arith.constant 0 : index
    %21 = vector.load %arg1[%c0_41, %c2_42, %c0_43, %c0_44] : memref<1x18x18x128xf32, #tpu.memory_space<vmem>>, vector<1x16x16x128xf32>
    %22 = arith.truncf %21 : vector<1x16x16x128xf32> to vector<1x16x16x128xbf16>
    %c0_45 = arith.constant 0 : index
    %c0_46 = arith.constant 0 : index
    %c0_47 = arith.constant 0 : index
    %c768 = arith.constant 768 : index
    %23 = vector.load %arg8[%c0_45, %c0_46, %c0_47, %c768] : memref<1x16x16x1152xbf16, #tpu.memory_space<vmem>>, vector<1x16x16x128xbf16>
    tpu.vector_store %arg8[%c0_45, %c0_46, %c0_47, %c768], %22 {strides = array<i32>} : memref<1x16x16x1152xbf16, #tpu.memory_space<vmem>>, vector<1x16x16x128xbf16>,
    %c0_48 = arith.constant 0 : index
    %c2_49 = arith.constant 2 : index
    %c1_50 = arith.constant 1 : index
    %c0_51 = arith.constant 0 : index
    %24 = vector.load %arg1[%c0_48, %c2_49, %c1_50, %c0_51] : memref<1x18x18x128xf32, #tpu.memory_space<vmem>>, vector<1x16x16x128xf32>
    %25 = arith.truncf %24 : vector<1x16x16x128xf32> to vector<1x16x16x128xbf16>
    %c0_52 = arith.constant 0 : index
    %c0_53 = arith.constant 0 : index
    %c0_54 = arith.constant 0 : index
    %c896 = arith.constant 896 : index
    %26 = vector.load %arg8[%c0_52, %c0_53, %c0_54, %c896] : memref<1x16x16x1152xbf16, #tpu.memory_space<vmem>>, vector<1x16x16x128xbf16>
    tpu.vector_store %arg8[%c0_52, %c0_53, %c0_54, %c896], %25 {strides = array<i32>} : memref<1x16x16x1152xbf16, #tpu.memory_space<vmem>>, vector<1x16x16x128xbf16>,
    %c0_55 = arith.constant 0 : index
    %c2_56 = arith.constant 2 : index
    %c2_57 = arith.constant 2 : index
    %c0_58 = arith.constant 0 : index
    %27 = vector.load %arg1[%c0_55, %c2_56, %c2_57, %c0_58] : memref<1x18x18x128xf32, #tpu.memory_space<vmem>>, vector<1x16x16x128xf32>
    %28 = arith.truncf %27 : vector<1x16x16x128xf32> to vector<1x16x16x128xbf16>
    %c0_59 = arith.constant 0 : index
    %c0_60 = arith.constant 0 : index
    %c0_61 = arith.constant 0 : index
    %c1024 = arith.constant 1024 : index
    %29 = vector.load %arg8[%c0_59, %c0_60, %c0_61, %c1024] : memref<1x16x16x1152xbf16, #tpu.memory_space<vmem>>, vector<1x16x16x128xbf16>
    tpu.vector_store %arg8[%c0_59, %c0_60, %c0_61, %c1024], %28 {strides = array<i32>} : memref<1x16x16x1152xbf16, #tpu.memory_space<vmem>>, vector<1x16x16x128xbf16>,
    %c0_62 = arith.constant 0 : index
    %c0_63 = arith.constant 0 : index
    %c0_64 = arith.constant 0 : index
    %c0_65 = arith.constant 0 : index
    %30 = vector.load %arg8[%c0_62, %c0_63, %c0_64, %c0_65] : memref<1x16x16x1152xbf16, #tpu.memory_space<vmem>>, vector<1x16x16x1152xbf16>
    %31 = vector.shape_cast %30 : vector<1x16x16x1152xbf16> to vector<256x1152xbf16>
    %c0_66 = arith.constant 0 : index
    %c0_67 = arith.constant 0 : index
    %32 = vector.load %arg3[%c0_66, %c0_67] : memref<1152x128xbf16, #tpu.memory_space<vmem>>, vector<1152x128xbf16>
    %cst = arith.constant dense<0.000000e+00> : vector<256x128xf32>
    %33 = tpu.matmul %31, %32, %cst {dimension_numbers = #tpu.dot_dimension_numbers<[1], [0], [0], [1], [0, 0, 1, 1], [], []>} : vector<256x1152xbf16>, vector<1152x128xbf16>, vector<256x128xf32> -> vector<256x128xf32>
    %c0_68 = arith.constant 0 : index
    %c0_69 = arith.constant 0 : index
    %34 = vector.load %arg5[%c0_68, %c0_69] : memref<1x128xf32, #tpu.memory_space<vmem>>, vector<1x128xf32>
    %35 = vector.broadcast %34 : vector<1x128xf32> to vector<256x128xf32>
    %36 = arith.addf %33, %35 : vector<256x128xf32>
    %37 = arith.negf %36 : vector<256x128xf32>
    %38 = math.exp %37 : vector<256x128xf32>
    %cst_70 = arith.constant 1.000000e+00 : f32
    %39 = vector.broadcast %cst_70 : f32 to vector<256x128xf32>
    %40 = arith.addf %39, %38 : vector<256x128xf32>
    %41 = arith.divf %39, %40 : vector<256x128xf32>
    %c0_71 = arith.constant 0 : index
    %c0_72 = arith.constant 0 : index
    %c0_73 = arith.constant 0 : index
    %c0_74 = arith.constant 0 : index
    %42 = vector.load %arg2[%c0_71, %c0_72, %c0_73, %c0_74] : memref<1x16x16x128xf32, #tpu.memory_space<vmem>>, vector<1x16x16x128xf32>
    %43 = vector.shape_cast %42 : vector<1x16x16x128xf32> to vector<256x128xf32>
    %44 = vector.extract_strided_slice %41 {offsets = [0, 32], sizes = [256, 96], strides = [1, 1]} : vector<256x128xf32> to vector<256x96xf32>
    %45 = vector.extract_strided_slice %41 {offsets = [0, 0], sizes = [256, 32], strides = [1, 1]} : vector<256x128xf32> to vector<256x32xf32>
    %46 = tpu.concatenate %44, %45 in 1 : vector<256x96xf32>, vector<256x32xf32> -> vector<256x128xf32>
    %47 = arith.mulf %43, %46 : vector<256x128xf32>
    %48 = vector.shape_cast %47 : vector<256x128xf32> to vector<1x16x16x128xf32>
    %c0_75 = arith.constant 0 : index
    %c1_76 = arith.constant 1 : index
    %c1_77 = arith.constant 1 : index
    %c0_78 = arith.constant 0 : index
    %49 = vector.load %arg9[%c0_75, %c1_76, %c1_77, %c0_78] : memref<1x18x18x128xf32, #tpu.memory_space<vmem>>, vector<1x16x16x128xf32>
    tpu.vector_store %arg9[%c0_75, %c1_76, %c1_77, %c0_78], %48 {strides = array<i32>} : memref<1x18x18x128xf32, #tpu.memory_space<vmem>>, vector<1x16x16x128xf32>,
    %c0_79 = arith.constant 0 : index
    %c0_80 = arith.constant 0 : index
    %c0_81 = arith.constant 0 : index
    %c0_82 = arith.constant 0 : index
    %50 = vector.load %arg9[%c0_79, %c0_80, %c0_81, %c0_82] : memref<1x18x18x128xf32, #tpu.memory_space<vmem>>, vector<1x16x16x128xf32>
    %51 = arith.truncf %50 : vector<1x16x16x128xf32> to vector<1x16x16x128xbf16>
    %c0_83 = arith.constant 0 : index
    %c0_84 = arith.constant 0 : index
    %c0_85 = arith.constant 0 : index
    %c0_86 = arith.constant 0 : index
    %52 = vector.load %arg8[%c0_83, %c0_84, %c0_85, %c0_86] : memref<1x16x16x1152xbf16, #tpu.memory_space<vmem>>, vector<1x16x16x128xbf16>
    tpu.vector_store %arg8[%c0_83, %c0_84, %c0_85, %c0_86], %51 {strides = array<i32>} : memref<1x16x16x1152xbf16, #tpu.memory_space<vmem>>, vector<1x16x16x128xbf16>,
    %c0_87 = arith.constant 0 : index
    %c0_88 = arith.constant 0 : index
    %c1_89 = arith.constant 1 : index
    %c0_90 = arith.constant 0 : index
    %53 = vector.load %arg9[%c0_87, %c0_88, %c1_89, %c0_90] : memref<1x18x18x128xf32, #tpu.memory_space<vmem>>, vector<1x16x16x128xf32>
    %54 = arith.truncf %53 : vector<1x16x16x128xf32> to vector<1x16x16x128xbf16>
    %c0_91 = arith.constant 0 : index
    %c0_92 = arith.constant 0 : index
    %c0_93 = arith.constant 0 : index
    %c128_94 = arith.constant 128 : index
    %55 = vector.load %arg8[%c0_91, %c0_92, %c0_93, %c128_94] : memref<1x16x16x1152xbf16, #tpu.memory_space<vmem>>, vector<1x16x16x128xbf16>
    tpu.vector_store %arg8[%c0_91, %c0_92, %c0_93, %c128_94], %54 {strides = array<i32>} : memref<1x16x16x1152xbf16, #tpu.memory_space<vmem>>, vector<1x16x16x128xbf16>,
    %c0_95 = arith.constant 0 : index
    %c0_96 = arith.constant 0 : index
    %c2_97 = arith.constant 2 : index
    %c0_98 = arith.constant 0 : index
    %56 = vector.load %arg9[%c0_95, %c0_96, %c2_97, %c0_98] : memref<1x18x18x128xf32, #tpu.memory_space<vmem>>, vector<1x16x16x128xf32>
    %57 = arith.truncf %56 : vector<1x16x16x128xf32> to vector<1x16x16x128xbf16>
    %c0_99 = arith.constant 0 : index
    %c0_100 = arith.constant 0 : index
    %c0_101 = arith.constant 0 : index
    %c256_102 = arith.constant 256 : index
    %58 = vector.load %arg8[%c0_99, %c0_100, %c0_101, %c256_102] : memref<1x16x16x1152xbf16, #tpu.memory_space<vmem>>, vector<1x16x16x128xbf16>
    tpu.vector_store %arg8[%c0_99, %c0_100, %c0_101, %c256_102], %57 {strides = array<i32>} : memref<1x16x16x1152xbf16, #tpu.memory_space<vmem>>, vector<1x16x16x128xbf16>,
    %c0_103 = arith.constant 0 : index
    %c1_104 = arith.constant 1 : index
    %c0_105 = arith.constant 0 : index
    %c0_106 = arith.constant 0 : index
    %59 = vector.load %arg9[%c0_103, %c1_104, %c0_105, %c0_106] : memref<1x18x18x128xf32, #tpu.memory_space<vmem>>, vector<1x16x16x128xf32>
    %60 = arith.truncf %59 : vector<1x16x16x128xf32> to vector<1x16x16x128xbf16>
    %c0_107 = arith.constant 0 : index
    %c0_108 = arith.constant 0 : index
    %c0_109 = arith.constant 0 : index
    %c384_110 = arith.constant 384 : index
    %61 = vector.load %arg8[%c0_107, %c0_108, %c0_109, %c384_110] : memref<1x16x16x1152xbf16, #tpu.memory_space<vmem>>, vector<1x16x16x128xbf16>
    tpu.vector_store %arg8[%c0_107, %c0_108, %c0_109, %c384_110], %60 {strides = array<i32>} : memref<1x16x16x1152xbf16, #tpu.memory_space<vmem>>, vector<1x16x16x128xbf16>,
    %c0_111 = arith.constant 0 : index
    %c1_112 = arith.constant 1 : index
    %c1_113 = arith.constant 1 : index
    %c0_114 = arith.constant 0 : index
    %62 = vector.load %arg9[%c0_111, %c1_112, %c1_113, %c0_114] : memref<1x18x18x128xf32, #tpu.memory_space<vmem>>, vector<1x16x16x128xf32>
    %63 = arith.truncf %62 : vector<1x16x16x128xf32> to vector<1x16x16x128xbf16>
    %c0_115 = arith.constant 0 : index
    %c0_116 = arith.constant 0 : index
    %c0_117 = arith.constant 0 : index
    %c512_118 = arith.constant 512 : index
    %64 = vector.load %arg8[%c0_115, %c0_116, %c0_117, %c512_118] : memref<1x16x16x1152xbf16, #tpu.memory_space<vmem>>, vector<1x16x16x128xbf16>
    tpu.vector_store %arg8[%c0_115, %c0_116, %c0_117, %c512_118], %63 {strides = array<i32>} : memref<1x16x16x1152xbf16, #tpu.memory_space<vmem>>, vector<1x16x16x128xbf16>,
    %c0_119 = arith.constant 0 : index
    %c1_120 = arith.constant 1 : index
    %c2_121 = arith.constant 2 : index
    %c0_122 = arith.constant 0 : index
    %65 = vector.load %arg9[%c0_119, %c1_120, %c2_121, %c0_122] : memref<1x18x18x128xf32, #tpu.memory_space<vmem>>, vector<1x16x16x128xf32>
    %66 = arith.truncf %65 : vector<1x16x16x128xf32> to vector<1x16x16x128xbf16>
    %c0_123 = arith.constant 0 : index
    %c0_124 = arith.constant 0 : index
    %c0_125 = arith.constant 0 : index
    %c640_126 = arith.constant 640 : index
    %67 = vector.load %arg8[%c0_123, %c0_124, %c0_125, %c640_126] : memref<1x16x16x1152xbf16, #tpu.memory_space<vmem>>, vector<1x16x16x128xbf16>
    tpu.vector_store %arg8[%c0_123, %c0_124, %c0_125, %c640_126], %66 {strides = array<i32>} : memref<1x16x16x1152xbf16, #tpu.memory_space<vmem>>, vector<1x16x16x128xbf16>,
    %c0_127 = arith.constant 0 : index
    %c2_128 = arith.constant 2 : index
    %c0_129 = arith.constant 0 : index
    %c0_130 = arith.constant 0 : index
    %68 = vector.load %arg9[%c0_127, %c2_128, %c0_129, %c0_130] : memref<1x18x18x128xf32, #tpu.memory_space<vmem>>, vector<1x16x16x128xf32>
    %69 = arith.truncf %68 : vector<1x16x16x128xf32> to vector<1x16x16x128xbf16>
    %c0_131 = arith.constant 0 : index
    %c0_132 = arith.constant 0 : index
    %c0_133 = arith.constant 0 : index
    %c768_134 = arith.constant 768 : index
    %70 = vector.load %arg8[%c0_131, %c0_132, %c0_133, %c768_134] : memref<1x16x16x1152xbf16, #tpu.memory_space<vmem>>, vector<1x16x16x128xbf16>
    tpu.vector_store %arg8[%c0_131, %c0_132, %c0_133, %c768_134], %69 {strides = array<i32>} : memref<1x16x16x1152xbf16, #tpu.memory_space<vmem>>, vector<1x16x16x128xbf16>,
    %c0_135 = arith.constant 0 : index
    %c2_136 = arith.constant 2 : index
    %c1_137 = arith.constant 1 : index
    %c0_138 = arith.constant 0 : index
    %71 = vector.load %arg9[%c0_135, %c2_136, %c1_137, %c0_138] : memref<1x18x18x128xf32, #tpu.memory_space<vmem>>, vector<1x16x16x128xf32>
    %72 = arith.truncf %71 : vector<1x16x16x128xf32> to vector<1x16x16x128xbf16>
    %c0_139 = arith.constant 0 : index
    %c0_140 = arith.constant 0 : index
    %c0_141 = arith.constant 0 : index
    %c896_142 = arith.constant 896 : index
    %73 = vector.load %arg8[%c0_139, %c0_140, %c0_141, %c896_142] : memref<1x16x16x1152xbf16, #tpu.memory_space<vmem>>, vector<1x16x16x128xbf16>
    tpu.vector_store %arg8[%c0_139, %c0_140, %c0_141, %c896_142], %72 {strides = array<i32>} : memref<1x16x16x1152xbf16, #tpu.memory_space<vmem>>, vector<1x16x16x128xbf16>,
    %c0_143 = arith.constant 0 : index
    %c2_144 = arith.constant 2 : index
    %c2_145 = arith.constant 2 : index
    %c0_146 = arith.constant 0 : index
    %74 = vector.load %arg9[%c0_143, %c2_144, %c2_145, %c0_146] : memref<1x18x18x128xf32, #tpu.memory_space<vmem>>, vector<1x16x16x128xf32>
    %75 = arith.truncf %74 : vector<1x16x16x128xf32> to vector<1x16x16x128xbf16>
    %c0_147 = arith.constant 0 : index
    %c0_148 = arith.constant 0 : index
    %c0_149 = arith.constant 0 : index
    %c1024_150 = arith.constant 1024 : index
    %76 = vector.load %arg8[%c0_147, %c0_148, %c0_149, %c1024_150] : memref<1x16x16x1152xbf16, #tpu.memory_space<vmem>>, vector<1x16x16x128xbf16>
    tpu.vector_store %arg8[%c0_147, %c0_148, %c0_149, %c1024_150], %75 {strides = array<i32>} : memref<1x16x16x1152xbf16, #tpu.memory_space<vmem>>, vector<1x16x16x128xbf16>,
    %c0_151 = arith.constant 0 : index
    %c0_152 = arith.constant 0 : index
    %c0_153 = arith.constant 0 : index
    %c0_154 = arith.constant 0 : index
    %77 = vector.load %arg8[%c0_151, %c0_152, %c0_153, %c0_154] : memref<1x16x16x1152xbf16, #tpu.memory_space<vmem>>, vector<1x16x16x1152xbf16>
    %78 = vector.shape_cast %77 : vector<1x16x16x1152xbf16> to vector<256x1152xbf16>
    %c0_155 = arith.constant 0 : index
    %c0_156 = arith.constant 0 : index
    %79 = vector.load %arg4[%c0_155, %c0_156] : memref<1152x128xbf16, #tpu.memory_space<vmem>>, vector<1152x128xbf16>
    %cst_157 = arith.constant dense<0.000000e+00> : vector<256x128xf32>
    %80 = tpu.matmul %78, %79, %cst_157 {dimension_numbers = #tpu.dot_dimension_numbers<[1], [0], [0], [1], [0, 0, 1, 1], [], []>} : vector<256x1152xbf16>, vector<1152x128xbf16>, vector<256x128xf32> -> vector<256x128xf32>
    %81 = vector.extract_strided_slice %33 {offsets = [0, 64], sizes = [256, 64], strides = [1, 1]} : vector<256x128xf32> to vector<256x64xf32>
    %82 = vector.extract_strided_slice %33 {offsets = [0, 0], sizes = [256, 64], strides = [1, 1]} : vector<256x128xf32> to vector<256x64xf32>
    %83 = tpu.concatenate %81, %82 in 1 : vector<256x64xf32>, vector<256x64xf32> -> vector<256x128xf32>
    %84 = arith.addf %80, %83 : vector<256x128xf32>
    %c0_158 = arith.constant 0 : index
    %c0_159 = arith.constant 0 : index
    %85 = vector.load %arg6[%c0_158, %c0_159] : memref<1x128xf32, #tpu.memory_space<vmem>>, vector<1x128xf32>
    %86 = vector.broadcast %85 : vector<1x128xf32> to vector<256x128xf32>
    %87 = arith.addf %84, %86 : vector<256x128xf32>
    %88 = math.tanh %87 : vector<256x128xf32>
    %89 = arith.subf %88, %43 : vector<256x128xf32>
    %90 = arith.mulf %41, %89 : vector<256x128xf32>
    %91 = arith.addf %43, %90 : vector<256x128xf32>
    %92 = vector.shape_cast %91 : vector<256x128xf32> to vector<1x256x128xf32>
    %c0_160 = arith.constant 0 : index
    %c0_161 = arith.constant 0 : index
    %c0_162 = arith.constant 0 : index
    %93 = vector.load %arg7[%c0_160, %c0_161, %c0_162] : memref<1x256x128xf32, #tpu.memory_space<vmem>>, vector<1x256x128xf32>
    tpu.vector_store %arg7[%c0_160, %c0_161, %c0_162], %92 {strides = array<i32>} : memref<1x256x128xf32, #tpu.memory_space<vmem>>, vector<1x256x128xf32>,
    return
  }
  func.func @transform_0(%arg0: i32) -> (i32, i32, i32, i32) {
    %c0_i32 = arith.constant 0 : i32
    %c0_i32_0 = arith.constant 0 : i32
    %c0_i32_1 = arith.constant 0 : i32
    %c0_i32_2 = arith.constant 0 : i32
    return %arg0, %c0_i32, %c0_i32_0, %c0_i32_1 : i32, i32, i32, i32
  }
  func.func @transform_1(%arg0: i32) -> (i32, i32, i32, i32) {
    %c0_i32 = arith.constant 0 : i32
    %c0_i32_0 = arith.constant 0 : i32
    %c0_i32_1 = arith.constant 0 : i32
    %c0_i32_2 = arith.constant 0 : i32
    return %arg0, %c0_i32, %c0_i32_0, %c0_i32_1 : i32, i32, i32, i32
  }
  func.func @transform_2(%arg0: i32) -> (i32, i32) {
    %c0_i32 = arith.constant 0 : i32
    %c0_i32_0 = arith.constant 0 : i32
    %c0_i32_1 = arith.constant 0 : i32
    return %c0_i32, %c0_i32_0 : i32, i32
  }
  func.func @transform_3(%arg0: i32) -> (i32, i32) {
    %c0_i32 = arith.constant 0 : i32
    %c0_i32_0 = arith.constant 0 : i32
    %c0_i32_1 = arith.constant 0 : i32
    return %c0_i32, %c0_i32_0 : i32, i32
  }
  func.func @transform_4(%arg0: i32) -> (i32, i32) {
    %c0_i32 = arith.constant 0 : i32
    %c0_i32_0 = arith.constant 0 : i32
    %c0_i32_1 = arith.constant 0 : i32
    return %c0_i32, %c0_i32_0 : i32, i32
  }
  func.func @transform_5(%arg0: i32) -> (i32, i32) {
    %c0_i32 = arith.constant 0 : i32
    %c0_i32_0 = arith.constant 0 : i32
    %c0_i32_1 = arith.constant 0 : i32
    return %c0_i32, %c0_i32_0 : i32, i32
  }
  func.func @transform_6(%arg0: i32) -> (i32, i32, i32) {
    %c0_i32 = arith.constant 0 : i32
    %c0_i32_0 = arith.constant 0 : i32
    %c0_i32_1 = arith.constant 0 : i32
    return %arg0, %c0_i32, %c0_i32_0 : i32, i32, i32
  }
}

</mosaic_0001>

<bundles_post_ra>
// kernel: tpu_custom_call.1
= control target key start
LH: loop header
LB: loop body
LE: loop exit
PB: predicated region body
PF: predicated region fallthrough
CT: control target
= control target key end

     0   :  { %11 = vsyncpa [#allocation5], 0  ;;  %s9513_s0 = inlined_call_operand.vmem [shape: f32[2,18,18,128], index: 0, kind: input, shape index: {}]   ;;  %s9514_s1 = inlined_call_operand.hbm [shape: f32[2,16,16,128], index: 1, kind: input, shape index: {}]   ;;  %s9515_s2 = inlined_call_operand.vmem [shape: bf16[1152,128], index: 2, kind: input, shape index: {}]   ;;  %s9516_s3 = inlined_call_operand.vmem [shape: bf16[1152,128], index: 3, kind: input, shape index: {}]   ;;  %s9517_s4 = inlined_call_operand.vmem [shape: f32[1,128], index: 4, kind: input, shape index: {}]   ;;  %s9518_s5 = inlined_call_operand.vmem [shape: f32[1,128], index: 5, kind: input, shape index: {}]   ;;  %s9519_s6 = inlined_call_operand.hbm [shape: f32[2,256,128], index: 6, kind: output, shape index: {}]  }
   0x1   :  { %13 = vsyncpa [#allocation5 + $0x1], 0 }
   0x2   :  { %14 = vsyncpa [#allocation6], 0 }
   0x3   :  { %16 = vsyncpa [#allocation6 + $0x1], 0  ;;  %s7428_s21 = smov 0   ;;  %s7430_s22 = smov 0  }
   0x4   :  { %s7432_s23 = smov 0   ;;  %s7434_s24 = smov 0  }
   0x5 LB: > { %s7449_s25 = sadd.s32 4294967295, %s7382_s24   ;;  %s5436_s26 = sadd.s32 4294967294, %s7382_s24   ;;  %s7382_s24 = sphi %s7434_s24, %s9601_s24   ;;  %s7378_s23 = sphi %s7432_s23, %s9600_s23   ;;  %s7374_s22 = sphi %s7430_s22, %s9599_s22   ;;  %s7370_s21 = sphi %s7428_s21, %s9598_s21  }
   0x6   : > { %s7453_s27 = sadd.s32 1, %s7382_s24   ;;  %s55_s28 = sadd.s32 1, %s7378_s23 }
   0x7   : > { %s52_s29 = ssub.s32 %s7382_s24, %s7453_s27  ;;  %p62_p0 = scmp.ne.s32.totalorder %s7378_s23, %s7374_s22 }
   0x8   : > { %p53_p1 = scmp.eq.s32.totalorder %s52_s29, 0  ;;  %p63_p2 = scmp.eq.s32.totalorder %s7382_s24, 0 }
   0x9   : > { %p68_p3 = scmp.ne.s32.totalorder %s7374_s22, %s7370_s21  ;;  %p69_p4 = scmp.eq.s32.totalorder %s7449_s25, 0 }
   0xa   : > { %s7465_s30 = scalar_select %p53_p1, %s7378_s23, %s55_s28  }
   0xb   : > { %p7467_p5 = por %p63_p2, %p62_p0  ;;  %p7471_p6 = por %p69_p4, %p68_p3 }
   0xc   : > { %p176_p7 = scmp.eq.s32.totalorder %s7449_s25, 1  ;;  %p182_p8 = scmp.eq.s32.totalorder %s5436_s26, 1 }
   0xd   : > { %p6877_p10 = scmp.lt.s32.totalorder %s7382_s24, 2  ;;  %s222_s11 = sand.u32 1, %s7378_s23  }
   0xe   : > { %p7478_p11 = por %p176_p7, %p62_p0  ;;  %p7482_p12 = por %p182_p8, %p68_p3 }
   0xf   : > { %s5822_s12 = sshll.u32 %s7382_s24, 12  ;;  %s5439_s13 = sshll.u32 %s222_s11, 8 }
  0x10   : > { %s9546_s9 = scalar_select %p7478_p11, 1, 0 }
  0x11   : > { %s9547_s10 = scalar_select %p7482_p12, 1, 0 }
  0x12   : > { %s7491_s16 = scalar_lea.hbm %s9514_s1, %s5822_s12  ;;  %s226_s17 = scalar_lea.vmem [#allocation4], %s5439_s13 }
  0x13   : > { %s233_s18 = sshll.u32 %s226_s17, 4  ;;  %p7495_p13 = pnand %p6877_p10, %p7467_p5  ;;  %s7499_s18 = int_to_ptr.vmem [resolvable:$true] %s233_s18 }
  0x14   : > { %s7501_s20 = scalar_lea.sflag [#allocation5], %s222_s11  ;;  %s7286_s26 = scalar_lea.hbm %s7491_s16, 4096 }
  0x15   : > { %p7287_p0 = scmp.ne.s32.totalorder %s7491_s16, %s7286_s26  ;;  %p7288_p1 = pneg %p7495_p13 }
  0x16   : > { %s7291_s7 = scalar_lea.hbm %s9514_s1, 8192  ;;  %p7292_p4 = scmp.lt.u32.totalorder %s7491_s16, %s9514_s1 }
  0x17   : > { %p7289_p2 = pnand %p7288_p1, %p7287_p0  ;;  %p7293_p5 = scmp.lt.u32.totalorder %s7291_s7, %s7286_s26 }
  0x18   : > { %p7295_p8 = scmp.lt.u32.totalorder %s7286_s26, %s7491_s16 }
  0x19   : > { %p7290_p3 = pneg %p7289_p2  ;;  %p7294_p7 = por %p7293_p5, %p7292_p4 }
  0x1b   : > { %p7296_p10 = por %p7295_p8, %p7294_p7 }
  0x1d   : > { %p7297_p9 = pnand %p7296_p10, %p7290_p3 }
  0x1f   : > { %7300 = shalt.err (!%p7297_p9)
}
  0x20   : > { %s7301_s11 = scalar_lea.vmem %s7499_s18, 4096  ;;  %s7384_s14 = smov [#allocation4]  }
  0x21   : > { %p7302_p0 = scmp.ne.s32.totalorder %s7499_s18, %s7301_s11  ;;  %s7306_s15 = sshll.u32 %s7384_s14, 4  ;;  %s7307_s15 = int_to_ptr.vmem [resolvable:$false] %s7306_s15 }
  0x22   : > { %s7308_s17 = scalar_lea.vmem %s7307_s15, 8192  ;;  %p7309_p11 = scmp.lt.s32.totalorder %s7499_s18, %s7307_s15 }
  0x23   : > { %p7304_p2 = pnand %p7302_p0, %p7288_p1  ;;  %p7310_p4 = scmp.lt.s32.totalorder %s7308_s17, %s7301_s11 }
  0x25   : > { %p7305_p12 = pneg %p7304_p2  ;;  %p7311_p5 = por %p7310_p4, %p7309_p11 }
  0x27   : > { %p7312_p7 = pnand %p7311_p5, %p7305_p12 }
  0x29   : > { %7315 = shalt.err (!%p7312_p7)
}
  0x2a   : > { %s7385_s26 = smov 128   ;;  %s7386_s28 = smov 8  }
  0x2b   : > { %6872 = dma.hbm_to_vmem [thread:$0]  (!%p7495_p13), %s7491_s16, 4096, %s7499_s18, %s7501_s20, %s7385_s26, %s7385_s26, %s7386_s28  }
  0x2c   : > { %p5442_p9 = scmp.ge.s32.totalorder %s7382_s24, 1  ;;  %p241_p1 = scmp.lt.s32.totalorder %s7382_s24, 3 }
  0x2e   : > { %p242_p3 = pnand %p5442_p9, %p241_p1 }
  0x30   : > { %245 = sbr.rel (%p242_p3) target bundleno = 1309 (0x51d), region = 44 }
  0x37   : > { %s7532_s29 = sand.u32 1, %s7374_s22  }
  0x38   : > { %s5443_s7 = sshll.u32 %s7532_s29, 8  ;;  %s248_s12 = scalar_lea.sflag [#allocation5], %s7532_s29 }
  0x39   : > { %s7536_s13 = scalar_lea.vmem [#allocation4], %s5443_s7 }
  0x3a   : > { %7361 = dma.done.wait (%p7471_p6), %s248_s12, 4096  }
  0x3b   : > { %7363 = vsyncadd (%p7471_p6), %s248_s12, 4294963200  ;;  %p285_p11 = scmp.lt.s32.totalorder %s7449_s25, 1  ;;  %s7549_s14 = scalar_lea.vmem [#allocation7], %s5443_s7 }
  0x3c   : > { %p5446_p12 = scmp.ne.s32.totalorder %s7449_s25, 0 }
  0x3d   : > { %s286_s16 = scalar_select %p285_p11, %s7449_s25, 1 }
  0x3e   : > { %294 = sbr.rel (%p5446_p12) target bundleno = 90 (0x5a), region = 52  ;;  %v7387_v0 = vmov (!%p5446_p12), 0.0  }
  0x3f   : > { %s6864_s18 = smul.u32 432, %s286_s16  ;;  %295 = vst [vmem:[#allocation3] sm:$0xff] (!%p5446_p12), %v7387_v0  ;;  %296 = vst [vmem:[#allocation3 + $0x8] sm:$0xff] (!%p5446_p12), %v7387_v0 }
  0x40   : > { %297 = vst [vmem:[#allocation3 + $0x10] sm:$0x3] (!%p5446_p12), %v7387_v0  ;;  %298 = vst [vmem:[#allocation3 + $0x18] sm:$0xff] (!%p5446_p12), %v7387_v0 }
  0x41   : > { %s7547_s11 = scalar_lea.vmem %s9513_s0, %s6864_s18  ;;  %299 = vst [vmem:[#allocation3 + $0x20] sm:$0xff] (!%p5446_p12), %v7387_v0  ;;  %300 = vst [vmem:[#allocation3 + $0x28] sm:$0x3] (!%p5446_p12), %v7387_v0 }
  0x42   : > { %301 = vst [vmem:[#allocation3 + $0x30] sm:$0xff] (!%p5446_p12), %v7387_v0  ;;  %302 = vst [vmem:[#allocation3 + $0x38] sm:$0xff] (!%p5446_p12), %v7387_v0 }
  0x43   : > { %303 = vst [vmem:[#allocation3 + $0x40] sm:$0x3] (!%p5446_p12), %v7387_v0  ;;  %304 = vst [vmem:[#allocation3 + $0x48] sm:$0xff] (!%p5446_p12), %v7387_v0 }
  0x44   : > { %305 = vst [vmem:[#allocation3 + $0x50] sm:$0xff] (!%p5446_p12), %v7387_v0  ;;  %306 = vst [vmem:[#allocation3 + $0x58] sm:$0x3] (!%p5446_p12), %v7387_v0 }
  0x45   : > { %307 = vst [vmem:[#allocation3 + $0x60] sm:$0xff] %v7387_v0  ;;  %308 = vst [vmem:[#allocation3 + $0x68] sm:$0xff] %v7387_v0 }
  0x46   : > { %309 = vst [vmem:[#allocation3 + $0x70] sm:$0x3] %v7387_v0  ;;  %310 = vst [vmem:[#allocation3 + $0x78] sm:$0xff] %v7387_v0 }
  0x47   : > { %311 = vst [vmem:[#allocation3 + $0x80] sm:$0xff] %v7387_v0  ;;  %312 = vst [vmem:[#allocation3 + $0x88] sm:$0x3] %v7387_v0 }
  0x48   : > { %313 = vst [vmem:[#allocation3 + $0x90] sm:$0xff] %v7387_v0  ;;  %314 = vst [vmem:[#allocation3 + $0x98] sm:$0xff] %v7387_v0 }
  0x49   : > { %315 = vst [vmem:[#allocation3 + $0xa0] sm:$0x3] %v7387_v0  ;;  %316 = vst [vmem:[#allocation3 + $0xa8] sm:$0xff] %v7387_v0 }
  0x4a   : > { %317 = vst [vmem:[#allocation3 + $0xb0] sm:$0xff] %v7387_v0  ;;  %318 = vst [vmem:[#allocation3 + $0xb8] sm:$0x3] %v7387_v0 }
  0x4b   : > { %319 = vst [vmem:[#allocation3 + $0xc0] sm:$0xff] %v7387_v0  ;;  %320 = vst [vmem:[#allocation3 + $0xc8] sm:$0xff] %v7387_v0 }
  0x4c   : > { %321 = vst [vmem:[#allocation3 + $0xd0] sm:$0x3] %v7387_v0  ;;  %322 = vst [vmem:[#allocation3 + $0xd8] sm:$0xff] %v7387_v0 }
  0x4d   : > { %323 = vst [vmem:[#allocation3 + $0xe0] sm:$0xff] %v7387_v0  ;;  %324 = vst [vmem:[#allocation3 + $0xe8] sm:$0x3] %v7387_v0 }
  0x4e   : > { %325 = vst [vmem:[#allocation3 + $0xf0] sm:$0xff] %v7387_v0  ;;  %326 = vst [vmem:[#allocation3 + $0xf8] sm:$0xff] %v7387_v0 }
  0x4f   : > { %327 = vst [vmem:[#allocation3 + $0x100] sm:$0x3] %v7387_v0  ;;  %328 = vst [vmem:[#allocation3 + $0x108] sm:$0xff] %v7387_v0 }
  0x50   : > { %329 = vst [vmem:[#allocation3 + $0x110] sm:$0xff] %v7387_v0  ;;  %330 = vst [vmem:[#allocation3 + $0x118] sm:$0x3] %v7387_v0 }
  0x51   : > { %331 = vst [vmem:[#allocation3 + $0x120] sm:$0xff] %v7387_v0  ;;  %332 = vst [vmem:[#allocation3 + $0x128] sm:$0xff] %v7387_v0 }
  0x52   : > { %333 = vst [vmem:[#allocation3 + $0x130] sm:$0x3] %v7387_v0  ;;  %334 = vst [vmem:[#allocation3 + $0x138] sm:$0xff] %v7387_v0 }
  0x53   : > { %335 = vst [vmem:[#allocation3 + $0x140] sm:$0xff] %v7387_v0  ;;  %336 = vst [vmem:[#allocation3 + $0x148] sm:$0x3] %v7387_v0 }
  0x54   : > { %337 = vst [vmem:[#allocation3 + $0x150] sm:$0xff] %v7387_v0  ;;  %338 = vst [vmem:[#allocation3 + $0x158] sm:$0xff] %v7387_v0 }
  0x55   : > { %339 = vst [vmem:[#allocation3 + $0x160] sm:$0x3] %v7387_v0  ;;  %340 = vst [vmem:[#allocation3 + $0x168] sm:$0xff] %v7387_v0 }
  0x56   : > { %341 = vst [vmem:[#allocation3 + $0x170] sm:$0xff] %v7387_v0  ;;  %342 = vst [vmem:[#allocation3 + $0x178] sm:$0x3] %v7387_v0 }
  0x57   : > { %343 = vst [vmem:[#allocation3 + $0x180] sm:$0xff] %v7387_v0  ;;  %344 = vst [vmem:[#allocation3 + $0x188] sm:$0xff] %v7387_v0 }
  0x58   : > { %345 = vst [vmem:[#allocation3 + $0x190] sm:$0x3] %v7387_v0  ;;  %346 = vst [vmem:[#allocation3 + $0x198] sm:$0xff] %v7387_v0 }
  0x59   : > { %347 = vst [vmem:[#allocation3 + $0x1a0] sm:$0xff] %v7387_v0  ;;  %348 = vst [vmem:[#allocation3 + $0x1a8] sm:$0x3] %v7387_v0 }
  0x5a PF: > { %v6918_v1 = vld [vmem:[%s9515_s2 + $0x40] sm:$0xff]   ;;  %v6922_v5 = vld [vmem:[%s9515_s2 + $0x48] sm:$0xff]   ;;  %v6926_v9 = vld [vmem:[%s9515_s2 + $0x50] sm:$0xff]   ;;  %s7388_s7 = smov 96   ;;  %s7389_s18 = smov 64  }
  0x5b   : > { %v6919_v2 = vld [vmem:[%s9515_s2 + $0xc0] sm:$0xff]   ;;  %5824 = vmatprep.subr.bf16.mxu0 %v6918_v1  ;;  %v6923_v6 = vld [vmem:[%s9515_s2 + $0xc8] sm:$0xff]   ;;  %v6927_v10 = vld [vmem:[%s9515_s2 + $0xd0] sm:$0xff]   ;;  %s5351_s19 = sshll.u32 %s7549_s14, 4  ;;  %p9595_p13 = scmp.ne.s32.totalorder %s9546_s9, 0  ;;  %s9466_s19 = int_to_ptr.vmem [resolvable:$true] %s5351_s19 }
  0x5c   : > { %v6920_v3 = vld [vmem:[%s9515_s2] sm:$0xff]   ;;  %5936 = vmatprep.subr.bf16.mxu1 %v6919_v2  ;;  %v6924_v7 = vld [vmem:[%s9515_s2 + $0x8] sm:$0xff]   ;;  %v6928_v11 = vld [vmem:[%s9515_s2 + $0x10] sm:$0xff]   ;;  %s7390_s17 = smov [#allocation7]  }
  0x5d   : > { %v6921_v4 = vld [vmem:[%s9515_s2 + $0x80] sm:$0xff]   ;;  %5825 = vmatpush3.bf16.msra.mxu0 %v6920_v3  ;;  %v6925_v8 = vld [vmem:[%s9515_s2 + $0x88] sm:$0xff]   ;;  %v6929_v12 = vld [vmem:[%s9515_s2 + $0x90] sm:$0xff]  }
  0x5e   : > { %5937 = vmatpush3.bf16.msra.mxu1 %v6921_v4  ;;  %5826 = vmatprep.subr.bf16.mxu0 %v6922_v5  ;;  %v6930_v13 = vld [vmem:[%s9515_s2 + $0x58] sm:$0xff]   ;;  %v6934_v17 = vld [vmem:[%s9515_s2 + $0x60] sm:$0xff]   ;;  %v6938_v21 = vld [vmem:[%s9515_s2 + $0x68] sm:$0xff]  }
  0x5f   : > { %5938 = vmatprep.subr.bf16.mxu1 %v6923_v6  ;;  %v6931_v14 = vld [vmem:[%s9515_s2 + $0xd8] sm:$0xff]   ;;  %v6935_v18 = vld [vmem:[%s9515_s2 + $0xe0] sm:$0xff]   ;;  %v6939_v22 = vld [vmem:[%s9515_s2 + $0xe8] sm:$0xff]  }
  0x60   : > { %v6932_v15 = vld [vmem:[%s9515_s2 + $0x18] sm:$0xff]   ;;  %v6936_v19 = vld [vmem:[%s9515_s2 + $0x20] sm:$0xff]   ;;  %v6940_v23 = vld [vmem:[%s9515_s2 + $0x28] sm:$0xff]  }
  0x61   : > { %5827 = vmatpush3.bf16.msra.mxu0 %v6924_v7  ;;  %v6933_v16 = vld [vmem:[%s9515_s2 + $0x98] sm:$0xff]   ;;  %v6937_v20 = vld [vmem:[%s9515_s2 + $0xa0] sm:$0xff]   ;;  %v6941_v24 = vld [vmem:[%s9515_s2 + $0xa8] sm:$0xff]  }
  0x62   : > { %5939 = vmatpush3.bf16.msra.mxu1 %v6925_v8  ;;  %5828 = vmatprep.subr.bf16.mxu0 %v6926_v9  ;;  %v6942_v25 = vld [vmem:[%s9515_s2 + $0x70] sm:$0xff]   ;;  %v6946_v29 = vld [vmem:[%s9515_s2 + $0x78] sm:$0xff]   ;;  %v413_v33 = vld [vmem:[%s7547_s11 + $0x1] sm:$0xff] }
  0x63   : > { %5940 = vmatprep.subr.bf16.mxu1 %v6927_v10  ;;  %v6943_v26 = vld [vmem:[%s9515_s2 + $0xf0] sm:$0xff]   ;;  %v6947_v30 = vld [vmem:[%s9515_s2 + $0xf8] sm:$0xff]   ;;  %v5448_v37 = vld [vmem:[%s7547_s11 + $0x20] sm:$0xff] }
  0x64   : > { %v6944_v27 = vld [vmem:[%s9515_s2 + $0x30] sm:$0xff]   ;;  %v6948_v31 = vld [vmem:[%s9515_s2 + $0x38] sm:$0xff]   ;;  %v349_v38 = vld [vmem:[%s7547_s11] sm:$0xff] }
  0x65   : > { %5829 = vmatpush3.bf16.msra.mxu0 %v6928_v11  ;;  %v6945_v28 = vld [vmem:[%s9515_s2 + $0xb0] sm:$0xff]   ;;  %v6949_v32 = vld [vmem:[%s9515_s2 + $0xb8] sm:$0xff]   ;;  %v350_v39 = vld [vmem:[%s7547_s11 + $0x8] sm:$0xff] }
  0x66   : > { %5941 = vmatpush3.bf16.msra.mxu1 %v6929_v12  ;;  %5830 = vmatprep.subr.bf16.mxu0 %v6930_v13  ;;  %v414_v34 = vld [vmem:[%s7547_s11 + $0x9] sm:$0xff]  ;;  %v5447_v35 = vld [vmem:[%s7547_s11 + $0x18] sm:$0xff]  ;;  %v381_v41 = vpack.c.bf16 %v350_v39, %v349_v38  ;;  %v6950_v45 = vld [vmem:[%s9515_s2 + $0x140] sm:$0xff]  }
  0x67   : > { %5942 = vmatprep.subr.bf16.mxu1 %v6931_v14  ;;  %v445_v36 = vpack.c.bf16 %v414_v34, %v413_v33  ;;  %v574_v40 = vpack.c.bf16 %v5448_v37, %v5447_v35  ;;  %v477_v42 = vld [vmem:[%s7547_s11 + $0x2] sm:$0xff]  ;;  %v478_v43 = vld [vmem:[%s7547_s11 + $0xa] sm:$0xff]  ;;  %v415_v47 = vld [vmem:[%s7547_s11 + $0x19] sm:$0xff] }
  0x68   : > { %v509_v44 = vpack.c.bf16 %v478_v43, %v477_v42  ;;  %v6951_v46 = vld [vmem:[%s9515_s2 + $0x100] sm:$0xff]   ;;  %v5449_v49 = vld [vmem:[%s7547_s11 + $0x30] sm:$0xff]  ;;  %v5450_v50 = vld [vmem:[%s7547_s11 + $0x38] sm:$0xff] }
  0x69   : > { %5831 = vmatpush3.bf16.msra.mxu0 %v6932_v15  ;;  %1679 = vmatprep.mubr.bf16.mxu0 %v445_v36  ;;  %v416_v48 = vld [vmem:[%s7547_s11 + $0x21] sm:$0xff]  ;;  %v7668_v52 = vpack.c.bf16 %v5450_v50, %v5449_v49  ;;  %v417_v55 = vld [vmem:[%s7547_s11 + $0x31] sm:$0xff]  ;;  %v418_v56 = vld [vmem:[%s7547_s11 + $0x39] sm:$0xff] }
  0x6a   : > { %5943 = vmatpush3.bf16.msra.mxu1 %v6933_v16  ;;  %5832 = vmatprep.subr.bf16.mxu0 %v6934_v17  ;;  %v7666_v51 = vpack.c.bf16 %v416_v48, %v415_v47  ;;  %v479_v53 = vld [vmem:[%s7547_s11 + $0x1a] sm:$0xff]  ;;  %v480_v54 = vld [vmem:[%s7547_s11 + $0x22] sm:$0xff]  ;;  %v5452_v58 = vld [vmem:[%s7547_s11 + $0x50] sm:$0xff]  ;;  %v7680_v60 = vpack.c.bf16 %v418_v56, %v417_v55 }
  0x6b   : > { %5944 = vmatprep.subr.bf16.mxu1 %v6935_v18  ;;  %1840 = vmatprep.mubr.bf16.mxu1 %v574_v40  ;;  %v5451_v57 = vld [vmem:[%s7547_s11 + $0x48] sm:$0xff]  ;;  %v7678_v59 = vpack.c.bf16 %v480_v54, %v479_v53  ;;  %v481_v0 = vld [vmem:[%s7547_s11 + $0x32] sm:$0xff]  ;;  %v482_v1 = vld [vmem:[%s7547_s11 + $0x3a] sm:$0xff] }
  0x6c   : > { %v6952_v61 = vld [vmem:[%s9515_s2 + $0x148] sm:$0xff]   ;;  %v7685_v62 = vpack.c.bf16 %v5452_v58, %v5451_v57  ;;  %v420_v3 = vld [vmem:[%s7547_s11 + $0x51] sm:$0xff]  ;;  %v5453_v4 = vld [vmem:[%s7547_s11 + $0x60] sm:$0xff]  ;;  %v7705_v8 = vpack.c.bf16 %v482_v1, %v481_v0 }
  0x6d   : > { %5833 = vmatpush3.bf16.msra.mxu0 %v6936_v19  ;;  %v6953_v63 = vld [vmem:[%s9515_s2 + $0x108] sm:$0xff]   ;;  %v6954_v6 = vld [vmem:[%s9515_s2 + $0x150] sm:$0xff]   ;;  %v6956_v14 = vld [vmem:[%s9515_s2 + $0x158] sm:$0xff]  }
  0x6e   : > { %5945 = vmatpush3.bf16.msra.mxu1 %v6937_v20  ;;  %5834 = vmatprep.subr.bf16.mxu0 %v6938_v21  ;;  %v419_v2 = vld [vmem:[%s7547_s11 + $0x49] sm:$0xff]  ;;  %v484_v12 = vld [vmem:[%s7547_s11 + $0x52] sm:$0xff]  ;;  %v421_v13 = vld [vmem:[%s7547_s11 + $0x61] sm:$0xff] }
  0x6f   : > { %5946 = vmatprep.subr.bf16.mxu1 %v6939_v22  ;;  %v5454_v5 = vld [vmem:[%s7547_s11 + $0x68] sm:$0xff]  ;;  %v6955_v7 = vld [vmem:[%s9515_s2 + $0x110] sm:$0xff]   ;;  %v7707_v9 = vpack.c.bf16 %v420_v3, %v419_v2  ;;  %v6957_v16 = vld [vmem:[%s9515_s2 + $0x118] sm:$0xff]  }
  0x70   : > { %v7709_v10 = vpack.c.bf16 %v5454_v5, %v5453_v4  ;;  %v483_v11 = vld [vmem:[%s7547_s11 + $0x4a] sm:$0xff]  ;;  %v5455_v17 = vld [vmem:[%s7547_s11 + $0x78] sm:$0xff]  ;;  %v5456_v18 = vld [vmem:[%s7547_s11 + $0x80] sm:$0xff] }
  0x71   : > { %5835 = vmatpush3.bf16.msra.mxu0 %v6940_v23  ;;  %v422_v15 = vld [vmem:[%s7547_s11 + $0x69] sm:$0xff]  ;;  %v7727_v19 = vpack.c.bf16 %v484_v12, %v483_v11  ;;  %v7731_v21 = vpack.c.bf16 %v5456_v18, %v5455_v17  ;;  %v6958_v22 = vld [vmem:[%s9515_s2 + $0x160] sm:$0xff]   ;;  %v425_v37 = vld [vmem:[%s7547_s11 + $0x91] sm:$0xff] }
  0x72   : > { %5947 = vmatpush3.bf16.msra.mxu1 %v6941_v24  ;;  %5836 = vmatprep.subr.bf16.mxu0 %v6942_v25  ;;  %v7729_v20 = vpack.c.bf16 %v422_v15, %v421_v13  ;;  %v6959_v23 = vld [vmem:[%s9515_s2 + $0x120] sm:$0xff]   ;;  %v486_v25 = vld [vmem:[%s7547_s11 + $0x6a] sm:$0xff]  ;;  %v489_v49 = vld [vmem:[%s7547_s11 + $0x92] sm:$0xff] }
  0x73   : > { %5948 = vmatprep.subr.bf16.mxu1 %v6943_v26  ;;  %v485_v24 = vld [vmem:[%s7547_s11 + $0x62] sm:$0xff]  ;;  %v423_v26 = vld [vmem:[%s7547_s11 + $0x79] sm:$0xff]  ;;  %v6963_v42 = vld [vmem:[%s9515_s2 + $0x130] sm:$0xff]  }
  0x74   : > { %v6961_v34 = vld [vmem:[%s9515_s2 + $0x128] sm:$0xff]   ;;  %v487_v35 = vld [vmem:[%s7547_s11 + $0x7a] sm:$0xff]  ;;  %v428_v54 = vld [vmem:[%s7547_s11 + $0xb1] sm:$0xff] }
  0x75   : > { %5837 = vmatpush3.bf16.msra.mxu0 %v6944_v27  ;;  %v424_v27 = vld [vmem:[%s7547_s11 + $0x81] sm:$0xff]  ;;  %v426_v38 = vld [vmem:[%s7547_s11 + $0x99] sm:$0xff]  ;;  %v427_v53 = vld [vmem:[%s7547_s11 + $0xa9] sm:$0xff] }
  0x76   : > { %5949 = vmatpush3.bf16.msra.mxu1 %v6945_v28  ;;  %5838 = vmatprep.subr.bf16.mxu0 %v6946_v29  ;;  %v5457_v28 = vld [vmem:[%s7547_s11 + $0x90] sm:$0xff]  ;;  %v5458_v29 = vld [vmem:[%s7547_s11 + $0x98] sm:$0xff]  ;;  %v488_v36 = vld [vmem:[%s7547_s11 + $0x82] sm:$0xff]  ;;  %v7813_v0 = vpack.c.bf16 %v428_v54, %v427_v53 }
  0x77   : > { %5950 = vmatprep.subr.bf16.mxu1 %v6947_v30  ;;  %v7749_v30 = vpack.c.bf16 %v486_v25, %v485_v24  ;;  %v7756_v33 = vpack.c.bf16 %v5458_v29, %v5457_v28  ;;  %v5459_v39 = vld [vmem:[%s7547_s11 + $0xa8] sm:$0xff]  ;;  %v7777_v43 = vpack.c.bf16 %v488_v36, %v487_v35  ;;  %v6965_v47 = vld [vmem:[%s9515_s2 + $0x180] sm:$0xff]   ;;  %v6968_v58 = vld [vmem:[%s9515_s2 + $0x1d0] sm:$0xff]  }
  0x78   : > { %v6966_v48 = vld [vmem:[%s9515_s2 + $0x1c8] sm:$0xff]   ;;  %v490_v50 = vld [vmem:[%s7547_s11 + $0x9a] sm:$0xff]  ;;  %v492_v4 = vld [vmem:[%s7547_s11 + $0xb2] sm:$0xff] }
  0x79   : > { %5839 = vmatpush3.bf16.msra.mxu0 %v6948_v31  ;;  %v7751_v31 = vpack.c.bf16 %v424_v27, %v423_v26  ;;  %v6967_v55 = vld [vmem:[%s9515_s2 + $0x188] sm:$0xff]   ;;  %v5461_v56 = vld [vmem:[%s7547_s11 + $0xc0] sm:$0xff]  ;;  %v6970_v2 = vld [vmem:[%s9515_s2 + $0x1d8] sm:$0xff]  }
  0x7a   : > { %5951 = vmatpush3.bf16.msra.mxu1 %v6949_v32  ;;  %6048 = vmatprep.subr.bf16.mxu0 %v6950_v45  ;;  %v6960_v32 = vld [vmem:[%s9515_s2 + $0x168] sm:$0xff]   ;;  %v6964_v45 = vld [vmem:[%s9515_s2 + $0x1c0] sm:$0xff]   ;;  %v5463_v11 = vld [vmem:[%s7547_s11 + $0xd8] sm:$0xff] }
  0x7b   : > { %6160 = vmatprep.subr.bf16.mxu1 %v6964_v45  ;;  %v5462_v57 = vld [vmem:[%s7547_s11 + $0xc8] sm:$0xff]  ;;  %v5464_v12 = vld [vmem:[%s7547_s11 + $0xe0] sm:$0xff]  ;;  %v6972_v13 = vld [vmem:[%s9515_s2 + $0x178] sm:$0xff]  }
  0x7c   : > { %1680 = vmatmul.mubr.bf16.vlgmr.msra.gmra.mrb[0].mxu0 %v381_v41  ;;  %v6962_v41 = vld [vmem:[%s9515_s2 + $0x170] sm:$0xff]   ;;  %v7815_v1 = vpack.c.bf16 %v5462_v57, %v5461_v56  ;;  %v429_v5 = vld [vmem:[%s7547_s11 + $0xc1] sm:$0xff]  ;;  %v431_v26 = vld [vmem:[%s7547_s11 + $0xd9] sm:$0xff] }
  0x7d   : > { %1841 = vmatmul.mubr.bf16.vlgmr.msra.gmra.mrb[0].mxu1 %v509_v44  ;;  %6049 = vmatpush3.bf16.msra.mxu0 %v6951_v46  ;;  %v7779_v44 = vpack.c.bf16 %v426_v38, %v425_v37  ;;  %v491_v3 = vld [vmem:[%s7547_s11 + $0xaa] sm:$0xff]  ;;  %v6974_v15 = vld [vmem:[%s9515_s2 + $0x1e0] sm:$0xff]   ;;  %v497_v56 = vld [vmem:[%s7547_s11 + $0xf2] sm:$0xff] }
  0x7e   : > { %1687 = vmatprep.mubr.bf16.mxu0 %v7666_v51  ;;  %1848 = vmatprep.mubr.bf16.mxu1 %v7668_v52  ;;  %v7845_v17 = vpack.c.bf16 %v492_v4, %v491_v3  ;;  %v493_v24 = vld [vmem:[%s7547_s11 + $0xc2] sm:$0xff]  ;;  %v494_v25 = vld [vmem:[%s7547_s11 + $0xca] sm:$0xff]  ;;  %v498_v57 = vld [vmem:[%s7547_s11 + $0xfa] sm:$0xff] }
  0x7f   : > { %6050 = vmatprep.subr.bf16.mxu0 %v6952_v61  ;;  %6161 = vmatpush3.bf16.msra.mxu1 %v6965_v47  ;;  %v6969_v61 = vld [vmem:[%s9515_s2 + $0x190] sm:$0xff]   ;;  %v432_v27 = vld [vmem:[%s7547_s11 + $0xe1] sm:$0xff]  ;;  %v7873_v36 = vpack.c.bf16 %v494_v25, %v493_v24  ;;  %v434_v47 = vld [vmem:[%s7547_s11 + $0xf9] sm:$0xff]  ;;  %v7917_v4 = vpack.c.bf16 %v498_v57, %v497_v56 }
  0x80   : > { %6162 = vmatprep.subr.bf16.mxu1 %v6966_v48  ;;  %v6977_v28 = vld [vmem:[%s9515_s2 + $0x1a8] sm:$0xff]   ;;  %v6978_v29 = vld [vmem:[%s9515_s2 + $0x1f0] sm:$0xff]   ;;  %v7875_v37 = vpack.c.bf16 %v432_v27, %v431_v26  ;;  %v7880_v38 = vld [vmem:[%s9515_s2 + $0x200] sm:$0xff]  }
  0x81   : > { %6051 = vmatpush3.bf16.msra.mxu0 %v6953_v63  ;;  %v7811_v63 = vpack.c.bf16 %v490_v50, %v489_v49  ;;  %v6979_v35 = vld [vmem:[%s9515_s2 + $0x1b0] sm:$0xff]   ;;  %v6981_v48 = vld [vmem:[%s9515_s2 + $0x1b8] sm:$0xff]   ;;  %v5467_v49 = vld [vmem:[%s7547_s11 + $0x108] sm:$0xff] }
  0x82   : > { %6052 = vmatprep.subr.bf16.mxu0 %v6954_v6  ;;  %v430_v6 = vld [vmem:[%s7547_s11 + $0xc9] sm:$0xff]  ;;  %v433_v45 = vld [vmem:[%s7547_s11 + $0xf1] sm:$0xff]  ;;  %v439_v27 = vld [vmem:[%s7547_s11 + $0x139] sm:$0xff] }
  0x83   : > { %6163 = vmatpush3.bf16.msra.mxu1 %v6967_v55  ;;  %v7847_v18 = vpack.c.bf16 %v430_v6, %v429_v5  ;;  %v5468_v50 = vld [vmem:[%s7547_s11 + $0x110] sm:$0xff]  ;;  %v7903_v54 = vpack.c.bf16 %v434_v47, %v433_v45  ;;  %v5470_v3 = vld [vmem:[%s7547_s11 + $0x128] sm:$0xff]  ;;  %v442_v47 = vld [vmem:[%s7547_s11 + $0x159] sm:$0xff] }
  0x84   : > { %1688 = vmatmul.mubr.bf16.gmra.mrb[4].mxu0 %v574_v40  ;;  %v5460_v40 = vld [vmem:[%s7547_s11 + $0xb0] sm:$0xff]  ;;  %6164 = vmatprep.subr.bf16.mxu1 %v6968_v58  ;;  %v7905_v55 = vpack.c.bf16 %v5468_v50, %v5467_v49  ;;  %v501_v25 = vld [vmem:[%s7547_s11 + $0x122] sm:$0xff] }
  0x85   : > { %1849 = vmatmul.mubr.bf16.gmra.mrb[4].mxu1 %v7678_v59  ;;  %1695 = vmatprep.mubr.bf16.mxu0 %v7680_v60  ;;  %v7784_v46 = vpack.c.bf16 %v5460_v40, %v5459_v39  ;;  %v6980_v40 = vld [vmem:[%s9515_s2 + $0x1f8] sm:$0xff]   ;;  %v435_v58 = vld [vmem:[%s7547_s11 + $0x109] sm:$0xff] }
  0x86   : > { %1856 = vmatprep.mubr.bf16.mxu1 %v7685_v62  ;;  %6053 = vmatpush3.bf16.msra.mxu0 %v6955_v7  ;;  %v6971_v7 = vld [vmem:[%s9515_s2 + $0x198] sm:$0xff]   ;;  %v502_v26 = vld [vmem:[%s7547_s11 + $0x12a] sm:$0xff] }
  0x87   : > { %6054 = vmatprep.subr.bf16.mxu0 %v6956_v14  ;;  %6165 = vmatpush3.bf16.msra.mxu1 %v6969_v61  ;;  %v6973_v14 = vld [vmem:[%s9515_s2 + $0x138] sm:$0xff]   ;;  %v5476_v49 = vld [vmem:[%s7547_s11 + $0x170] sm:$0xff] }
  0x88   : > { %6166 = vmatprep.subr.bf16.mxu1 %v6970_v2  ;;  %v436_v61 = vld [vmem:[%s7547_s11 + $0x111] sm:$0xff]  ;;  %v5469_v2 = vld [vmem:[%s7547_s11 + $0x120] sm:$0xff] }
  0x89   : > { %v7919_v5 = vpack.c.bf16 %v436_v61, %v435_v58  ;;  %v7921_v6 = vpack.c.bf16 %v5470_v3, %v5469_v2  ;;  %v441_v45 = vld [vmem:[%s7547_s11 + $0x151] sm:$0xff]  ;;  %v506_v61 = vld [vmem:[%s7547_s11 + $0x15a] sm:$0xff]  ;;  %v443_v2 = vld [vmem:[%s7547_s11 + $0x169] sm:$0xff] }
  0x8a   : > { %6055 = vmatpush3.bf16.msra.mxu0 %v6957_v16  ;;  %v6975_v16 = vld [vmem:[%s9515_s2 + $0x1a0] sm:$0xff]   ;;  %v7967_v56 = vpack.c.bf16 %v442_v47, %v441_v45  ;;  %v505_v58 = vld [vmem:[%s7547_s11 + $0x152] sm:$0xff] }
  0x8b   : > { %6056 = vmatprep.subr.bf16.mxu0 %v6958_v22  ;;  %6167 = vmatpush3.bf16.msra.mxu1 %v6971_v7  ;;  %v7849_v22 = vpack.c.bf16 %v5464_v12, %v5463_v11  ;;  %v499_v7 = vld [vmem:[%s7547_s11 + $0x10a] sm:$0xff]  ;;  %v500_v11 = vld [vmem:[%s7547_s11 + $0x112] sm:$0xff]  ;;  %v437_v12 = vld [vmem:[%s7547_s11 + $0x121] sm:$0xff] }
  0x8c   : > { %1696 = vmatmul.mubr.bf16.gmra.mrb[8].mxu0 %v7668_v52  ;;  %6168 = vmatprep.subr.bf16.mxu1 %v6974_v15  ;;  %v5472_v15 = vld [vmem:[%s7547_s11 + $0x140] sm:$0xff]  ;;  %v444_v3 = vld [vmem:[%s7547_s11 + $0x171] sm:$0xff] }
  0x8d   : > { %1857 = vmatmul.mubr.bf16.gmra.mrb[8].mxu1 %v7705_v8  ;;  %1703 = vmatprep.mubr.bf16.mxu0 %v7707_v9 }
  0x8e   : > { %1864 = vmatprep.mubr.bf16.mxu1 %v7709_v10  ;;  %6057 = vmatpush3.bf16.msra.mxu0 %v6959_v23  ;;  %v6976_v23 = vld [vmem:[%s9515_s2 + $0x1e8] sm:$0xff]  }
  0x8f   : > { %6058 = vmatprep.subr.bf16.mxu0 %v6960_v32  ;;  %6169 = vmatpush3.bf16.msra.mxu1 %v6975_v16  ;;  %v5465_v32 = vld [vmem:[%s7547_s11 + $0xf0] sm:$0xff]  ;;  %v7933_v16 = vpack.c.bf16 %v500_v11, %v499_v7  ;;  %v5477_v7 = vld [vmem:[%s7547_s11 + $0x180] sm:$0xff]  ;;  %v5478_v11 = vld [vmem:[%s7547_s11 + $0x188] sm:$0xff] }
  0x90   : > { %6170 = vmatprep.subr.bf16.mxu1 %v6976_v23 }
  0x92   : > { %6059 = vmatpush3.bf16.msra.mxu0 %v6961_v34  ;;  %v5466_v34 = vld [vmem:[%s7547_s11 + $0xf8] sm:$0xff] }
  0x93   : > { %6060 = vmatprep.subr.bf16.mxu0 %v6962_v41  ;;  %6171 = vmatpush3.bf16.msra.mxu1 %v6977_v28  ;;  %v7882_v39 = vpack.c.bf16 %v5466_v34, %v5465_v32  ;;  %v495_v41 = vld [vmem:[%s7547_s11 + $0xda] sm:$0xff]  ;;  %v7949_v34 = vpack.c.bf16 %v502_v26, %v501_v25  ;;  %v508_v25 = vld [vmem:[%s7547_s11 + $0x172] sm:$0xff] }
  0x94   : > { %1704 = vmatmul.mubr.bf16.gmra.mrb[12].mxu0 %v7685_v62  ;;  %6172 = vmatprep.subr.bf16.mxu1 %v6978_v29  ;;  %v440_v28 = vld [vmem:[%s7547_s11 + $0x141] sm:$0xff]  ;;  %v5473_v29 = vld [vmem:[%s7547_s11 + $0x150] sm:$0xff]  ;;  %v5474_v32 = vld [vmem:[%s7547_s11 + $0x158] sm:$0xff] }
  0x95   : > { %1865 = vmatmul.mubr.bf16.gmra.mrb[12].mxu1 %v7727_v19  ;;  %1711 = vmatprep.mubr.bf16.mxu0 %v7729_v20 }
  0x96   : > { %1872 = vmatprep.mubr.bf16.mxu1 %v7731_v21  ;;  %6061 = vmatpush3.bf16.msra.mxu0 %v6963_v42  ;;  %v496_v42 = vld [vmem:[%s7547_s11 + $0xe2] sm:$0xff] }
  0x97   : > { %6062 = vmatprep.subr.bf16.mxu0 %v6972_v13  ;;  %6173 = vmatpush3.bf16.msra.mxu1 %v6979_v35  ;;  %v7901_v53 = vpack.c.bf16 %v496_v42, %v495_v41  ;;  %v438_v13 = vld [vmem:[%s7547_s11 + $0x129] sm:$0xff]  ;;  %v7951_v35 = vpack.c.bf16 %v440_v28, %v439_v27  ;;  %v503_v41 = vld [vmem:[%s7547_s11 + $0x13a] sm:$0xff] }
  0x98   : > { %6174 = vmatprep.subr.bf16.mxu1 %v6980_v40  ;;  %v7935_v23 = vpack.c.bf16 %v438_v13, %v437_v12  ;;  %v7953_v40 = vpack.c.bf16 %v5474_v32, %v5473_v29  ;;  %v504_v42 = vld [vmem:[%s7547_s11 + $0x142] sm:$0xff]  ;;  %v7981_v12 = vpack.c.bf16 %v506_v61, %v505_v58  ;;  %v7983_v13 = vpack.c.bf16 %v444_v3, %v443_v2  ;;  %v6985_v28 = vld [vmem:[%s9515_s2 + $0x218] sm:$0xff]   ;;  %v5542_v2 = vld [vmem:[%s7547_s11 + $0x18a] sm:$0xff] }
  0x99   : > { %v7965_v50 = vpack.c.bf16 %v504_v42, %v503_v41  ;;  %v6983_v27 = vld [vmem:[%s9515_s2 + $0x208] sm:$0xff]  }
  0x9a   : > { %6063 = vmatpush3.bf16.msra.mxu0 %v6973_v14  ;;  %v5471_v14 = vld [vmem:[%s7547_s11 + $0x138] sm:$0xff]  ;;  %v5541_v61 = vld [vmem:[%s7547_s11 + $0x182] sm:$0xff] }
  0x9b   : > { %6768 = vmatprep.subr.bf16.mxu0 %v7880_v38  ;;  %6175 = vmatpush3.bf16.msra.mxu1 %v6981_v48  ;;  %v7937_v24 = vpack.c.bf16 %v5472_v15, %v5471_v14  ;;  %v5475_v48 = vld [vmem:[%s7547_s11 + $0x168] sm:$0xff]  ;;  %v7985_v14 = vpack.c.bf16 %v5478_v11, %v5477_v7  ;;  %v5605_v11 = vld [vmem:[%s7547_s11 + $0x199] sm:$0xff] }
  0x9c   : > { %1712 = vmatmul.mubr.bf16.gmra.mrb[16].mxu0 %v7709_v10  ;;  %v7969_v57 = vpack.c.bf16 %v5476_v49, %v5475_v48  ;;  %v507_v15 = vld [vmem:[%s7547_s11 + $0x16a] sm:$0xff] }
  0x9d   : > { %1873 = vmatmul.mubr.bf16.gmra.mrb[16].mxu1 %v7749_v30  ;;  %1719 = vmatprep.mubr.bf16.mxu0 %v7751_v31  ;;  %v7993_v26 = vpack.c.bf16 %v508_v25, %v507_v15 }
  0x9e   : > { %1880 = vmatprep.mubr.bf16.mxu1 %v7756_v33 }
  0xa4   : > { %1720 = vmatmul.mubr.bf16.gmra.mrb[20].mxu0 %v7731_v21 }
  0xa5   : > { %1881 = vmatmul.mubr.bf16.gmra.mrb[20].mxu1 %v7777_v43  ;;  %1727 = vmatprep.mubr.bf16.mxu0 %v7779_v44 }
  0xa6   : > { %1888 = vmatprep.mubr.bf16.mxu1 %v7784_v46 }
  0xac   : > { %1728 = vmatmul.mubr.bf16.gmra.mrb[24].mxu0 %v7756_v33 }
  0xad   : > { %1889 = vmatmul.mubr.bf16.gmra.mrb[24].mxu1 %v7811_v63  ;;  %1735 = vmatprep.mubr.bf16.mxu0 %v7813_v0 }
  0xae   : > { %1896 = vmatprep.mubr.bf16.mxu1 %v7815_v1 }
  0xb4   : > { %1736 = vmatmul.mubr.bf16.gmra.mrb[28].mxu0 %v7784_v46 }
  0xb5   : > { %1897 = vmatmul.mubr.bf16.gmra.mrb[28].mxu1 %v7845_v17  ;;  %1743 = vmatprep.mubr.bf16.mxu0 %v7847_v18 }
  0xb6   : > { %1904 = vmatprep.mubr.bf16.mxu1 %v7849_v22 }
  0xbc   : > { %1744 = vmatmul.mubr.bf16.gmra.mrb[32].mxu0 %v7815_v1 }
  0xbd   : > { %1905 = vmatmul.mubr.bf16.gmra.mrb[32].mxu1 %v7873_v36  ;;  %1751 = vmatprep.mubr.bf16.mxu0 %v7875_v37 }
  0xbe   : > { %1912 = vmatprep.mubr.bf16.mxu1 %v7882_v39 }
  0xc4   : > { %1752 = vmatmul.mubr.bf16.gmra.mrb[36].mxu0 %v7849_v22 }
  0xc5   : > { %1913 = vmatmul.mubr.bf16.gmra.mrb[36].mxu1 %v7901_v53  ;;  %1759 = vmatprep.mubr.bf16.mxu0 %v7903_v54 }
  0xc6   : > { %1920 = vmatprep.mubr.bf16.mxu1 %v7905_v55 }
  0xcc   : > { %1760 = vmatmul.mubr.bf16.gmra.mrb[40].mxu0 %v7882_v39 }
  0xcd   : > { %1921 = vmatmul.mubr.bf16.gmra.mrb[40].mxu1 %v7917_v4  ;;  %1767 = vmatprep.mubr.bf16.mxu0 %v7919_v5 }
  0xce   : > { %1928 = vmatprep.mubr.bf16.mxu1 %v7921_v6 }
  0xd4   : > { %1768 = vmatmul.mubr.bf16.gmra.mrb[44].mxu0 %v7905_v55 }
  0xd5   : > { %1929 = vmatmul.mubr.bf16.gmra.mrb[44].mxu1 %v7933_v16  ;;  %1775 = vmatprep.mubr.bf16.mxu0 %v7935_v23 }
  0xd6   : > { %1936 = vmatprep.mubr.bf16.mxu1 %v7937_v24 }
  0xdc   : > { %1776 = vmatmul.mubr.bf16.gmra.mrb[48].mxu0 %v7921_v6 }
  0xdd   : > { %1937 = vmatmul.mubr.bf16.gmra.mrb[48].mxu1 %v7949_v34  ;;  %1783 = vmatprep.mubr.bf16.mxu0 %v7951_v35 }
  0xde   : > { %1944 = vmatprep.mubr.bf16.mxu1 %v7953_v40 }
  0xe4   : > { %1784 = vmatmul.mubr.bf16.gmra.mrb[52].mxu0 %v7937_v24 }
  0xe5   : > { %1945 = vmatmul.mubr.bf16.gmra.mrb[52].mxu1 %v7965_v50  ;;  %1791 = vmatprep.mubr.bf16.mxu0 %v7967_v56 }
  0xe6   : > { %1952 = vmatprep.mubr.bf16.mxu1 %v7969_v57 }
  0xec   : > { %1792 = vmatmul.mubr.bf16.gmra.mrb[56].mxu0 %v7953_v40 }
  0xed   : > { %1953 = vmatmul.mubr.bf16.gmra.mrb[56].mxu1 %v7981_v12  ;;  %1799 = vmatprep.mubr.bf16.mxu0 %v7983_v13 }
  0xee   : > { %1960 = vmatprep.mubr.bf16.mxu1 %v7985_v14 }
  0xf4   : > { %1800 = vmatmul.mubr.bf16.gmra.mrb[60].mxu0 %v7969_v57 }
  0xf5   : > { %1961 = vmatmul.mubr.bf16.gmra.mrb[60].mxu1 %v7993_v26  ;;  %2001 = vmatprep.mubr.bf16.mxu0 %v7678_v59  ;;  %v6984_v59 = vld [vmem:[%s9515_s2 + $0x210] sm:$0xff]  }
  0xf6   : > { %2162 = vmatprep.mubr.bf16.mxu1 %v7680_v60 }
  0xfc   : > { %2002 = vmatmul.mubr.bf16.vlgmr.msra.gmra.mrb[64].mxu0 %v7666_v51  ;;  %v6986_v51 = vld [vmem:[%s9515_s2 + $0x220] sm:$0xff]  }
  0xfd   : > { %6769 = vmatpush3.bf16.msra.mxu0 %v7880_v38  ;;  %2163 = vmatmul.mubr.bf16.vlgmr.msra.gmra.mrb[64].mxu1 %v7668_v52  ;;  %v6987_v52 = vld [vmem:[%s9515_s2 + $0x228] sm:$0xff]  }
  0xfe   : > { %2009 = vmatprep.mubr.bf16.mxu0 %v7705_v8  ;;  %2170 = vmatprep.mubr.bf16.mxu1 %v7707_v9 }
  0xff   : > { %6770 = vmatprep.subr.bf16.mxu0 %v6983_v27 }
 0x101   : > { %6771 = vmatpush3.bf16.msra.mxu0 %v6983_v27 }
 0x102   : > { %6772 = vmatprep.subr.bf16.mxu0 %v6984_v59 }
 0x104   : > { %2010 = vmatmul.mubr.bf16.gmra.mrb[68].mxu0 %v7680_v60  ;;  %v6988_v60 = vld [vmem:[%s9515_s2 + $0x230] sm:$0xff]  }
 0x105   : > { %2171 = vmatmul.mubr.bf16.gmra.mrb[68].mxu1 %v7685_v62  ;;  %2017 = vmatprep.mubr.bf16.mxu0 %v7727_v19  ;;  %v6989_v62 = vld [vmem:[%s9515_s2 + $0x238] sm:$0xff]  }
 0x106   : > { %2178 = vmatprep.mubr.bf16.mxu1 %v7729_v20  ;;  %6773 = vmatpush3.bf16.msra.mxu0 %v6984_v59 }
 0x107   : > { %6774 = vmatprep.subr.bf16.mxu0 %v6985_v28 }
 0x10a   : > { %6775 = vmatpush3.bf16.msra.mxu0 %v6985_v28  ;;  %v8094_v28 = vpack.c.bf16 %v5542_v2, %v5541_v61  ;;  %v5613_v2 = vld [vmem:[%s7547_s11 + $0x7a] sm:$0xff] }
 0x10b   : > { %6776 = vmatprep.subr.bf16.mxu0 %v6986_v51 }
 0x10c   : > { %2018 = vmatmul.mubr.bf16.gmra.mrb[72].mxu0 %v7707_v9 }
 0x10d   : > { %2179 = vmatmul.mubr.bf16.gmra.mrb[72].mxu1 %v7709_v10  ;;  %2025 = vmatprep.mubr.bf16.mxu0 %v7749_v30 }
 0x10e   : > { %2186 = vmatprep.mubr.bf16.mxu1 %v7751_v31  ;;  %6777 = vmatpush3.bf16.msra.mxu0 %v6986_v51 }
 0x10f   : > { %6778 = vmatprep.subr.bf16.mxu0 %v6987_v52 }
 0x112   : > { %6779 = vmatpush3.bf16.msra.mxu0 %v6987_v52 }
 0x113   : > { %6780 = vmatprep.subr.bf16.mxu0 %v6988_v60 }
 0x114   : > { %2026 = vmatmul.mubr.bf16.gmra.mrb[76].mxu0 %v7729_v20 }
 0x115   : > { %2187 = vmatmul.mubr.bf16.gmra.mrb[76].mxu1 %v7731_v21  ;;  %2033 = vmatprep.mubr.bf16.mxu0 %v7777_v43 }
 0x116   : > { %2194 = vmatprep.mubr.bf16.mxu1 %v7779_v44  ;;  %6781 = vmatpush3.bf16.msra.mxu0 %v6988_v60 }
 0x117   : > { %6782 = vmatprep.subr.bf16.mxu0 %v6989_v62 }
 0x11a   : > { %6783 = vmatpush3.bf16.msra.mxu0 %v6989_v62 }
 0x11c   : > { %2034 = vmatmul.mubr.bf16.gmra.mrb[80].mxu0 %v7751_v31 }
 0x11d   : > { %2195 = vmatmul.mubr.bf16.gmra.mrb[80].mxu1 %v7756_v33  ;;  %2041 = vmatprep.mubr.bf16.mxu0 %v7811_v63 }
 0x11e   : > { %2202 = vmatprep.mubr.bf16.mxu1 %v7813_v0 }
 0x124   : > { %2042 = vmatmul.mubr.bf16.gmra.mrb[84].mxu0 %v7779_v44 }
 0x125   : > { %2203 = vmatmul.mubr.bf16.gmra.mrb[84].mxu1 %v7784_v46  ;;  %2049 = vmatprep.mubr.bf16.mxu0 %v7845_v17 }
 0x126   : > { %2210 = vmatprep.mubr.bf16.mxu1 %v7847_v18 }
 0x12c   : > { %2050 = vmatmul.mubr.bf16.gmra.mrb[88].mxu0 %v7813_v0 }
 0x12d   : > { %2211 = vmatmul.mubr.bf16.gmra.mrb[88].mxu1 %v7815_v1  ;;  %2057 = vmatprep.mubr.bf16.mxu0 %v7873_v36 }
 0x12e   : > { %2218 = vmatprep.mubr.bf16.mxu1 %v7875_v37 }
 0x134   : > { %2058 = vmatmul.mubr.bf16.gmra.mrb[92].mxu0 %v7847_v18 }
 0x135   : > { %2219 = vmatmul.mubr.bf16.gmra.mrb[92].mxu1 %v7849_v22  ;;  %2065 = vmatprep.mubr.bf16.mxu0 %v7901_v53 }
 0x136   : > { %2226 = vmatprep.mubr.bf16.mxu1 %v7903_v54 }
 0x13c   : > { %2066 = vmatmul.mubr.bf16.gmra.mrb[96].mxu0 %v7875_v37 }
 0x13d   : > { %2227 = vmatmul.mubr.bf16.gmra.mrb[96].mxu1 %v7882_v39  ;;  %2073 = vmatprep.mubr.bf16.mxu0 %v7917_v4 }
 0x13e   : > { %2234 = vmatprep.mubr.bf16.mxu1 %v7919_v5 }
 0x144   : > { %2074 = vmatmul.mubr.bf16.gmra.mrb[100].mxu0 %v7903_v54 }
 0x145   : > { %2235 = vmatmul.mubr.bf16.gmra.mrb[100].mxu1 %v7905_v55  ;;  %2081 = vmatprep.mubr.bf16.mxu0 %v7933_v16 }
 0x146   : > { %2242 = vmatprep.mubr.bf16.mxu1 %v7935_v23 }
 0x14c   : > { %2082 = vmatmul.mubr.bf16.gmra.mrb[104].mxu0 %v7919_v5 }
 0x14d   : > { %2243 = vmatmul.mubr.bf16.gmra.mrb[104].mxu1 %v7921_v6  ;;  %2089 = vmatprep.mubr.bf16.mxu0 %v7949_v34 }
 0x14e   : > { %2250 = vmatprep.mubr.bf16.mxu1 %v7951_v35 }
 0x14f   : > { %v5840_v8 = vpop.f32.mrb[0].mxu0 }
 0x150   : > { %v5952_v9 = vpop.f32.mrb[0].mxu1  ;;  %v5841_v10 = vpop.f32.mrb[1].mxu0 }
 0x151   : > { %v5842_v19 = vadd.f32 %v5841_v10, %v5840_v8  ;;  %v5953_v20 = vpop.f32.mrb[1].mxu1  ;;  %v5843_v21 = vpop.f32.mrb[2].mxu0  ;;  %v5573_v10 = vld [vmem:[%s7547_s11 + $0x198] sm:$0xff] }
 0x152   : > { %v5954_v30 = vadd.f32 %v5953_v20, %v5952_v9  ;;  %v5955_v31 = vpop.f32.mrb[2].mxu1  ;;  %v5844_v33 = vpop.f32.mrb[3].mxu0  ;;  %v5607_v20 = vld [vmem:[%s7547_s11 + $0x32] sm:$0xff] }
 0x153   : > { %v5845_v43 = vadd.f32 %v5844_v33, %v5843_v21  ;;  %v5956_v44 = vpop.f32.mrb[3].mxu1  ;;  %v5608_v21 = vld [vmem:[%s7547_s11 + $0x3a] sm:$0xff] }
 0x154   : > { %v5957_v46 = vadd.f32 %v5956_v44, %v5955_v31  ;;  %2090 = vmatmul.mubr.bf16.gmra.mrb[108].mxu0 %v7935_v23  ;;  %v8066_v63 = vadd.f32 %v5954_v30, %v5842_v19  ;;  %v5603_v23 = vld [vmem:[%s7547_s11 + $0x181] sm:$0xff] }
 0x155   : > { %2251 = vmatmul.mubr.bf16.gmra.mrb[108].mxu1 %v7937_v24  ;;  %2097 = vmatprep.mubr.bf16.mxu0 %v7965_v50  ;;  %v5604_v24 = vld [vmem:[%s7547_s11 + $0x189] sm:$0xff]  ;;  %v5574_v19 = vld [vmem:[%s7547_s11 + $0x1a0] sm:$0xff] }
 0x156   : > { %2258 = vmatprep.mubr.bf16.mxu1 %v7967_v56  ;;  %v8071_v0 = vadd.f32 %v5957_v46, %v5845_v43  ;;  %v845_v47 = vpack.c.bf16 %v5604_v24, %v5603_v23 }
 0x157   : > { %v5846_v1 = vpop.f32.mrb[4].mxu0 }
 0x158   : > { %v5958_v17 = vpop.f32.mrb[4].mxu1  ;;  %v5847_v18 = vpop.f32.mrb[5].mxu0 }
 0x159   : > { %v5848_v22 = vadd.f32 %v5847_v18, %v5846_v1  ;;  %v5959_v36 = vpop.f32.mrb[5].mxu1  ;;  %v5849_v37 = vpop.f32.mrb[6].mxu0  ;;  %v895_v1 = vpack.c.bf16 %v5608_v21, %v5607_v20 }
 0x15a   : > { %v5960_v38 = vadd.f32 %v5959_v36, %v5958_v17  ;;  %v5961_v39 = vpop.f32.mrb[6].mxu1  ;;  %v5850_v53 = vpop.f32.mrb[7].mxu0 }
 0x15b   : > { %v5851_v54 = vadd.f32 %v5850_v53, %v5849_v37  ;;  %v5962_v55 = vpop.f32.mrb[7].mxu1  ;;  %v5609_v53 = vld [vmem:[%s7547_s11 + $0x4a] sm:$0xff] }
 0x15c   : > { %v5963_v4 = vadd.f32 %v5962_v55, %v5961_v39  ;;  %2098 = vmatmul.mubr.bf16.gmra.mrb[112].mxu0 %v7951_v35  ;;  %v8074_v5 = vadd.f32 %v5960_v38, %v5848_v22  ;;  %v5611_v55 = vld [vmem:[%s7547_s11 + $0x62] sm:$0xff] }
 0x15d   : > { %2259 = vmatmul.mubr.bf16.gmra.mrb[112].mxu1 %v7953_v40  ;;  %2105 = vmatprep.mubr.bf16.mxu0 %v7981_v12  ;;  %v5606_v12 = vld [vmem:[%s7547_s11 + $0x1a1] sm:$0xff] }
 0x15e   : > { %2266 = vmatprep.mubr.bf16.mxu1 %v7983_v13  ;;  %v8079_v6 = vadd.f32 %v5963_v4, %v5851_v54  ;;  %v846_v52 = vpack.c.bf16 %v5606_v12, %v5605_v11  ;;  %v5610_v54 = vld [vmem:[%s7547_s11 + $0x52] sm:$0xff]  ;;  %v5612_v4 = vld [vmem:[%s7547_s11 + $0x6a] sm:$0xff]  ;;  %v5616_v12 = vld [vmem:[%s7547_s11 + $0x9a] sm:$0xff] }
 0x15f   : > { %v5852_v16 = vpop.f32.mrb[8].mxu0  ;;  %v5615_v11 = vld [vmem:[%s7547_s11 + $0x92] sm:$0xff] }
 0x160   : > { %v5964_v29 = vpop.f32.mrb[8].mxu1  ;;  %v5853_v32 = vpop.f32.mrb[9].mxu0 }
 0x161   : > { %v5854_v34 = vadd.f32 %v5853_v32, %v5852_v16  ;;  %v5965_v41 = vpop.f32.mrb[9].mxu1  ;;  %v5855_v35 = vpop.f32.mrb[10].mxu0  ;;  %v896_v32 = vpack.c.bf16 %v5610_v54, %v5609_v53 }
 0x162   : > { %v5966_v42 = vadd.f32 %v5965_v41, %v5964_v29  ;;  %v5967_v45 = vpop.f32.mrb[10].mxu1  ;;  %v5856_v40 = vpop.f32.mrb[11].mxu0 }
 0x163   : > { %v5857_v48 = vadd.f32 %v5856_v40, %v5855_v35  ;;  %v5968_v49 = vpop.f32.mrb[11].mxu1 }
 0x164   : > { %v5969_v50 = vadd.f32 %v5968_v49, %v5967_v45  ;;  %2106 = vmatmul.mubr.bf16.gmra.mrb[116].mxu0 %v7967_v56  ;;  %v8084_v58 = vadd.f32 %v5966_v42, %v5854_v34  ;;  %v897_v42 = vpack.c.bf16 %v5612_v4, %v5611_v55 }
 0x165   : > { %2267 = vmatmul.mubr.bf16.gmra.mrb[116].mxu1 %v7969_v57  ;;  %2113 = vmatprep.mubr.bf16.mxu0 %v7993_v26 }
 0x166   : > { %2274 = vmatprep.mubr.bf16.mxu1 %v845_v47  ;;  %v8090_v3 = vadd.f32 %v5969_v50, %v5857_v48 }
 0x167   : > { %v5858_v7 = vpop.f32.mrb[12].mxu0 }
 0x168   : > { %v5970_v15 = vpop.f32.mrb[12].mxu1  ;;  %v5859_v25 = vpop.f32.mrb[13].mxu0 }
 0x169   : > { %v5860_v27 = vadd.f32 %v5859_v25, %v5858_v7  ;;  %v5971_v59 = vpop.f32.mrb[13].mxu1  ;;  %v5861_v56 = vpop.f32.mrb[14].mxu0  ;;  %v5614_v7 = vld [vmem:[%s7547_s11 + $0x82] sm:$0xff] }
 0x16a   : > { %v5972_v57 = vadd.f32 %v5971_v59, %v5970_v15  ;;  %v5973_v26 = vpop.f32.mrb[14].mxu1  ;;  %v5862_v51 = vpop.f32.mrb[15].mxu0 }
 0x16b   : > { %v5863_v60 = vadd.f32 %v5862_v51, %v5861_v56  ;;  %v5974_v62 = vpop.f32.mrb[15].mxu1  ;;  %v898_v56 = vpack.c.bf16 %v5614_v7, %v5613_v2 }
 0x16c   : > { %v5975_v8 = vadd.f32 %v5974_v62, %v5973_v26  ;;  %2114 = vmatmul.mubr.bf16.gmra.mrb[120].mxu0 %v7983_v13  ;;  %v8097_v9 = vadd.f32 %v5972_v57, %v5860_v27 }
 0x16d   : > { %2275 = vmatmul.mubr.bf16.gmra.mrb[120].mxu1 %v7985_v14  ;;  %2121 = vmatprep.mubr.bf16.mxu0 %v8094_v28  ;;  %v782_v14 = vpack.c.bf16 %v5574_v19, %v5573_v10 }
 0x16e   : > { %2282 = vmatprep.mubr.bf16.mxu1 %v846_v52  ;;  %v8105_v30 = vadd.f32 %v5975_v8, %v5863_v60  ;;  %v899_v52 = vpack.c.bf16 %v5616_v12, %v5615_v11 }
 0x16f   : > { %v5864_v31 = vpop.f32.mrb[16].mxu0 }
 0x170   : > { %v5976_v33 = vpop.f32.mrb[16].mxu1  ;;  %v5865_v43 = vpop.f32.mrb[17].mxu0 }
 0x171   : > { %v5866_v44 = vadd.f32 %v5865_v43, %v5864_v31  ;;  %v5977_v13 = vpop.f32.mrb[17].mxu1  ;;  %v5867_v46 = vpop.f32.mrb[18].mxu0  ;;  %v5617_v31 = vld [vmem:[%s7547_s11 + $0xaa] sm:$0xff]  ;;  %v5619_v43 = vld [vmem:[%s7547_s11 + $0xc2] sm:$0xff] }
 0x172   : > { %v5978_v17 = vadd.f32 %v5977_v13, %v5976_v33  ;;  %v5979_v18 = vpop.f32.mrb[18].mxu1  ;;  %v5868_v22 = vpop.f32.mrb[19].mxu0  ;;  %v5618_v33 = vld [vmem:[%s7547_s11 + $0xb2] sm:$0xff] }
 0x173   : > { %v5869_v36 = vadd.f32 %v5868_v22, %v5867_v46  ;;  %v5980_v37 = vpop.f32.mrb[19].mxu1 }
 0x174   : > { %v5981_v38 = vadd.f32 %v5980_v37, %v5979_v18  ;;  %2122 = vmatmul.mubr.bf16.gmra.mrb[124].mxu0 %v845_v47  ;;  %v8107_v39 = vadd.f32 %v5978_v17, %v5866_v44  ;;  %v5620_v44 = vld [vmem:[%s7547_s11 + $0xca] sm:$0xff]  ;;  %v900_v17 = vpack.c.bf16 %v5618_v33, %v5617_v31 }
 0x175   : > { %2283 = vmatmul.mubr.bf16.gmra.mrb[124].mxu1 %v782_v14  ;;  %6784 = vmatprep.mubr.bf16.mxu0 %v895_v1  ;;  %v901_v37 = vpack.c.bf16 %v5620_v44, %v5619_v43 }
 0x176   : > { %v8113_v16 = vadd.f32 %v5981_v38, %v5869_v36 }
 0x177   : > { %v5870_v23 = vpop.f32.mrb[20].mxu0 }
 0x178   : > { %v5982_v24 = vpop.f32.mrb[20].mxu1  ;;  %v5871_v29 = vpop.f32.mrb[21].mxu0 }
 0x179   : > { %v5872_v34 = vadd.f32 %v5871_v29, %v5870_v23  ;;  %v5983_v41 = vpop.f32.mrb[21].mxu1  ;;  %v5873_v35 = vpop.f32.mrb[22].mxu0  ;;  %v5621_v29 = vld [vmem:[%s7547_s11 + $0xda] sm:$0xff] }
 0x17a   : > { %v5984_v45 = vadd.f32 %v5983_v41, %v5982_v24  ;;  %v5985_v40 = vpop.f32.mrb[22].mxu1  ;;  %v5874_v47 = vpop.f32.mrb[23].mxu0  ;;  %v5624_v41 = vld [vmem:[%s7547_s11 + $0xfa] sm:$0xff] }
 0x17b   : > { %v5875_v48 = vadd.f32 %v5874_v47, %v5873_v35  ;;  %v5986_v49 = vpop.f32.mrb[23].mxu1 }
 0x17c   : > { %v5987_v50 = vadd.f32 %v5986_v49, %v5985_v40  ;;  %6785 = vmatmul.mubr.bf16.vlgmr.msra.gmra.mrb[128].mxu0 %v896_v32  ;;  %v8115_v61 = vadd.f32 %v5984_v45, %v5872_v34  ;;  %v5622_v32 = vld [vmem:[%s7547_s11 + $0xe2] sm:$0xff]  ;;  %v5623_v34 = vld [vmem:[%s7547_s11 + $0xf2] sm:$0xff] }
 0x17d   : > { %6788 = vmatprep.mubr.bf16.mxu0 %v897_v42  ;;  %v902_v47 = vpack.c.bf16 %v5622_v32, %v5621_v29  ;;  %v903_v2 = vpack.c.bf16 %v5624_v41, %v5623_v34 }
 0x17e   : > { %v8121_v15 = vadd.f32 %v5987_v50, %v5875_v48 }
 0x17f   : > { %v5876_v25 = vpop.f32.mrb[24].mxu0 }
 0x180   : > { %v5988_v27 = vpop.f32.mrb[24].mxu1  ;;  %v5877_v59 = vpop.f32.mrb[25].mxu0 }
 0x181   : > { %v5878_v57 = vadd.f32 %v5877_v59, %v5876_v25  ;;  %v5989_v26 = vpop.f32.mrb[25].mxu1  ;;  %v5879_v51 = vpop.f32.mrb[26].mxu0 }
 0x182   : > { %v5990_v60 = vadd.f32 %v5989_v26, %v5988_v27  ;;  %v5991_v62 = vpop.f32.mrb[26].mxu1  ;;  %v5880_v8 = vpop.f32.mrb[27].mxu0  ;;  %v5626_v26 = vld [vmem:[%s7547_s11 + $0x112] sm:$0xff] }
 0x183   : > { %v5881_v10 = vadd.f32 %v5880_v8, %v5879_v51  ;;  %v5992_v19 = vpop.f32.mrb[27].mxu1 }
 0x184   : > { %v5993_v20 = vadd.f32 %v5992_v19, %v5991_v62  ;;  %6789 = vmatmul.mubr.bf16.gmra.mrb[132].mxu0 %v898_v56  ;;  %v8123_v21 = vadd.f32 %v5990_v60, %v5878_v57  ;;  %v5625_v57 = vld [vmem:[%s7547_s11 + $0x10a] sm:$0xff] }
 0x185   : > { %6792 = vmatprep.mubr.bf16.mxu0 %v899_v52  ;;  %v5627_v52 = vld [vmem:[%s7547_s11 + $0x122] sm:$0xff]  ;;  %v5628_v60 = vld [vmem:[%s7547_s11 + $0x12a] sm:$0xff]  ;;  %v904_v19 = vpack.c.bf16 %v5626_v26, %v5625_v57 }
 0x186   : > { %v8129_v13 = vadd.f32 %v5993_v20, %v5881_v10  ;;  %v905_v43 = vpack.c.bf16 %v5628_v60, %v5627_v52 }
 0x187   : > { %v5882_v46 = vpop.f32.mrb[28].mxu0 }
 0x188   : > { %v5994_v14 = vpop.f32.mrb[28].mxu1  ;;  %v5883_v1 = vpop.f32.mrb[29].mxu0 }
 0x189   : > { %v5884_v18 = vadd.f32 %v5883_v1, %v5882_v46  ;;  %v5995_v22 = vpop.f32.mrb[29].mxu1  ;;  %v5885_v36 = vpop.f32.mrb[30].mxu0 }
 0x18a   : > { %v5996_v38 = vadd.f32 %v5995_v22, %v5994_v14  ;;  %v5997_v53 = vpop.f32.mrb[30].mxu1  ;;  %v5886_v54 = vpop.f32.mrb[31].mxu0 }
 0x18b   : > { %v5887_v55 = vadd.f32 %v5886_v54, %v5885_v36  ;;  %v5998_v4 = vpop.f32.mrb[31].mxu1  ;;  %v5629_v36 = vld [vmem:[%s7547_s11 + $0x13a] sm:$0xff] }
 0x18c   : > { %v5999_v23 = vadd.f32 %v5998_v4, %v5997_v53  ;;  %6793 = vmatmul.mubr.bf16.gmra.mrb[136].mxu0 %v900_v17  ;;  %v8131_v24 = vadd.f32 %v5996_v38, %v5884_v18  ;;  %v5631_v53 = vld [vmem:[%s7547_s11 + $0x152] sm:$0xff]  ;;  %v5632_v54 = vld [vmem:[%s7547_s11 + $0x15a] sm:$0xff] }
 0x18d   : > { %6796 = vmatprep.mubr.bf16.mxu0 %v901_v37  ;;  %v5630_v37 = vld [vmem:[%s7547_s11 + $0x142] sm:$0xff] }
 0x18e   : > { %v8137_v35 = vadd.f32 %v5999_v23, %v5887_v55  ;;  %v906_v29 = vpack.c.bf16 %v5630_v37, %v5629_v36  ;;  %v6993_v36 = vld [vmem:[%s9516_s3 + $0x8] sm:$0xff]  }
 0x18f   : > { %v5888_v42 = vpop.f32.mrb[32].mxu0 }
 0x190   : > { %v6000_v45 = vpop.f32.mrb[32].mxu1  ;;  %v5889_v40 = vpop.f32.mrb[33].mxu0 }
 0x191   : > { %v5890_v48 = vadd.f32 %v5889_v40, %v5888_v42  ;;  %v6001_v49 = vpop.f32.mrb[33].mxu1  ;;  %v5891_v50 = vpop.f32.mrb[34].mxu0  ;;  %v907_v42 = vpack.c.bf16 %v5632_v54, %v5631_v53 }
 0x192   : > { %v6002_v7 = vadd.f32 %v6001_v49, %v6000_v45  ;;  %v6003_v11 = vpop.f32.mrb[34].mxu1  ;;  %v5892_v12 = vpop.f32.mrb[35].mxu0 }
 0x193   : > { %v5893_v25 = vadd.f32 %v5892_v12, %v5891_v50  ;;  %v6004_v27 = vpop.f32.mrb[35].mxu1 }
 0x194   : > { %v8139_v59 = vadd.f32 %v6002_v7, %v5890_v48  ;;  %v6005_v56 = vadd.f32 %v6004_v27, %v6003_v11  ;;  %6797 = vmatmul.mubr.bf16.gmra.mrb[140].mxu0 %v902_v47  ;;  %v5633_v7 = vld [vmem:[%s7547_s11 + $0x16a] sm:$0xff]  ;;  %v5634_v11 = vld [vmem:[%s7547_s11 + $0x172] sm:$0xff] }
 0x195   : > { %6800 = vmatprep.mubr.bf16.mxu0 %v903_v2  ;;  %v908_v57 = vpack.c.bf16 %v5634_v11, %v5633_v7  ;;  %v6997_v7 = vld [vmem:[%s9516_s3 + $0x18] sm:$0xff]  }
 0x196   : > { %v8143_v51 = vadd.f32 %v6005_v56, %v5893_v25 }
 0x197   : > { %v5894_v62 = vpop.f32.mrb[36].mxu0 }
 0x198   : > { %v6006_v8 = vpop.f32.mrb[36].mxu1  ;;  %v5895_v10 = vpop.f32.mrb[37].mxu0 }
 0x199   : > { %v5896_v20 = vadd.f32 %v5895_v10, %v5894_v62  ;;  %v6007_v31 = vpop.f32.mrb[37].mxu1  ;;  %v5897_v33 = vpop.f32.mrb[38].mxu0 }
 0x19a   : > { %v6008_v44 = vadd.f32 %v6007_v31, %v6006_v8  ;;  %v6009_v46 = vpop.f32.mrb[38].mxu1  ;;  %v5898_v14 = vpop.f32.mrb[39].mxu0 }
 0x19b   : > { %v5899_v1 = vadd.f32 %v5898_v14, %v5897_v33  ;;  %v6010_v17 = vpop.f32.mrb[39].mxu1  ;;  %v6991_v33 = vld [vmem:[%s9516_s3] sm:$0xff]  }
 0x19c   : > { %v8147_v18 = vadd.f32 %v6008_v44, %v5896_v20  ;;  %v6011_v22 = vadd.f32 %v6010_v17, %v6009_v46  ;;  %6801 = vmatmul.mubr.bf16.gmra.mrb[144].mxu0 %v904_v19  ;;  %v6990_v19 = vld [vmem:[%s9516_s3 + $0x40] sm:$0xff]   ;;  %v6992_v17 = vld [vmem:[%s9516_s3 + $0x48] sm:$0xff]  }
 0x19d   : > { %6804 = vmatprep.mubr.bf16.mxu0 %v905_v43  ;;  %6296 = vmatprep.subr.bf16.mxu1 %v6990_v19  ;;  %v5637_v46 = vld [vmem:[%s7547_s11 + $0x19a] sm:$0xff]  ;;  %v5638_v14 = vld [vmem:[%s7547_s11 + $0x1a2] sm:$0xff]  ;;  %s5823_s11 = sshll.u32 %s7449_s25, 12  ;;  %s5338_s25 = scalar_lea.sflag [#allocation6], %s7532_s29 }
 0x19e   : > { %v8151_v38 = vadd.f32 %v6011_v22, %v5899_v1  ;;  %6297 = vmatpush3.bf16.msra.mxu1 %v6991_v33  ;;  %v910_v54 = vpack.c.bf16 %v5638_v14, %v5637_v46  ;;  %v6999_v19 = vld [vmem:[%s9516_s3 + $0x20] sm:$0xff]   ;;  %v7001_v14 = vld [vmem:[%s9516_s3 + $0x28] sm:$0xff]   ;;  %s9464_s15 = scalar_lea.hbm %s9519_s6, %s5823_s11 }
 0x19f   : > { %v5900_v55 = vpop.f32.mrb[40].mxu0  ;;  %6298 = vmatprep.subr.bf16.mxu1 %v6992_v17 }
 0x1a0   : > { %v6012_v4 = vpop.f32.mrb[40].mxu1  ;;  %v5901_v23 = vpop.f32.mrb[41].mxu0 }
 0x1a1   : > { %v5902_v32 = vadd.f32 %v5901_v23, %v5900_v55  ;;  %v6013_v34 = vpop.f32.mrb[41].mxu1  ;;  %v5903_v41 = vpop.f32.mrb[42].mxu0 }
 0x1a2   : > { %v6014_v45 = vadd.f32 %v6013_v34, %v6012_v4  ;;  %v6015_v40 = vpop.f32.mrb[42].mxu1  ;;  %v5904_v47 = vpop.f32.mrb[43].mxu0  ;;  %6299 = vmatpush3.bf16.msra.mxu1 %v6993_v36  ;;  %v6994_v34 = vld [vmem:[%s9516_s3 + $0x50] sm:$0xff]  }
 0x1a3   : > { %v5905_v48 = vadd.f32 %v5904_v47, %v5903_v41  ;;  %v6016_v49 = vpop.f32.mrb[43].mxu1  ;;  %6300 = vmatprep.subr.bf16.mxu1 %v6994_v34 }
 0x1a4   : > { %v8155_v50 = vadd.f32 %v6014_v45, %v5902_v32  ;;  %v6017_v2 = vadd.f32 %v6016_v49, %v6015_v40  ;;  %6805 = vmatmul.mubr.bf16.gmra.mrb[148].mxu0 %v906_v29  ;;  %v6995_v45 = vld [vmem:[%s9516_s3 + $0x10] sm:$0xff]   ;;  %v6996_v49 = vld [vmem:[%s9516_s3 + $0x58] sm:$0xff]  }
 0x1a5   : > { %6808 = vmatprep.mubr.bf16.mxu0 %v907_v42 }
 0x1a6   : > { %v8159_v12 = vadd.f32 %v6017_v2, %v5905_v48  ;;  %6301 = vmatpush3.bf16.msra.mxu1 %v6995_v45  ;;  %v7004_v45 = vld [vmem:[%s9516_s3 + $0x78] sm:$0xff]  }
 0x1a7   : > { %v5906_v25 = vpop.f32.mrb[44].mxu0  ;;  %6302 = vmatprep.subr.bf16.mxu1 %v6996_v49  ;;  %v7005_v49 = vld [vmem:[%s9516_s3 + $0x38] sm:$0xff]  }
 0x1a8   : > { %v6018_v27 = vpop.f32.mrb[44].mxu1  ;;  %v5907_v56 = vpop.f32.mrb[45].mxu0 }
 0x1a9   : > { %v5908_v26 = vadd.f32 %v5907_v56, %v5906_v25  ;;  %v6019_v52 = vpop.f32.mrb[45].mxu1  ;;  %v5909_v60 = vpop.f32.mrb[46].mxu0 }
 0x1aa   : > { %v6020_v62 = vadd.f32 %v6019_v52, %v6018_v27  ;;  %v6021_v8 = vpop.f32.mrb[46].mxu1  ;;  %v5910_v10 = vpop.f32.mrb[47].mxu0  ;;  %6303 = vmatpush3.bf16.msra.mxu1 %v6997_v7 }
 0x1ab   : > { %v5911_v20 = vadd.f32 %v5910_v10, %v5909_v60  ;;  %v6022_v31 = vpop.f32.mrb[47].mxu1 }
 0x1ac   : > { %v8167_v43 = vadd.f32 %v6020_v62, %v5908_v26  ;;  %v6023_v44 = vadd.f32 %v6022_v31, %v6021_v8  ;;  %6809 = vmatmul.mubr.bf16.gmra.mrb[152].mxu0 %v908_v57  ;;  %v6998_v62 = vld [vmem:[%s9516_s3 + $0x60] sm:$0xff]  }
 0x1ad   : > { %6812 = vmatprep.mubr.bf16.mxu0 %v8094_v28  ;;  %6304 = vmatprep.subr.bf16.mxu1 %v6998_v62 }
 0x1ae   : > { %v8172_v1 = vadd.f32 %v6023_v44, %v5911_v20  ;;  %6305 = vmatpush3.bf16.msra.mxu1 %v6999_v19  ;;  %v7000_v44 = vld [vmem:[%s9516_s3 + $0x68] sm:$0xff]  }
 0x1af   : > { %v5912_v22 = vpop.f32.mrb[48].mxu0  ;;  %6306 = vmatprep.subr.bf16.mxu1 %v7000_v44 }
 0x1b0   : > { %v6024_v37 = vpop.f32.mrb[48].mxu1  ;;  %v5913_v53 = vpop.f32.mrb[49].mxu0 }
 0x1b1   : > { %v5914_v55 = vadd.f32 %v5913_v53, %v5912_v22  ;;  %v6025_v28 = vpop.f32.mrb[49].mxu1  ;;  %v5915_v4 = vpop.f32.mrb[50].mxu0 }
 0x1b2   : > { %v6026_v23 = vadd.f32 %v6025_v28, %v6024_v37  ;;  %v6027_v29 = vpop.f32.mrb[50].mxu1  ;;  %v5916_v32 = vpop.f32.mrb[51].mxu0  ;;  %6307 = vmatpush3.bf16.msra.mxu1 %v7001_v14 }
 0x1b3   : > { %v5917_v41 = vadd.f32 %v5916_v32, %v5915_v4  ;;  %v6028_v42 = vpop.f32.mrb[51].mxu1  ;;  %v7002_v4 = vld [vmem:[%s9516_s3 + $0x70] sm:$0xff]  }
 0x1b4   : > { %v8186_v40 = vadd.f32 %v6026_v23, %v5914_v55  ;;  %v6029_v47 = vadd.f32 %v6028_v42, %v6027_v29  ;;  %6813 = vmatmul.mubr.bf16.gmra.mrb[156].mxu0 %v910_v54  ;;  %v7003_v32 = vld [vmem:[%s9516_s3 + $0x30] sm:$0xff]   ;;  %6308 = vmatprep.subr.bf16.mxu1 %v7002_v4 }
 0x1b6   : > { %v8188_v48 = vadd.f32 %v6029_v47, %v5917_v41  ;;  %6309 = vmatpush3.bf16.msra.mxu1 %v7003_v32 }
 0x1b7   : > { %v5918_v2 = vpop.f32.mrb[52].mxu0  ;;  %6310 = vmatprep.subr.bf16.mxu1 %v7004_v45 }
 0x1b8   : > { %v6030_v11 = vpop.f32.mrb[52].mxu1  ;;  %v5919_v25 = vpop.f32.mrb[53].mxu0 }
 0x1b9   : > { %v5920_v27 = vadd.f32 %v5919_v25, %v5918_v2  ;;  %v6031_v56 = vpop.f32.mrb[53].mxu1  ;;  %v5921_v57 = vpop.f32.mrb[54].mxu0  ;;  %v2973_v25 = vld [vmem:[#allocation3 + $0x9] sm:$0xff] }
 0x1ba   : > { %v6032_v26 = vadd.f32 %v6031_v56, %v6030_v11  ;;  %v6033_v52 = vpop.f32.mrb[54].mxu1  ;;  %v5922_v60 = vpop.f32.mrb[55].mxu0  ;;  %v2972_v11 = vld [vmem:[#allocation3 + $0x1] sm:$0xff]  ;;  %6311 = vmatpush3.bf16.msra.mxu1 %v7005_v49 }
 0x1bb   : > { %v5923_v8 = vadd.f32 %v5922_v60, %v5921_v57  ;;  %v6034_v10 = vpop.f32.mrb[55].mxu1  ;;  %v2909_v60 = vld [vmem:[#allocation3 + $0x8] sm:$0xff] }
 0x1bc   : > { %v8202_v20 = vadd.f32 %v6032_v26, %v5920_v27  ;;  %v6035_v31 = vadd.f32 %v6034_v10, %v6033_v52  ;;  %v3004_v26 = vpack.c.bf16 %v2973_v25, %v2972_v11  ;;  %v2908_v52 = vld [vmem:[#allocation3] sm:$0xff] }
 0x1bd   : > { %v2940_v19 = vpack.c.bf16 %v2909_v60, %v2908_v52 }
 0x1be   : > { %v8204_v33 = vadd.f32 %v6035_v31, %v5923_v8  ;;  %4365 = vmatprep.mubr.bf16.mxu1 %v3004_v26 }
 0x1bf   : > { %v5924_v46 = vpop.f32.mrb[56].mxu0  ;;  %4366 = vmatmul.mubr.bf16.vlgmr.msra.gmra.mrb[128].mxu1 %v2940_v19 }
 0x1c0   : > { %v6036_v17 = vpop.f32.mrb[56].mxu1  ;;  %v5925_v22 = vpop.f32.mrb[57].mxu0 }
 0x1c1   : > { %v5926_v36 = vadd.f32 %v5925_v22, %v5924_v46  ;;  %v6037_v37 = vpop.f32.mrb[57].mxu1  ;;  %v5927_v53 = vpop.f32.mrb[58].mxu0 }
 0x1c2   : > { %v6038_v54 = vadd.f32 %v6037_v37, %v6036_v17  ;;  %v6039_v55 = vpop.f32.mrb[58].mxu1  ;;  %v5928_v28 = vpop.f32.mrb[59].mxu0 }
 0x1c3   : > { %v5929_v23 = vadd.f32 %v5928_v28, %v5927_v53  ;;  %v6040_v29 = vpop.f32.mrb[59].mxu1 }
 0x1c4   : > { %v8218_v34 = vadd.f32 %v6038_v54, %v5926_v36  ;;  %v6041_v41 = vadd.f32 %v6040_v29, %v6039_v55 }
 0x1c6   : > { %v8220_v42 = vadd.f32 %v6041_v41, %v5929_v23 }
 0x1c7   : > { %v5930_v47 = vpop.f32.mrb[60].mxu0 }
 0x1c8   : > { %v6042_v2 = vpop.f32.mrb[60].mxu1  ;;  %v5931_v7 = vpop.f32.mrb[61].mxu0 }
 0x1c9   : > { %v5932_v27 = vadd.f32 %v5931_v7, %v5930_v47  ;;  %v6043_v56 = vpop.f32.mrb[61].mxu1  ;;  %v5933_v57 = vpop.f32.mrb[62].mxu0 }
 0x1ca   : > { %v6044_v62 = vadd.f32 %v6043_v56, %v6042_v2  ;;  %v6045_v8 = vpop.f32.mrb[62].mxu1  ;;  %v5934_v10 = vpop.f32.mrb[63].mxu0 }
 0x1cb   : > { %v5935_v31 = vadd.f32 %v5934_v10, %v5933_v57  ;;  %v6046_v44 = vpop.f32.mrb[63].mxu1 }
 0x1cc   : > { %v8228_v46 = vadd.f32 %v6044_v62, %v5932_v27  ;;  %v6047_v14 = vadd.f32 %v6046_v44, %v6045_v8 }
 0x1ce   : > { %v8230_v17 = vadd.f32 %v6047_v14, %v5935_v31 }
 0x1cf   : > { %v6064_v22 = vpop.f32.mrb[64].mxu0 }
 0x1d0   : > { %v6065_v36 = vpop.f32.mrb[65].mxu0  ;;  %v6176_v37 = vpop.f32.mrb[64].mxu1 }
 0x1d1   : > { %v6066_v53 = vadd.f32 %v6065_v36, %v6064_v22  ;;  %v6067_v54 = vpop.f32.mrb[66].mxu0  ;;  %v6177_v55 = vpop.f32.mrb[65].mxu1 }
 0x1d2   : > { %v6068_v28 = vpop.f32.mrb[67].mxu0  ;;  %v6178_v4 = vadd.f32 %v6177_v55, %v6176_v37  ;;  %v6179_v23 = vpop.f32.mrb[66].mxu1 }
 0x1d3   : > { %v2004_v29 = vadd.f32 %v6066_v53, %v8066_v63  ;;  %v6069_v32 = vadd.f32 %v6068_v28, %v6067_v54  ;;  %v6180_v41 = vpop.f32.mrb[67].mxu1 }
 0x1d4   : > { %v6181_v45 = vadd.f32 %v6180_v41, %v6179_v23 }
 0x1d5   : > { %v2007_v47 = vadd.f32 %v6069_v32, %v8071_v0  ;;  %v8234_v49 = vadd.f32 %v6178_v4, %v2004_v29 }
 0x1d7   : > { %v6070_v2 = vpop.f32.mrb[68].mxu0  ;;  %v8236_v7 = vadd.f32 %v6181_v45, %v2007_v47 }
 0x1d8   : > { %v6071_v11 = vpop.f32.mrb[69].mxu0  ;;  %v6182_v25 = vpop.f32.mrb[68].mxu1 }
 0x1d9   : > { %v6072_v27 = vadd.f32 %v6071_v11, %v6070_v2  ;;  %v6073_v56 = vpop.f32.mrb[70].mxu0  ;;  %v6183_v57 = vpop.f32.mrb[69].mxu1 }
 0x1da   : > { %v6074_v26 = vpop.f32.mrb[71].mxu0  ;;  %v6184_v52 = vadd.f32 %v6183_v57, %v6182_v25  ;;  %v6185_v60 = vpop.f32.mrb[70].mxu1 }
 0x1db   : > { %v2012_v63 = vadd.f32 %v6072_v27, %v8074_v5  ;;  %v6075_v62 = vadd.f32 %v6074_v26, %v6073_v56  ;;  %v6186_v8 = vpop.f32.mrb[71].mxu1 }
 0x1dc   : > { %v6187_v10 = vadd.f32 %v6186_v8, %v6185_v60 }
 0x1dd   : > { %v2015_v0 = vadd.f32 %v6075_v62, %v8079_v6  ;;  %v8240_v19 = vadd.f32 %v6184_v52, %v2012_v63 }
 0x1df   : > { %v6076_v31 = vpop.f32.mrb[72].mxu0  ;;  %v8242_v44 = vadd.f32 %v6187_v10, %v2015_v0 }
 0x1e0   : > { %v6077_v14 = vpop.f32.mrb[73].mxu0  ;;  %v6188_v22 = vpop.f32.mrb[72].mxu1 }
 0x1e1   : > { %v6078_v36 = vadd.f32 %v6077_v14, %v6076_v31  ;;  %v6079_v37 = vpop.f32.mrb[74].mxu0  ;;  %v6189_v53 = vpop.f32.mrb[73].mxu1 }
 0x1e2   : > { %v6080_v54 = vpop.f32.mrb[75].mxu0  ;;  %v6190_v55 = vadd.f32 %v6189_v53, %v6188_v22  ;;  %v6191_v28 = vpop.f32.mrb[74].mxu1 }
 0x1e3   : > { %v2020_v5 = vadd.f32 %v6078_v36, %v8084_v58  ;;  %v6081_v4 = vadd.f32 %v6080_v54, %v6079_v37  ;;  %v6192_v23 = vpop.f32.mrb[75].mxu1 }
 0x1e4   : > { %v6193_v29 = vadd.f32 %v6192_v23, %v6191_v28 }
 0x1e5   : > { %v2023_v6 = vadd.f32 %v6081_v4, %v8090_v3  ;;  %v8246_v32 = vadd.f32 %v6190_v55, %v2020_v5 }
 0x1e7   : > { %v6082_v41 = vpop.f32.mrb[76].mxu0  ;;  %v8248_v45 = vadd.f32 %v6193_v29, %v2023_v6 }
 0x1e8   : > { %v6083_v47 = vpop.f32.mrb[77].mxu0  ;;  %v6194_v2 = vpop.f32.mrb[76].mxu1 }
 0x1e9   : > { %v6084_v11 = vadd.f32 %v6083_v47, %v6082_v41  ;;  %v6085_v25 = vpop.f32.mrb[78].mxu0  ;;  %v6195_v27 = vpop.f32.mrb[77].mxu1 }
 0x1ea   : > { %v6086_v56 = vpop.f32.mrb[79].mxu0  ;;  %v6196_v57 = vadd.f32 %v6195_v27, %v6194_v2  ;;  %v6197_v26 = vpop.f32.mrb[78].mxu1 }
 0x1eb   : > { %v2028_v58 = vadd.f32 %v6084_v11, %v8097_v9  ;;  %v6087_v52 = vadd.f32 %v6086_v56, %v6085_v25  ;;  %v6198_v60 = vpop.f32.mrb[79].mxu1 }
 0x1ec   : > { %v6199_v63 = vadd.f32 %v6198_v60, %v6197_v26 }
 0x1ed   : > { %v2031_v3 = vadd.f32 %v6087_v52, %v8105_v30  ;;  %v8252_v62 = vadd.f32 %v6196_v57, %v2028_v58 }
 0x1ef   : > { %v6088_v8 = vpop.f32.mrb[80].mxu0  ;;  %v8254_v10 = vadd.f32 %v6199_v63, %v2031_v3 }
 0x1f0   : > { %v6089_v0 = vpop.f32.mrb[81].mxu0  ;;  %v6200_v31 = vpop.f32.mrb[80].mxu1 }
 0x1f1   : > { %v6090_v14 = vadd.f32 %v6089_v0, %v6088_v8  ;;  %v6091_v22 = vpop.f32.mrb[82].mxu0  ;;  %v6201_v36 = vpop.f32.mrb[81].mxu1 }
 0x1f2   : > { %v6092_v37 = vpop.f32.mrb[83].mxu0  ;;  %v6202_v53 = vadd.f32 %v6201_v36, %v6200_v31  ;;  %v6203_v54 = vpop.f32.mrb[82].mxu1 }
 0x1f3   : > { %v2036_v9 = vadd.f32 %v6090_v14, %v8107_v39  ;;  %v6093_v55 = vadd.f32 %v6092_v37, %v6091_v22  ;;  %v6204_v28 = vpop.f32.mrb[83].mxu1 }
 0x1f4   : > { %v6205_v5 = vadd.f32 %v6204_v28, %v6203_v54 }
 0x1f5   : > { %v2039_v30 = vadd.f32 %v6093_v55, %v8113_v16  ;;  %v8258_v4 = vadd.f32 %v6202_v53, %v2036_v9 }
 0x1f7   : > { %v6094_v23 = vpop.f32.mrb[84].mxu0  ;;  %v8260_v29 = vadd.f32 %v6205_v5, %v2039_v30 }
 0x1f8   : > { %v6095_v6 = vpop.f32.mrb[85].mxu0  ;;  %v6206_v41 = vpop.f32.mrb[84].mxu1 }
 0x1f9   : > { %v6096_v47 = vadd.f32 %v6095_v6, %v6094_v23  ;;  %v6097_v2 = vpop.f32.mrb[86].mxu0  ;;  %v6207_v11 = vpop.f32.mrb[85].mxu1 }
 0x1fa   : > { %v6098_v25 = vpop.f32.mrb[87].mxu0  ;;  %v6208_v27 = vadd.f32 %v6207_v11, %v6206_v41  ;;  %v6209_v56 = vpop.f32.mrb[86].mxu1 }
 0x1fb   : > { %v2044_v39 = vadd.f32 %v6096_v47, %v8115_v61  ;;  %v6099_v57 = vadd.f32 %v6098_v25, %v6097_v2  ;;  %v6210_v26 = vpop.f32.mrb[87].mxu1 }
 0x1fc   : > { %v6211_v58 = vadd.f32 %v6210_v26, %v6209_v56 }
 0x1fd   : > { %v2047_v16 = vadd.f32 %v6099_v57, %v8121_v15  ;;  %v8264_v52 = vadd.f32 %v6208_v27, %v2044_v39 }
 0x1ff   : > { %v6100_v60 = vpop.f32.mrb[88].mxu0  ;;  %v8266_v63 = vadd.f32 %v6211_v58, %v2047_v16 }
 0x200   : > { %v6101_v3 = vpop.f32.mrb[89].mxu0  ;;  %v6212_v8 = vpop.f32.mrb[88].mxu1 }
 0x201   : > { %v6102_v0 = vadd.f32 %v6101_v3, %v6100_v60  ;;  %v6103_v31 = vpop.f32.mrb[90].mxu0  ;;  %v6213_v14 = vpop.f32.mrb[89].mxu1 }
 0x202   : > { %v6104_v22 = vpop.f32.mrb[91].mxu0  ;;  %v6214_v36 = vadd.f32 %v6213_v14, %v6212_v8  ;;  %v6215_v37 = vpop.f32.mrb[90].mxu1 }
 0x203   : > { %v2052_v61 = vadd.f32 %v6102_v0, %v8123_v21  ;;  %v6105_v53 = vadd.f32 %v6104_v22, %v6103_v31  ;;  %v6216_v54 = vpop.f32.mrb[91].mxu1 }
 0x204   : > { %v6217_v9 = vadd.f32 %v6216_v54, %v6215_v37 }
 0x205   : > { %v2055_v15 = vadd.f32 %v6105_v53, %v8129_v13  ;;  %v8270_v55 = vadd.f32 %v6214_v36, %v2052_v61 }
 0x207   : > { %v6106_v28 = vpop.f32.mrb[92].mxu0  ;;  %v8272_v5 = vadd.f32 %v6217_v9, %v2055_v15 }
 0x208   : > { %v6107_v30 = vpop.f32.mrb[93].mxu0  ;;  %v6218_v23 = vpop.f32.mrb[92].mxu1 }
 0x209   : > { %v6108_v6 = vadd.f32 %v6107_v30, %v6106_v28  ;;  %v6109_v41 = vpop.f32.mrb[94].mxu0  ;;  %v6219_v47 = vpop.f32.mrb[93].mxu1 }
 0x20a   : > { %v6110_v2 = vpop.f32.mrb[95].mxu0  ;;  %v6220_v11 = vadd.f32 %v6219_v47, %v6218_v23  ;;  %v6221_v25 = vpop.f32.mrb[94].mxu1 }
 0x20b   : > { %v2060_v21 = vadd.f32 %v6108_v6, %v8131_v24  ;;  %v6111_v27 = vadd.f32 %v6110_v2, %v6109_v41  ;;  %v6222_v56 = vpop.f32.mrb[95].mxu1 }
 0x20c   : > { %v6223_v39 = vadd.f32 %v6222_v56, %v6221_v25 }
 0x20d   : > { %v2063_v13 = vadd.f32 %v6111_v27, %v8137_v35  ;;  %v8276_v57 = vadd.f32 %v6220_v11, %v2060_v21 }
 0x20f   : > { %v6112_v26 = vpop.f32.mrb[96].mxu0  ;;  %v8278_v58 = vadd.f32 %v6223_v39, %v2063_v13 }
 0x210   : > { %v6113_v16 = vpop.f32.mrb[97].mxu0  ;;  %v6224_v60 = vpop.f32.mrb[96].mxu1 }
 0x211   : > { %v6114_v3 = vadd.f32 %v6113_v16, %v6112_v26  ;;  %v6115_v8 = vpop.f32.mrb[98].mxu0  ;;  %v6225_v0 = vpop.f32.mrb[97].mxu1 }
 0x212   : > { %v6116_v31 = vpop.f32.mrb[99].mxu0  ;;  %v6226_v14 = vadd.f32 %v6225_v0, %v6224_v60  ;;  %v6227_v22 = vpop.f32.mrb[98].mxu1 }
 0x213   : > { %v2068_v24 = vadd.f32 %v6114_v3, %v8139_v59  ;;  %v6117_v36 = vadd.f32 %v6116_v31, %v6115_v8  ;;  %v6228_v37 = vpop.f32.mrb[99].mxu1 }
 0x214   : > { %v6229_v61 = vadd.f32 %v6228_v37, %v6227_v22 }
 0x215   : > { %v2071_v35 = vadd.f32 %v6117_v36, %v8143_v51  ;;  %v8282_v53 = vadd.f32 %v6226_v14, %v2068_v24 }
 0x217   : > { %v6118_v54 = vpop.f32.mrb[100].mxu0  ;;  %v8284_v9 = vadd.f32 %v6229_v61, %v2071_v35 }
 0x218   : > { %v6119_v15 = vpop.f32.mrb[101].mxu0  ;;  %v6230_v28 = vpop.f32.mrb[100].mxu1 }
 0x219   : > { %v6120_v30 = vadd.f32 %v6119_v15, %v6118_v54  ;;  %v6121_v23 = vpop.f32.mrb[102].mxu0  ;;  %v6231_v6 = vpop.f32.mrb[101].mxu1 }
 0x21a   : > { %v6122_v41 = vpop.f32.mrb[103].mxu0  ;;  %v6232_v47 = vadd.f32 %v6231_v6, %v6230_v28  ;;  %v6233_v2 = vpop.f32.mrb[102].mxu1 }
 0x21b   : > { %v2076_v59 = vadd.f32 %v6120_v30, %v8147_v18  ;;  %v6123_v11 = vadd.f32 %v6122_v41, %v6121_v23  ;;  %v6234_v25 = vpop.f32.mrb[103].mxu1 }
 0x21c   : > { %v6235_v21 = vadd.f32 %v6234_v25, %v6233_v2 }
 0x21d   : > { %v2079_v51 = vadd.f32 %v6123_v11, %v8151_v38  ;;  %v8288_v27 = vadd.f32 %v6232_v47, %v2076_v59 }
 0x21f   : > { %v6124_v56 = vpop.f32.mrb[104].mxu0  ;;  %v8290_v39 = vadd.f32 %v6235_v21, %v2079_v51 }
 0x220   : > { %v6125_v13 = vpop.f32.mrb[105].mxu0  ;;  %v6236_v26 = vpop.f32.mrb[104].mxu1 }
 0x221   : > { %v6126_v16 = vadd.f32 %v6125_v13, %v6124_v56  ;;  %v6127_v60 = vpop.f32.mrb[106].mxu0  ;;  %v6237_v3 = vpop.f32.mrb[105].mxu1 }
 0x222   : > { %v6128_v8 = vpop.f32.mrb[107].mxu0  ;;  %v6238_v0 = vadd.f32 %v6237_v3, %v6236_v26  ;;  %v6239_v31 = vpop.f32.mrb[106].mxu1 }
 0x223   : > { %v2084_v18 = vadd.f32 %v6126_v16, %v8155_v50  ;;  %v6129_v14 = vadd.f32 %v6128_v8, %v6127_v60  ;;  %v6240_v22 = vpop.f32.mrb[107].mxu1 }
 0x224   : > { %v6241_v24 = vadd.f32 %v6240_v22, %v6239_v31 }
 0x225   : > { %v2087_v38 = vadd.f32 %v6129_v14, %v8159_v12  ;;  %v8294_v36 = vadd.f32 %v6238_v0, %v2084_v18 }
 0x227   : > { %v6130_v37 = vpop.f32.mrb[108].mxu0  ;;  %v8296_v61 = vadd.f32 %v6241_v24, %v2087_v38 }
 0x228   : > { %v6131_v35 = vpop.f32.mrb[109].mxu0  ;;  %v6242_v54 = vpop.f32.mrb[108].mxu1 }
 0x229   : > { %v6132_v15 = vadd.f32 %v6131_v35, %v6130_v37  ;;  %v6133_v28 = vpop.f32.mrb[110].mxu0  ;;  %v6243_v30 = vpop.f32.mrb[109].mxu1 }
 0x22a   : > { %v6134_v23 = vpop.f32.mrb[111].mxu0  ;;  %v6244_v6 = vadd.f32 %v6243_v30, %v6242_v54  ;;  %v6245_v41 = vpop.f32.mrb[110].mxu1 }
 0x22b   : > { %v2092_v50 = vadd.f32 %v6132_v15, %v8167_v43  ;;  %v6135_v47 = vadd.f32 %v6134_v23, %v6133_v28  ;;  %v6246_v2 = vpop.f32.mrb[111].mxu1 }
 0x22c   : > { %v6247_v59 = vadd.f32 %v6246_v2, %v6245_v41 }
 0x22d   : > { %v2095_v12 = vadd.f32 %v6135_v47, %v8172_v1  ;;  %v8300_v11 = vadd.f32 %v6244_v6, %v2092_v50 }
 0x22f   : > { %v6136_v25 = vpop.f32.mrb[112].mxu0  ;;  %v8302_v21 = vadd.f32 %v6247_v59, %v2095_v12 }
 0x230   : > { %v6137_v51 = vpop.f32.mrb[113].mxu0  ;;  %v6248_v56 = vpop.f32.mrb[112].mxu1 }
 0x231   : > { %v6138_v13 = vadd.f32 %v6137_v51, %v6136_v25  ;;  %v6139_v26 = vpop.f32.mrb[114].mxu0  ;;  %v6249_v16 = vpop.f32.mrb[113].mxu1 }
 0x232   : > { %v6140_v60 = vpop.f32.mrb[115].mxu0  ;;  %v6250_v3 = vadd.f32 %v6249_v16, %v6248_v56  ;;  %v6251_v8 = vpop.f32.mrb[114].mxu1 }
 0x233   : > { %v2100_v43 = vadd.f32 %v6138_v13, %v8186_v40  ;;  %v6141_v0 = vadd.f32 %v6140_v60, %v6139_v26  ;;  %v6252_v31 = vpop.f32.mrb[115].mxu1 }
 0x234   : > { %v6253_v18 = vadd.f32 %v6252_v31, %v6251_v8 }
 0x235   : > { %v2103_v1 = vadd.f32 %v6141_v0, %v8188_v48  ;;  %v8306_v14 = vadd.f32 %v6250_v3, %v2100_v43 }
 0x237   : > { %v6142_v22 = vpop.f32.mrb[116].mxu0  ;;  %v8308_v24 = vadd.f32 %v6253_v18, %v2103_v1 }
 0x238   : > { %v6143_v38 = vpop.f32.mrb[117].mxu0  ;;  %v6254_v37 = vpop.f32.mrb[116].mxu1 }
 0x239   : > { %v6144_v35 = vadd.f32 %v6143_v38, %v6142_v22  ;;  %v6145_v54 = vpop.f32.mrb[118].mxu0  ;;  %v6255_v15 = vpop.f32.mrb[117].mxu1 }
 0x23a   : > { %v6146_v28 = vpop.f32.mrb[119].mxu0  ;;  %v6256_v30 = vadd.f32 %v6255_v15, %v6254_v37  ;;  %v6257_v23 = vpop.f32.mrb[118].mxu1 }
 0x23b   : > { %v2108_v40 = vadd.f32 %v6144_v35, %v8202_v20  ;;  %v6147_v6 = vadd.f32 %v6146_v28, %v6145_v54  ;;  %v6258_v41 = vpop.f32.mrb[119].mxu1 }
 0x23c   : > { %v6259_v50 = vadd.f32 %v6258_v41, %v6257_v23 }
 0x23d   : > { %v2111_v48 = vadd.f32 %v6147_v6, %v8204_v33  ;;  %v8312_v47 = vadd.f32 %v6256_v30, %v2108_v40 }
 0x23f   : > { %v6148_v2 = vpop.f32.mrb[120].mxu0  ;;  %v8314_v59 = vadd.f32 %v6259_v50, %v2111_v48  ;;  %v8329_v50 = vld [vmem:[%s9517_s4] ss:$0 sm:$0xff] }
 0x240   : > { %v6149_v12 = vpop.f32.mrb[121].mxu0  ;;  %v6260_v25 = vpop.f32.mrb[120].mxu1 }
 0x241   : > { %v6150_v51 = vadd.f32 %v6149_v12, %v6148_v2  ;;  %v6151_v56 = vpop.f32.mrb[122].mxu0  ;;  %v6261_v13 = vpop.f32.mrb[121].mxu1 }
 0x242   : > { %v6152_v26 = vpop.f32.mrb[123].mxu0  ;;  %v6262_v16 = vadd.f32 %v6261_v13, %v6260_v25  ;;  %v6263_v60 = vpop.f32.mrb[122].mxu1 }
 0x243   : > { %v2116_v20 = vadd.f32 %v6150_v51, %v8218_v34  ;;  %v6153_v3 = vadd.f32 %v6152_v26, %v6151_v56  ;;  %v6264_v8 = vpop.f32.mrb[123].mxu1 }
 0x244   : > { %v6265_v43 = vadd.f32 %v6264_v8, %v6263_v60 }
 0x245   : > { %v2119_v33 = vadd.f32 %v6153_v3, %v8220_v42  ;;  %v8318_v0 = vadd.f32 %v6262_v16, %v2116_v20  ;;  %v7007_v20 = vld [vmem:[%s9516_s3 + $0x80] sm:$0xff]  }
 0x247   : > { %v6154_v31 = vpop.f32.mrb[124].mxu0  ;;  %v8320_v18 = vadd.f32 %v6265_v43, %v2119_v33 }
 0x248   : > { %v6155_v1 = vpop.f32.mrb[125].mxu0  ;;  %v6266_v22 = vpop.f32.mrb[124].mxu1 }
 0x249   : > { %v6156_v38 = vadd.f32 %v6155_v1, %v6154_v31  ;;  %v6157_v37 = vpop.f32.mrb[126].mxu0  ;;  %v6267_v35 = vpop.f32.mrb[125].mxu1  ;;  %v7008_v31 = vld [vmem:[%s9516_s3 + $0xc8] sm:$0xff]  }
 0x24a   : > { %v6158_v54 = vpop.f32.mrb[127].mxu0  ;;  %v6268_v15 = vadd.f32 %v6267_v35, %v6266_v22  ;;  %v6269_v28 = vpop.f32.mrb[126].mxu1 }
 0x24b   : > { %v2124_v34 = vadd.f32 %v6156_v38, %v8228_v46  ;;  %v6159_v30 = vadd.f32 %v6158_v54, %v6157_v37  ;;  %v6270_v23 = vpop.f32.mrb[127].mxu1  ;;  %v7009_v38 = vld [vmem:[%s9516_s3 + $0x88] sm:$0xff]  }
 0x24c   : > { %v6271_v40 = vadd.f32 %v6270_v23, %v6269_v28  ;;  %v7011_v23 = vld [vmem:[%s9516_s3 + $0x90] sm:$0xff]  }
 0x24d   : > { %v2127_v42 = vadd.f32 %v6159_v30, %v8230_v17  ;;  %v8324_v6 = vadd.f32 %v6268_v15, %v2124_v34  ;;  %v7010_v34 = vld [vmem:[%s9516_s3 + $0xd0] sm:$0xff]  }
 0x24f   : > { %v6786_v41 = vpop.f32.mrb[128].mxu0  ;;  %v8331_v48 = vadd.f32 %v6271_v40, %v2127_v42 }
 0x250   : > { %v8334_v2 = vadd.f32 %v6786_v41, %v8240_v19  ;;  %v2325_v12 = vpop.f32.mrb[129].mxu0 }
 0x251   : > { %v8337_v46 = vadd.f32 %v2325_v12, %v8234_v49  ;;  %v6787_v25 = vpop.f32.mrb[130].mxu0  ;;  %v7006_v49 = vld [vmem:[%s9516_s3 + $0xc0] sm:$0xff]  }
 0x252   : > { %v2461_v17 = vadd.f32 %v8329_v50, %v8334_v2  ;;  %v8342_v51 = vadd.f32 %v6787_v25, %v8242_v44  ;;  %v2328_v56 = vpop.f32.mrb[131].mxu0  ;;  %6408 = vmatprep.subr.bf16.mxu0 %v7006_v49  ;;  %v7013_v49 = vld [vmem:[%s9516_s3 + $0x98] sm:$0xff]  }
 0x253   : > { %v2459_v13 = vadd.f32 %v8329_v50, %v8337_v46  ;;  %v8347_v26 = vadd.f32 %v2328_v56, %v8236_v7  ;;  %6409 = vmatpush3.bf16.msra.mxu0 %v7007_v20 }
 0x254   : > { %v5714_v19 = vmul.f32 -1.442695, %v2461_v17  ;;  %v2462_v16 = vadd.f32 %v8329_v50, %v8342_v51  ;;  %6410 = vmatprep.subr.bf16.mxu0 %v7008_v31  ;;  %v7012_v17 = vld [vmem:[%s9516_s3 + $0xd8] sm:$0xff]  }
 0x255   : > { %v5712_v60 = vmul.f32 -1.442695, %v2459_v13  ;;  %v2460_v44 = vadd.f32 %v8329_v50, %v8347_v26 }
 0x256   : > { %7062 = vpow2.f32 %v5714_v19  ;;  %v5715_v3 = vmul.f32 -1.442695, %v2462_v16 }
 0x257   : > { %7064 = vpow2.f32 %v5712_v60  ;;  %v5713_v7 = vmul.f32 -1.442695, %v2460_v44  ;;  %v6790_v8 = vpop.f32.mrb[132].mxu0  ;;  %6411 = vmatpush3.bf16.msra.mxu0 %v7009_v38 }
 0x258   : > { %7066 = vpow2.f32 %v5715_v3  ;;  %v8360_v43 = vadd.f32 %v6790_v8, %v8252_v62  ;;  %v2341_v33 = vpop.f32.mrb[133].mxu0  ;;  %6412 = vmatprep.subr.bf16.mxu0 %v7010_v34 }
 0x259   : > { %7068 = vpow2.f32 %v5713_v7  ;;  %v8366_v1 = vadd.f32 %v2341_v33, %v8246_v32  ;;  %v6791_v22 = vpop.f32.mrb[134].mxu0 }
 0x25a   : > { %v2465_v37 = vadd.f32 %v8329_v50, %v8360_v43  ;;  %v8374_v62 = vadd.f32 %v6791_v22, %v8254_v10  ;;  %v2344_v35 = vpop.f32.mrb[135].mxu0 }
 0x25b   : > { %v2463_v54 = vadd.f32 %v8329_v50, %v8366_v1  ;;  %v8379_v15 = vadd.f32 %v2344_v35, %v8248_v45  ;;  %6413 = vmatpush3.bf16.msra.mxu0 %v7011_v23  ;;  %v7016_v23 = vld [vmem:[%s9516_s3 + $0xe8] sm:$0xff]  }
 0x25c   : > { %v5718_v32 = vmul.f32 -1.442695, %v2465_v37  ;;  %v2466_v28 = vadd.f32 %v8329_v50, %v8374_v62  ;;  %6414 = vmatprep.subr.bf16.mxu0 %v7012_v17 }
 0x25d   : > { %v5716_v30 = vmul.f32 -1.442695, %v2463_v54  ;;  %v2464_v10 = vadd.f32 %v8329_v50, %v8379_v15 }
 0x25e   : > { %7070 = vpow2.f32 %v5718_v32  ;;  %v5719_v45 = vmul.f32 -1.442695, %v2466_v28 }
 0x25f   : > { %7072 = vpow2.f32 %v5716_v30  ;;  %v5717_v40 = vmul.f32 -1.442695, %v2464_v10  ;;  %v6794_v42 = vpop.f32.mrb[136].mxu0  ;;  %6415 = vmatpush3.bf16.msra.mxu0 %v7013_v49 }
 0x260   : > { %v7063_v41 = vpop.eup %7062  ;;  %7074 = vpow2.f32 %v5719_v45  ;;  %v8392_v12 = vadd.f32 %v6794_v42, %v8264_v52  ;;  %v2357_v25 = vpop.f32.mrb[137].mxu0 }
 0x261   : > { %v7065_v56 = vpop.eup %7064  ;;  %v2589_v13 = vadd.f32 1.0, %v7063_v41  ;;  %7076 = vpow2.f32 %v5717_v40  ;;  %v8398_v19 = vadd.f32 %v2357_v25, %v8258_v4  ;;  %v6795_v16 = vpop.f32.mrb[138].mxu0  ;;  %v7017_v25 = vld [vmem:[%s9516_s3 + $0xa8] sm:$0xff]  }
 0x262   : > { %v7067_v60 = vpop.eup %7066  ;;  %v2587_v44 = vadd.f32 1.0, %v7065_v56  ;;  %v2469_v52 = vadd.f32 %v8329_v50, %v8392_v12  ;;  %v8406_v20 = vadd.f32 %v6795_v16, %v8266_v63  ;;  %v2360_v3 = vpop.f32.mrb[139].mxu0  ;;  %v7014_v63 = vld [vmem:[%s9516_s3 + $0xe0] sm:$0xff]  }
 0x263   : > { %v7069_v7 = vpop.eup %7068  ;;  %7078 = vrcp.f32 %v2589_v13  ;;  %v2590_v8 = vadd.f32 1.0, %v7067_v60  ;;  %v2467_v4 = vadd.f32 %v8329_v50, %v8398_v19  ;;  %v8411_v33 = vadd.f32 %v2360_v3, %v8260_v29  ;;  %v7015_v29 = vld [vmem:[%s9516_s3 + $0xa0] sm:$0xff]   ;;  %6416 = vmatprep.subr.bf16.mxu0 %v7014_v63 }
 0x264   : > { %7080 = vrcp.f32 %v2587_v44  ;;  %v2588_v31 = vadd.f32 1.0, %v7069_v7  ;;  %v5722_v22 = vmul.f32 -1.442695, %v2469_v52  ;;  %v2470_v38 = vadd.f32 %v8329_v50, %v8406_v20  ;;  %6417 = vmatpush3.bf16.msra.mxu0 %v7015_v29 }
 0x265   : > { %7082 = vrcp.f32 %v2590_v8  ;;  %v5720_v37 = vmul.f32 -1.442695, %v2467_v4  ;;  %v2468_v35 = vadd.f32 %v8329_v50, %v8411_v33  ;;  %6418 = vmatprep.subr.bf16.mxu0 %v7016_v23  ;;  %v7019_v8 = vld [vmem:[%s9516_s3 + $0x140] sm:$0xff]  }
 0x266   : > { %7084 = vrcp.f32 %v2588_v31  ;;  %v5723_v54 = vmul.f32 -1.442695, %v2470_v38  ;;  %6520 = vmatprep.subr.bf16.mxu1 %v7019_v8 }
 0x267   : > { %7086 = vpow2.f32 %v5722_v22  ;;  %v5721_v32 = vmul.f32 -1.442695, %v2468_v35  ;;  %v6798_v28 = vpop.f32.mrb[140].mxu0  ;;  %v7020_v22 = vld [vmem:[%s9516_s3 + $0xb0] sm:$0xff]  }
 0x268   : > { %v7071_v34 = vpop.eup %7070  ;;  %7088 = vpow2.f32 %v5720_v37  ;;  %v8424_v30 = vadd.f32 %v6798_v28, %v8276_v57  ;;  %v2373_v10 = vpop.f32.mrb[141].mxu0  ;;  %6419 = vmatpush3.bf16.msra.mxu0 %v7017_v25 }
 0x269   : > { %v7073_v45 = vpop.eup %7072  ;;  %v2593_v40 = vadd.f32 1.0, %v7071_v34  ;;  %7090 = vpow2.f32 %v5723_v54  ;;  %v8430_v42 = vadd.f32 %v2373_v10, %v8270_v55  ;;  %v6799_v41 = vpop.f32.mrb[142].mxu0  ;;  %v7022_v34 = vld [vmem:[%s9516_s3 + $0xf8] sm:$0xff]  }
 0x26a   : > { %v7075_v17 = vpop.eup %7074  ;;  %v2591_v56 = vadd.f32 1.0, %v7073_v45  ;;  %7092 = vpow2.f32 %v5721_v32  ;;  %v2473_v57 = vadd.f32 %v8329_v50, %v8424_v30  ;;  %v8438_v13 = vadd.f32 %v6799_v41, %v8278_v58  ;;  %v2376_v16 = vpop.f32.mrb[143].mxu0  ;;  %v7018_v58 = vld [vmem:[%s9516_s3 + $0xf0] sm:$0xff]  }
 0x26b   : > { %v7077_v49 = vpop.eup %7076  ;;  %7094 = vrcp.f32 %v2593_v40  ;;  %v2594_v55 = vadd.f32 1.0, %v7075_v17  ;;  %v2471_v60 = vadd.f32 %v8329_v50, %v8430_v42  ;;  %v8443_v44 = vadd.f32 %v2376_v16, %v8272_v5  ;;  %6420 = vmatprep.subr.bf16.mxu0 %v7018_v58  ;;  %v7023_v40 = vld [vmem:[%s9516_s3 + $0xb8] sm:$0xff]  }
 0x26c   : > { %7096 = vrcp.f32 %v2591_v56  ;;  %v2592_v52 = vadd.f32 1.0, %v7077_v49  ;;  %v5726_v3 = vmul.f32 -1.442695, %v2473_v57  ;;  %v2474_v7 = vadd.f32 %v8329_v50, %v8438_v13  ;;  %6421 = vmatpush3.bf16.msra.mxu0 %v7020_v22 }
 0x26d   : > { %v8453_v4 = vpop.eup %7078  ;;  %7098 = vrcp.f32 %v2594_v55  ;;  %v5724_v5 = vmul.f32 -1.442695, %v2471_v60  ;;  %v2472_v31 = vadd.f32 %v8329_v50, %v8443_v44  ;;  %6422 = vmatprep.subr.bf16.mxu0 %v7022_v34 }
 0x26e   : > { %v8460_v38 = vpop.eup %7080  ;;  %7100 = vrcp.f32 %v2592_v52  ;;  %v5727_v63 = vmul.f32 -1.442695, %v2474_v7  ;;  %2751 = vrot.lane.b32.xlu1 %v8453_v4, %s7388_s7 }
 0x26f   : > { %v8464_v37 = vpop.eup %7082  ;;  %7102 = vpow2.f32 %v5726_v3  ;;  %v5725_v35 = vmul.f32 -1.442695, %v2472_v31  ;;  %v6802_v29 = vpop.f32.mrb[144].mxu0  ;;  %2747 = vrot.lane.b32.xlu0 %v8460_v38, %s7388_s7  ;;  %v7021_v31 = vld [vmem:[%s9516_s3 + $0x100] sm:$0xff]  }
 0x270   : > { %v8468_v54 = vpop.eup %7084  ;;  %7104 = vpow2.f32 %v5724_v5  ;;  %v8471_v32 = vadd.f32 %v6802_v29, %v8288_v27  ;;  %v2389_v28 = vpop.f32.mrb[145].mxu0  ;;  %6423 = vmatpush3.bf16.msra.mxu0 %v7023_v40  ;;  %6521 = vmatpush3.bf16.msra.mxu1 %v7021_v31 }
 0x271   : > { %v7087_v10 = vpop.eup %7086  ;;  %7106 = vpow2.f32 %v5727_v63  ;;  %v8477_v23 = vadd.f32 %v2389_v28, %v8282_v53  ;;  %v6803_v45 = vpop.f32.mrb[146].mxu0 }
 0x272   : > { %v7089_v41 = vpop.eup %7088  ;;  %v2597_v25 = vadd.f32 1.0, %v7087_v10  ;;  %7108 = vpow2.f32 %v5725_v35  ;;  %v2477_v27 = vadd.f32 %v8329_v50, %v8471_v32  ;;  %v8485_v17 = vadd.f32 %v6803_v45, %v8290_v39  ;;  %v2392_v56 = vpop.f32.mrb[147].mxu0  ;;  %2753 = vrot.lane.b32.xlu1 %v8464_v37, %s7388_s7 }
 0x273   : > { %v7091_v53 = vpop.eup %7090  ;;  %v2595_v57 = vadd.f32 1.0, %v7089_v41  ;;  %v2475_v16 = vadd.f32 %v8329_v50, %v8477_v23  ;;  %v8492_v49 = vadd.f32 %v2392_v56, %v8284_v9  ;;  %2749 = vrot.lane.b32.xlu0 %v8468_v54, %s7388_s7 }
 0x274   : > { %v7093_v55 = vpop.eup %7092  ;;  %7110 = vrcp.f32 %v2597_v25  ;;  %v2598_v39 = vadd.f32 1.0, %v7091_v53  ;;  %v5730_v60 = vmul.f32 -1.442695, %v2477_v27  ;;  %v2478_v52 = vadd.f32 %v8329_v50, %v8485_v17 }
 0x275   : > { %v8498_v3 = vpop.eup %7094  ;;  %7112 = vrcp.f32 %v2595_v57  ;;  %v2596_v7 = vadd.f32 1.0, %v7093_v55  ;;  %v5728_v58 = vmul.f32 -1.442695, %v2475_v16  ;;  %v2476_v9 = vadd.f32 %v8329_v50, %v8492_v49 }
 0x276   : > { %v8502_v8 = vpop.eup %7096  ;;  %7114 = vrcp.f32 %v2598_v39  ;;  %v5731_v5 = vmul.f32 -1.442695, %v2478_v52 }
 0x277   : > { %v8507_v22 = vpop.eup %7098  ;;  %7116 = vrcp.f32 %v2596_v7  ;;  %v5729_v63 = vmul.f32 -1.442695, %v2476_v9  ;;  %v6806_v35 = vpop.f32.mrb[148].mxu0  ;;  %2755 = vrot.lane.b32.xlu0 %v8502_v8, %s7388_s7 }
 0x278   : > { %v8511_v29 = vpop.eup %7100  ;;  %7118 = vpow2.f32 %v5730_v60  ;;  %v8514_v28 = vadd.f32 %v6806_v35, %v8300_v11  ;;  %v2405_v34 = vpop.f32.mrb[149].mxu0 }
 0x279   : > { %v7103_v10 = vpop.eup %7102  ;;  %7120 = vpow2.f32 %v5728_v58  ;;  %v8517_v45 = vadd.f32 %v2405_v34, %v8294_v36  ;;  %v6807_v40 = vpop.f32.mrb[150].mxu0  ;;  %2757 = vrot.lane.b32.xlu1 %v8511_v29, %s7388_s7  ;;  %v7025_v34 = vld [vmem:[%s9516_s3 + $0x108] sm:$0xff]  }
 0x27a   : > { %v7105_v41 = vpop.eup %7104  ;;  %v2601_v25 = vadd.f32 1.0, %v7103_v10  ;;  %7122 = vpow2.f32 %v5731_v5  ;;  %v2481_v27 = vadd.f32 %v8329_v50, %v8514_v28  ;;  %v8524_v11 = vadd.f32 %v6807_v40, %v8302_v21  ;;  %v2408_v56 = vpop.f32.mrb[151].mxu0 }
 0x27b   : > { %v7107_v53 = vpop.eup %7106  ;;  %v2599_v57 = vadd.f32 1.0, %v7105_v41  ;;  %7124 = vpow2.f32 %v5729_v63  ;;  %v2479_v36 = vadd.f32 %v8329_v50, %v8517_v45  ;;  %v8529_v16 = vadd.f32 %v2408_v56, %v8296_v61  ;;  %2759 = vrot.lane.b32.xlu0 %v8498_v3, %s7388_s7  ;;  %v7024_v61 = vld [vmem:[%s9516_s3 + $0x148] sm:$0xff]  }
 0x27c   : > { %v7109_v55 = vpop.eup %7108  ;;  %7126 = vrcp.f32 %v2601_v25  ;;  %v2602_v39 = vadd.f32 1.0, %v7107_v53  ;;  %v5734_v60 = vmul.f32 -1.442695, %v2481_v27  ;;  %v2482_v21 = vadd.f32 %v8329_v50, %v8524_v11  ;;  %6522 = vmatprep.subr.bf16.mxu1 %v7024_v61 }
 0x27d   : > { %7128 = vrcp.f32 %v2599_v57  ;;  %v2600_v52 = vadd.f32 1.0, %v7109_v55  ;;  %v5732_v7 = vmul.f32 -1.442695, %v2479_v36  ;;  %v2480_v58 = vadd.f32 %v8329_v50, %v8529_v16  ;;  %2761 = vrot.lane.b32.xlu1 %v8507_v22, %s7388_s7  ;;  %6523 = vmatpush3.bf16.msra.mxu1 %v7025_v34 }
 0x27e   : > { %v8542_v9 = vpop.eup %7110  ;;  %7130 = vrcp.f32 %v2602_v39  ;;  %v5735_v5 = vmul.f32 -1.442695, %v2482_v21 }
 0x27f   : > { %v8544_v31 = vpop.eup %7112  ;;  %7132 = vrcp.f32 %v2600_v52  ;;  %v5733_v63 = vmul.f32 -1.442695, %v2480_v58  ;;  %v6810_v35 = vpop.f32.mrb[152].mxu0 }
 0x280   : > { %9549 = vst [vmem:[#allocation10_spill] sm:$0xff] %v8544_v31  ;;  %v8549_v10 = vpop.eup %7114  ;;  %7134 = vpow2.f32 %v5734_v60  ;;  %v8552_v40 = vadd.f32 %v6810_v35, %v8312_v47  ;;  %2763 = vrot.lane.b32.xlu0 %v8544_v31, %s7388_s7  ;;  %v2421_v41 = vpop.f32.mrb[153].mxu0 }
 0x281   : > { %9550 = vst [vmem:[#allocation11_spill] sm:$0xff] %v8549_v10  ;;  %v8556_v25 = vpop.eup %7116  ;;  %7136 = vpow2.f32 %v5732_v7  ;;  %v8559_v27 = vadd.f32 %v2421_v41, %v8306_v14  ;;  %v6811_v56 = vpop.f32.mrb[154].mxu0 }
 0x282   : > { %9551 = vst [vmem:[#allocation12_spill] sm:$0xff] %v8556_v25  ;;  %v7119_v53 = vpop.eup %7118  ;;  %7138 = vpow2.f32 %v5735_v5  ;;  %v2485_v57 = vadd.f32 %v8329_v50, %v8552_v40  ;;  %v8564_v47 = vadd.f32 %v6811_v56, %v8314_v59  ;;  %2765 = vrot.lane.b32.xlu1 %v8556_v25, %s7388_s7  ;;  %v2424_v36 = vpop.f32.mrb[155].mxu0 }
 0x283   : > { %v7121_v55 = vpop.eup %7120  ;;  %v2605_v39 = vadd.f32 1.0, %v7119_v53  ;;  %7140 = vpow2.f32 %v5733_v63  ;;  %v2483_v14 = vadd.f32 %v8329_v50, %v8559_v27  ;;  %v8571_v60 = vadd.f32 %v2424_v36, %v8308_v24 }
 0x284   : > { %v7123_v21 = vpop.eup %7122  ;;  %v2603_v52 = vadd.f32 1.0, %v7121_v55  ;;  %v2486_v7 = vadd.f32 %v8329_v50, %v8564_v47  ;;  %2767 = vrot.lane.b32.xlu0 %v8542_v9, %s7388_s7  ;;  %v5738_v61 = vmul.f32 -1.442695, %v2485_v57 }
 0x285   : > { %v7125_v59 = vpop.eup %7124  ;;  %7142 = vrcp.f32 %v2605_v39  ;;  %v2606_v58 = vadd.f32 1.0, %v7123_v21  ;;  %v2484_v5 = vadd.f32 %v8329_v50, %v8571_v60  ;;  %v5736_v35 = vmul.f32 -1.442695, %v2483_v14 }
 0x286   : > { %v8579_v63 = vpop.eup %7126  ;;  %7144 = vrcp.f32 %v2603_v52  ;;  %v2604_v24 = vadd.f32 1.0, %v7125_v59  ;;  %2769 = vrot.lane.b32.xlu1 %v8549_v10, %s7388_s7  ;;  %v5739_v41 = vmul.f32 -1.442695, %v2486_v7 }
 0x287   : > { %9552 = vst [vmem:[#allocation13_spill] sm:$0xff] %v8579_v63  ;;  %v8583_v34 = vpop.eup %7128  ;;  %7146 = vrcp.f32 %v2606_v58  ;;  %v6814_v56 = vpop.f32.mrb[156].mxu0  ;;  %v5737_v57 = vmul.f32 -1.442695, %v2484_v5 }
 0x288   : > { %9553 = vst [vmem:[#allocation14_spill] sm:$0xff] %v8583_v34  ;;  %v8585_v53 = vpop.eup %7130  ;;  %7148 = vrcp.f32 %v2604_v24  ;;  %v8588_v36 = vadd.f32 %v6814_v56, %v8324_v6  ;;  %2771 = vrot.lane.b32.xlu0 %v8583_v34, %s7388_s7  ;;  %v2437_v55 = vpop.f32.mrb[157].mxu0 }
 0x289   : > { %9554 = vst [vmem:[#allocation15_spill] sm:$0xff] %v8585_v53  ;;  %v8592_v39 = vpop.eup %7132  ;;  %7150 = vpow2.f32 %v5738_v61  ;;  %v8595_v14 = vadd.f32 %v2437_v55, %v8318_v0  ;;  %v6815_v21 = vpop.f32.mrb[158].mxu0 }
 0x28a   : > { %9555 = vst [vmem:[#allocation16_spill] sm:$0xff] %v8592_v39  ;;  %v7135_v52 = vpop.eup %7134  ;;  %7152 = vpow2.f32 %v5736_v35  ;;  %v2489_v7 = vadd.f32 %v8329_v50, %v8588_v36  ;;  %v8600_v59 = vadd.f32 %v6815_v21, %v8331_v48  ;;  %2773 = vrot.lane.b32.xlu1 %v8592_v39, %s7388_s7  ;;  %v2440_v6 = vpop.f32.mrb[159].mxu0 }
 0x28b   : > { %v7137_v58 = vpop.eup %7136  ;;  %v2609_v5 = vadd.f32 1.0, %v7135_v52  ;;  %7154 = vpow2.f32 %v5739_v41  ;;  %v2487_v0 = vadd.f32 %v8329_v50, %v8595_v14  ;;  %v8607_v61 = vadd.f32 %v2440_v6, %v8320_v18 }
 0x28c   : > { %v7139_v24 = vpop.eup %7138  ;;  %v2607_v35 = vadd.f32 1.0, %v7137_v58  ;;  %7156 = vpow2.f32 %v5737_v57  ;;  %v2490_v48 = vadd.f32 %v8329_v50, %v8600_v59  ;;  %2775 = vrot.lane.b32.xlu0 %v8579_v63, %s7388_s7  ;;  %v5742_v21 = vmul.f32 -1.442695, %v2489_v7  ;;  %v7026_v57 = vld [vmem:[%s9516_s3 + $0x150] sm:$0xff]  }
 0x28d   : > { %v7141_v56 = vpop.eup %7140  ;;  %7158 = vrcp.f32 %v2609_v5  ;;  %v2610_v55 = vadd.f32 1.0, %v7139_v24  ;;  %v2488_v41 = vadd.f32 %v8329_v50, %v8607_v61  ;;  %v5740_v18 = vmul.f32 -1.442695, %v2487_v0  ;;  %6524 = vmatprep.subr.bf16.mxu1 %v7026_v57  ;;  %v7027_v50 = vld [vmem:[%s9516_s3 + $0x110] sm:$0xff]  }
 0x28e   : > { %7160 = vrcp.f32 %v2607_v35  ;;  %v2608_v52 = vadd.f32 1.0, %v7141_v56  ;;  %2777 = vrot.lane.b32.xlu1 %v8585_v53, %s7388_s7  ;;  %v5743_v58 = vmul.f32 -1.442695, %v2490_v48  ;;  %6525 = vmatpush3.bf16.msra.mxu1 %v7027_v50 }
 0x28f   : > { %v8620_v6 = vpop.eup %7142  ;;  %7162 = vrcp.f32 %v2610_v55  ;;  %v5741_v7 = vmul.f32 -1.442695, %v2488_v41 }
 0x290   : > { %9556 = vst [vmem:[#allocation17_spill] sm:$0xff] %v8620_v6  ;;  %v8622_v5 = vpop.eup %7144  ;;  %7164 = vrcp.f32 %v2608_v52 }
 0x291   : > { %9557 = vst [vmem:[#allocation18_spill] sm:$0xff] %v8622_v5  ;;  %v8627_v0 = vpop.eup %7146  ;;  %7166 = vpow2.f32 %v5742_v21  ;;  %2779 = vrot.lane.b32.xlu0 %v8622_v5, %s7388_s7 }
 0x292   : > { %9558 = vst [vmem:[#allocation19_spill] sm:$0xff] %v8627_v0  ;;  %v8631_v24 = vpop.eup %7148  ;;  %7168 = vpow2.f32 %v5740_v18 }
 0x293   : > { %9559 = vst [vmem:[#allocation20_spill] sm:$0xff] %v8631_v24  ;;  %v7151_v35 = vpop.eup %7150  ;;  %7170 = vpow2.f32 %v5743_v58  ;;  %2781 = vrot.lane.b32.xlu1 %v8631_v24, %s7388_s7 }
 0x294   : > { %v7153_v48 = vpop.eup %7152  ;;  %7172 = vpow2.f32 %v5741_v7  ;;  %v2613_v52 = vadd.f32 1.0, %v7151_v35 }
 0x295   : > { %v7155_v56 = vpop.eup %7154  ;;  %v2611_v55 = vadd.f32 1.0, %v7153_v48  ;;  %2783 = vrot.lane.b32.xlu0 %v8620_v6, %s7388_s7 }
 0x296   : > { %v7157_v21 = vpop.eup %7156  ;;  %v2614_v50 = vadd.f32 1.0, %v7155_v56 }
 0x297   : > { %v8637_v41 = vpop.eup %7158  ;;  %7174 = vrcp.f32 %v2611_v55  ;;  %v2612_v57 = vadd.f32 1.0, %v7157_v21  ;;  %2785 = vrot.lane.b32.xlu1 %v8627_v0, %s7388_s7 }
 0x298   : > { %9560 = vst [vmem:[#allocation21_spill] sm:$0xff] %v8637_v41  ;;  %v8641_v18 = vpop.eup %7160 }
 0x299   : > { %9561 = vst [vmem:[#allocation22_spill] sm:$0xff] %v8641_v18  ;;  %v8643_v58 = vpop.eup %7162  ;;  %7176 = vrcp.f32 %v2612_v57  ;;  %2787 = vrot.lane.b32.xlu0 %v8641_v18, %s7388_s7 }
 0x29a   : > { %9562 = vst [vmem:[#allocation23_spill] sm:$0xff] %v8643_v58  ;;  %v8647_v7 = vpop.eup %7164  ;;  %7178 = vrcp.f32 %v2613_v52  ;;  %v7028_v52 = vld [vmem:[%s9516_s3 + $0x158] sm:$0xff]  }
 0x29b   : > { %9563 = vst [vmem:[#allocation24_spill] sm:$0xff] %v8647_v7  ;;  %v7167_v48 = vpop.eup %7166  ;;  %2789 = vrot.lane.b32.xlu1 %v8647_v7, %s7388_s7  ;;  %7180 = vrcp.f32 %v2614_v50  ;;  %6526 = vmatprep.subr.bf16.mxu1 %v7028_v52  ;;  %v7029_v50 = vld [vmem:[%s9516_s3 + $0x118] sm:$0xff]  }
 0x29c   : > { %v7169_v35 = vpop.eup %7168  ;;  %v2617_v56 = vadd.f32 1.0, %v7167_v48  ;;  %6527 = vmatpush3.bf16.msra.mxu1 %v7029_v50 }
 0x29d   : > { %v7171_v55 = vpop.eup %7170  ;;  %v2615_v21 = vadd.f32 1.0, %v7169_v35  ;;  %2791 = vrot.lane.b32.xlu0 %v8637_v41, %s7388_s7  ;;  %v6312_v35 = vpop.f32.mrb[128].mxu1 }
 0x29e   : > { %v7173_v24 = vpop.eup %7172  ;;  %v2618_v7 = vadd.f32 1.0, %v7171_v55 }
 0x29f   : > { %7182 = vrcp.f32 %v2615_v21  ;;  %v2616_v57 = vadd.f32 1.0, %v7173_v24  ;;  %2793 = vrot.lane.b32.xlu1 %v8643_v58, %s7388_s7  ;;  %v6313_v24 = vpop.f32.mrb[129].mxu1 }
 0x2a0   : > { %v8667_v21 = vadd.f32 %v6313_v24, %v6312_v35  ;;  %v6315_v58 = vpop.f32.mrb[130].mxu1  ;;  %v7033_v24 = vld [vmem:[%s9516_s3 + $0x120] sm:$0xff]  }
 0x2a1   : > { %v8658_v18 = vpop.eup %7174  ;;  %7184 = vrcp.f32 %v2616_v57  ;;  %v6316_v55 = vpop.f32.mrb[131].mxu1 }
 0x2a2   : > { %9564 = vst [vmem:[#allocation25_spill] sm:$0xff] %v8658_v18  ;;  %2795 = vrot.lane.b32.xlu0 %v8658_v18, %s7388_s7  ;;  %7186 = vrcp.f32 %v2617_v56  ;;  %v8673_v52 = vadd.f32 %v6316_v55, %v6315_v58  ;;  %v7030_v56 = vld [vmem:[%s9516_s3 + $0x1c0] sm:$0xff]  }
 0x2a3   : > { %v8665_v48 = vpop.eup %7176  ;;  %7188 = vrcp.f32 %v2618_v7  ;;  %6632 = vmatprep.subr.bf16.mxu0 %v7030_v56  ;;  %v7032_v7 = vld [vmem:[%s9516_s3 + $0x160] sm:$0xff]   ;;  %v7036_v56 = vld [vmem:[%s9516_s3 + $0x168] sm:$0xff]  }
 0x2a4   : > { %9565 = vst [vmem:[#allocation26_spill] sm:$0xff] %v8665_v48  ;;  %2797 = vrot.lane.b32.xlu1 %v8665_v48, %s7388_s7  ;;  %v8671_v57 = vpop.eup %7178  ;;  %6528 = vmatprep.subr.bf16.mxu1 %v7032_v7  ;;  %v2690_v7 = vld [vmem:[%s7536_s13 + $0x38] sm:$0xff] }
 0x2a5   : > { %9566 = vst [vmem:[#allocation27_spill] sm:$0xff] %v8671_v57  ;;  %v8677_v18 = vpop.eup %7180  ;;  %6529 = vmatpush3.bf16.msra.mxu1 %v7033_v24 }
 0x2a6   : > { %2799 = vrot.lane.b32.xlu0 %v8671_v57, %s7388_s7  ;;  %9567 = vst [vmem:[#allocation28_spill] sm:$0xff] %v8677_v18  ;;  %6530 = vmatprep.subr.bf16.mxu1 %v7036_v56 }
 0x2a8   : > { %2801 = vrot.lane.b32.xlu1 %v8677_v18, %s7388_s7 }
 0x2a9   : > { %v8684_v50 = vpop.eup %7182 }
 0x2aa   : > { %9568 = vst [vmem:[#allocation29_spill] sm:$0xff] %v8684_v50  ;;  %2803 = vrot.lane.b32.xlu0 %v8684_v50, %s7388_s7  ;;  %v2711_v50 = vld [vmem:[%s7536_s13 + $0xe0] sm:$0xff] }
 0x2ab   : > { %v8688_v58 = vpop.eup %7184 }
 0x2ac   : > { %9569 = vst [vmem:[#allocation30_spill] sm:$0xff] %v8688_v58  ;;  %2805 = vrot.lane.b32.xlu1 %v8688_v58, %s7388_s7  ;;  %v8695_v35 = vpop.eup %7186 }
 0x2ad   : > { %9570 = vst [vmem:[#allocation31_spill] sm:$0xff] %v8695_v35  ;;  %v8702_v55 = vpop.eup %7188 }
 0x2ae   : > { %2807 = vrot.lane.b32.xlu0 %v8695_v35, %s7388_s7  ;;  %9571 = vst [vmem:[#allocation32_spill] sm:$0xff] %v8702_v55  ;;  %v2714_v35 = vld [vmem:[%s7536_s13 + $0xf8] sm:$0xff] }
 0x2b0   : > { %2809 = vrot.lane.b32.xlu1 %v8702_v55, %s7388_s7 }
 0x2b2   : > { %3805 = vrot.lane.b32.xlu0 %v8337_v46, %s7389_s18  ;;  %v7040_v46 = vld [vmem:[%s9516_s3 + $0x170] sm:$0xff]  }
 0x2b4   : > { %3807 = vrot.lane.b32.xlu1 %v8347_v26, %s7389_s18  ;;  %v7044_v26 = vld [vmem:[%s9516_s3 + $0x178] sm:$0xff]  }
 0x2b6   : > { %3809 = vrot.lane.b32.xlu0 %v8334_v2, %s7389_s18  ;;  %v7037_v2 = vld [vmem:[%s9516_s3 + $0x128] sm:$0xff]  }
 0x2b7   : > { %6531 = vmatpush3.bf16.msra.mxu1 %v7037_v2 }
 0x2b8   : > { %3811 = vrot.lane.b32.xlu1 %v8342_v51, %s7389_s18  ;;  %6532 = vmatprep.subr.bf16.mxu1 %v7040_v46  ;;  %v7041_v51 = vld [vmem:[%s9516_s3 + $0x130] sm:$0xff]  }
 0x2ba   : > { %3813 = vrot.lane.b32.xlu0 %v8366_v1, %s7389_s18  ;;  %v7045_v1 = vld [vmem:[%s9516_s3 + $0x138] sm:$0xff]  }
 0x2bb   : > { %6533 = vmatpush3.bf16.msra.mxu1 %v7041_v51 }
 0x2bc   : > { %3815 = vrot.lane.b32.xlu1 %v8379_v15, %s7389_s18  ;;  %6534 = vmatprep.subr.bf16.mxu1 %v7044_v26 }
 0x2be   : > { %3817 = vrot.lane.b32.xlu0 %v8360_v43, %s7389_s18  ;;  %v2685_v43 = vld [vmem:[%s7536_s13 + $0x10] sm:$0xff] }
 0x2bf   : > { %6535 = vmatpush3.bf16.msra.mxu1 %v7045_v1 }
 0x2c0   : > { %3819 = vrot.lane.b32.xlu1 %v8374_v62, %s7389_s18  ;;  %v2683_v62 = vld [vmem:[%s7536_s13] sm:$0xff] }
 0x2c2   : > { %3821 = vrot.lane.b32.xlu0 %v8398_v19, %s7389_s18 }
 0x2c4   : > { %3823 = vrot.lane.b32.xlu1 %v8411_v33, %s7389_s18  ;;  %v2686_v33 = vld [vmem:[%s7536_s13 + $0x18] sm:$0xff] }
 0x2c6   : > { %3825 = vrot.lane.b32.xlu0 %v8392_v12, %s7389_s18 }
 0x2c8   : > { %3827 = vrot.lane.b32.xlu1 %v8406_v20, %s7389_s18 }
 0x2ca   : > { %3829 = vrot.lane.b32.xlu0 %v8430_v42, %s7389_s18 }
 0x2cc   : > { %3831 = vrot.lane.b32.xlu1 %v8443_v44, %s7389_s18 }
 0x2ce   : > { %3833 = vrot.lane.b32.xlu0 %v8424_v30, %s7389_s18  ;;  %v2684_v30 = vld [vmem:[%s7536_s13 + $0x8] sm:$0xff] }
 0x2d0   : > { %3835 = vrot.lane.b32.xlu1 %v8438_v13, %s7389_s18 }
 0x2d2   : > { %3837 = vrot.lane.b32.xlu0 %v8477_v23, %s7389_s18  ;;  %v2687_v23 = vld [vmem:[%s7536_s13 + $0x20] sm:$0xff] }
 0x2d4   : > { %3839 = vrot.lane.b32.xlu1 %v8492_v49, %s7389_s18 }
 0x2d6   : > { %3841 = vrot.lane.b32.xlu0 %v8471_v32, %s7389_s18 }
 0x2d8   : > { %3843 = vrot.lane.b32.xlu1 %v8485_v17, %s7389_s18 }
 0x2da   : > { %3845 = vrot.lane.b32.xlu0 %v8517_v45, %s7389_s18 }
 0x2dc   : > { %3847 = vrot.lane.b32.xlu1 %v8529_v16, %s7389_s18  ;;  %v2689_v16 = vld [vmem:[%s7536_s13 + $0x30] sm:$0xff] }
 0x2de   : > { %3849 = vrot.lane.b32.xlu0 %v8514_v28, %s7389_s18  ;;  %v2688_v28 = vld [vmem:[%s7536_s13 + $0x28] sm:$0xff] }
 0x2e0   : > { %3851 = vrot.lane.b32.xlu1 %v8524_v11, %s7389_s18  ;;  %v2752_v15 = vpop.permute.xlu1 %2751 }
 0x2e1   : > { %v2845_v12 = vmul.f32 %v2752_v15, %v2685_v43  ;;  %v2748_v19 = vpop.permute.xlu0 %2747  ;;  %v2691_v43 = vld [vmem:[%s7536_s13 + $0x40] sm:$0xff] }
 0x2e2   : > { %3853 = vrot.lane.b32.xlu0 %v8559_v27, %s7389_s18  ;;  %v2843_v20 = vmul.f32 %v2748_v19, %v2683_v62  ;;  %v3036_v27 = vld [vmem:[#allocation3 + $0x2] sm:$0xff] }
 0x2e3   : > { %2878 = vst [vmem:[#allocation3 + $0x31] sm:$0xff] %v2845_v12  ;;  %v7034_v19 = vld [vmem:[%s9516_s3 + $0x1c8] sm:$0xff]  }
 0x2e4   : > { %3855 = vrot.lane.b32.xlu1 %v8571_v60, %s7389_s18  ;;  %2876 = vst [vmem:[#allocation3 + $0x19] sm:$0xff] %v2843_v20  ;;  %v2754_v42 = vpop.permute.xlu1 %2753  ;;  %v8799_v60 = vld [vmem:[%s9516_s3 + $0x200] sm:$0xff]  }
 0x2e5   : > { %v2846_v13 = vmul.f32 %v2754_v42, %v2686_v33  ;;  %v2750_v44 = vpop.permute.xlu0 %2749  ;;  %6816 = vmatprep.subr.bf16.mxu1 %v8799_v60 }
 0x2e6   : > { %3857 = vrot.lane.b32.xlu0 %v8552_v40, %s7389_s18  ;;  %v2844_v32 = vmul.f32 %v2750_v44, %v2684_v30 }
 0x2e7   : > { %2879 = vst [vmem:[#allocation3 + $0x39] sm:$0xff] %v2846_v13  ;;  %v3006_v62 = vpack.c.bf16 %v2846_v13, %v2845_v12  ;;  %v2693_v12 = vld [vmem:[%s7536_s13 + $0x50] sm:$0xff]  ;;  %v7035_v13 = vld [vmem:[%s9516_s3 + $0x188] sm:$0xff]  }
 0x2e8   : > { %3859 = vrot.lane.b32.xlu1 %v8564_v47, %s7389_s18  ;;  %2877 = vst [vmem:[#allocation3 + $0x21] sm:$0xff] %v2844_v32  ;;  %v3005_v17 = vpack.c.bf16 %v2844_v32, %v2843_v20  ;;  %v3037_v47 = vld [vmem:[#allocation3 + $0xa] sm:$0xff]  ;;  %v2692_v20 = vld [vmem:[%s7536_s13 + $0x48] sm:$0xff] }
 0x2e9   : > { %v2756_v49 = vpop.permute.xlu0 %2755  ;;  %v3068_v46 = vpack.c.bf16 %v3037_v47, %v3036_v27  ;;  %v7038_v32 = vld [vmem:[%s9516_s3 + $0x1d0] sm:$0xff]  }
 0x2ea   : > { %3861 = vrot.lane.b32.xlu0 %v8595_v14, %s7389_s18  ;;  %v8788_v45 = vmul.f32 %v2756_v49, %v2687_v23  ;;  %4373 = vmatprep.mubr.bf16.mxu1 %v3005_v17  ;;  %v3102_v15 = vld [vmem:[#allocation3 + $0x30] sm:$0xff]  ;;  %v2694_v17 = vld [vmem:[%s7536_s13 + $0x58] sm:$0xff] }
 0x2eb   : > { %v2758_v11 = vpop.permute.xlu1 %2757  ;;  %v3100_v56 = vld [vmem:[#allocation3 + $0x18] sm:$0xff]  ;;  %v2695_v47 = vld [vmem:[%s7536_s13 + $0x60] sm:$0xff] }
 0x2ec   : > { %3863 = vrot.lane.b32.xlu1 %v8607_v61, %s7389_s18  ;;  %2880 = vst [vmem:[#allocation3 + $0x49] sm:$0xff] %v8788_v45  ;;  %v8794_v40 = vmul.f32 %v2758_v11, %v2688_v28 }
 0x2ed   : > { %v2760_v14 = vpop.permute.xlu0 %2759 }
 0x2ee   : > { %2881 = vst [vmem:[#allocation3 + $0x51] sm:$0xff] %v8794_v40  ;;  %3865 = vrot.lane.b32.xlu0 %v8588_v36, %s7389_s18  ;;  %v8805_v61 = vmul.f32 %v2760_v14, %v2689_v16  ;;  %v3103_v51 = vld [vmem:[#allocation3 + $0x38] sm:$0xff]  ;;  %v7031_v36 = vld [vmem:[%s9516_s3 + $0x180] sm:$0xff]   ;;  %v7039_v14 = vld [vmem:[%s9516_s3 + $0x190] sm:$0xff]  }
 0x2ef   : > { %v2762_v24 = vpop.permute.xlu1 %2761  ;;  %v3101_v2 = vld [vmem:[#allocation3 + $0x20] sm:$0xff]  ;;  %v8822_v33 = vpack.c.bf16 %v3103_v51, %v3102_v15 }
 0x2f0   : > { %3867 = vrot.lane.b32.xlu1 %v8600_v59, %s7389_s18  ;;  %2882 = vst [vmem:[#allocation3 + $0x61] sm:$0xff] %v8805_v61  ;;  %v8811_v26 = vmul.f32 %v2762_v24, %v2690_v7  ;;  %v3132_v1 = vpack.c.bf16 %v3101_v2, %v3100_v56  ;;  %v3038_v49 = vld [vmem:[#allocation3 + $0x1a] sm:$0xff]  ;;  %v3039_v28 = vld [vmem:[#allocation3 + $0x22] sm:$0xff]  ;;  %v3007_v56 = vpack.c.bf16 %v8794_v40, %v8788_v45  ;;  %s7320_s18 = sshll.u32 %s7390_s17, 4  ;;  %s7321_s18 = int_to_ptr.vmem [resolvable:$false] %s7320_s18 }
 0x2f1   : > { %v8848_v24 = vpack.c.bf16 %v3039_v28, %v3038_v49  ;;  %v2697_v40 = vld [vmem:[%s7536_s13 + $0x70] sm:$0xff]  ;;  %v2699_v28 = vld [vmem:[%s7536_s13 + $0x80] sm:$0xff]  ;;  %s7322_s26 = scalar_lea.vmem %s7321_s18, 8192  ;;  %p7323_p0 = scmp.lt.s32.totalorder %s9466_s19, %s7321_s18 }
 0x2f2   : > { %2883 = vst [vmem:[#allocation3 + $0x69] sm:$0xff] %v8811_v26  ;;  %v2764_v59 = vpop.permute.xlu0 %2763  ;;  %4526 = vmatprep.mubr.bf16.mxu0 %v3132_v1  ;;  %4374 = vmatmul.mubr.bf16.gmra.mrb[132].mxu1 %v3132_v1 }
 0x2f3   : > { %v8824_v30 = vmul.f32 %v2764_v59, %v2691_v43  ;;  %4527 = vmatmul.mubr.bf16.vlgmr.msra.gmra.mrb[160].mxu0 %v3068_v46  ;;  %4381 = vmatprep.mubr.bf16.mxu1 %v3006_v62  ;;  %v3104_v2 = vld [vmem:[#allocation3 + $0x48] sm:$0xff]  ;;  %v7042_v46 = vld [vmem:[%s9516_s3 + $0x1d8] sm:$0xff]  }
 0x2f4   : > { %v2766_v42 = vpop.permute.xlu1 %2765  ;;  %4534 = vmatprep.mubr.bf16.mxu0 %v8822_v33  ;;  %6633 = vmatpush3.bf16.msra.mxu0 %v7031_v36  ;;  %v2696_v43 = vld [vmem:[%s7536_s13 + $0x68] sm:$0xff] }
 0x2f5   : > { %2884 = vst [vmem:[#allocation3 + $0x79] sm:$0xff] %v8824_v30  ;;  %v8832_v44 = vmul.f32 %v2766_v42, %v2692_v20  ;;  %6634 = vmatprep.subr.bf16.mxu0 %v7034_v19  ;;  %v3105_v16 = vld [vmem:[#allocation3 + $0x50] sm:$0xff]  ;;  %v7043_v62 = vld [vmem:[%s9516_s3 + $0x198] sm:$0xff]   ;;  %v7046_v19 = vld [vmem:[%s9516_s3 + $0x1e0] sm:$0xff]  }
 0x2f6   : > { %v2768_v23 = vpop.permute.xlu0 %2767  ;;  %v8857_v1 = vpack.c.bf16 %v3105_v16, %v3104_v2  ;;  %v2698_v20 = vld [vmem:[%s7536_s13 + $0x78] sm:$0xff]  ;;  %v3040_v42 = vld [vmem:[#allocation3 + $0x32] sm:$0xff] }
 0x2f7   : > { %2885 = vst [vmem:[#allocation3 + $0x81] sm:$0xff] %v8832_v44  ;;  %v8839_v11 = vmul.f32 %v2768_v23, %v2693_v12  ;;  %v3041_v12 = vld [vmem:[#allocation3 + $0x3a] sm:$0xff] }
 0x2f8   : > { %v2770_v27 = vpop.permute.xlu1 %2769  ;;  %6635 = vmatpush3.bf16.msra.mxu0 %v7035_v13  ;;  %v8885_v16 = vpack.c.bf16 %v3041_v12, %v3040_v42 }
 0x2f9   : > { %2886 = vst [vmem:[#allocation3 + $0x91] sm:$0xff] %v8839_v11  ;;  %v8846_v7 = vmul.f32 %v2770_v27, %v2694_v17  ;;  %6636 = vmatprep.subr.bf16.mxu0 %v7038_v32  ;;  %v3107_v32 = vld [vmem:[#allocation3 + $0x68] sm:$0xff]  ;;  %v7047_v17 = vld [vmem:[%s9516_s3 + $0x1a0] sm:$0xff]   ;;  %v3008_v27 = vpack.c.bf16 %v8811_v26, %v8805_v61 }
 0x2fa   : > { %v2772_v51 = vpop.permute.xlu0 %2771  ;;  %4382 = vmatmul.mubr.bf16.gmra.mrb[136].mxu1 %v8822_v33  ;;  %v7049_v26 = vld [vmem:[%s9516_s3 + $0x1a8] sm:$0xff]  }
 0x2fb   : > { %2887 = vst [vmem:[#allocation3 + $0x99] sm:$0xff] %v8846_v7  ;;  %v8860_v36 = vmul.f32 %v2772_v51, %v2695_v47  ;;  %4535 = vmatmul.mubr.bf16.gmra.mrb[164].mxu0 %v8848_v24  ;;  %4389 = vmatprep.mubr.bf16.mxu1 %v3007_v56  ;;  %v3106_v47 = vld [vmem:[#allocation3 + $0x60] sm:$0xff] }
 0x2fc   : > { %v2774_v45 = vpop.permute.xlu1 %2773  ;;  %4542 = vmatprep.mubr.bf16.mxu0 %v8857_v1  ;;  %6637 = vmatpush3.bf16.msra.mxu0 %v7039_v14  ;;  %v7048_v14 = vld [vmem:[%s9516_s3 + $0x1e8] sm:$0xff]   ;;  %v8893_v56 = vpack.c.bf16 %v3107_v32, %v3106_v47  ;;  %v7052_v32 = vld [vmem:[%s9516_s3 + $0x1b0] sm:$0xff]   ;;  %v3108_v47 = vld [vmem:[#allocation3 + $0x78] sm:$0xff] }
 0x2fd   : > { %2888 = vst [vmem:[#allocation3 + $0xa9] sm:$0xff] %v8860_v36  ;;  %v8869_v15 = vmul.f32 %v2774_v45, %v2696_v43  ;;  %6638 = vmatprep.subr.bf16.mxu0 %v7042_v46  ;;  %v2700_v46 = vld [vmem:[%s7536_s13 + $0x88] sm:$0xff]  ;;  %v2701_v43 = vld [vmem:[%s7536_s13 + $0x90] sm:$0xff]  ;;  %v7050_v45 = vld [vmem:[%s9516_s3 + $0x1f0] sm:$0xff]  }
 0x2fe   : > { %v2776_v59 = vpop.permute.xlu0 %2775  ;;  %v3109_v42 = vld [vmem:[#allocation3 + $0x80] sm:$0xff] }
 0x2ff   : > { %2889 = vst [vmem:[#allocation3 + $0xb1] sm:$0xff] %v8869_v15  ;;  %v8876_v13 = vmul.f32 %v2776_v59, %v2697_v40  ;;  %v3423_v40 = vld [vmem:[#allocation3 + $0x4a] sm:$0xff] }
 0x300   : > { %v2778_v23 = vpop.permute.xlu1 %2777  ;;  %6639 = vmatpush3.bf16.msra.mxu0 %v7043_v62  ;;  %v3424_v62 = vld [vmem:[#allocation3 + $0x52] sm:$0xff] }
 0x301   : > { %2890 = vst [vmem:[#allocation3 + $0xc1] sm:$0xff] %v8876_v13  ;;  %v8882_v49 = vmul.f32 %v2778_v23, %v2698_v20  ;;  %6640 = vmatprep.subr.bf16.mxu0 %v7046_v19  ;;  %v2702_v20 = vld [vmem:[%s7536_s13 + $0x98] sm:$0xff]  ;;  %v8918_v23 = vpack.c.bf16 %v3424_v62, %v3423_v40 }
 0x302   : > { %4390 = vmatmul.mubr.bf16.gmra.mrb[140].mxu1 %v8857_v1  ;;  %v3044_v62 = vld [vmem:[#allocation3 + $0x62] sm:$0xff] }
 0x303   : > { %2891 = vst [vmem:[#allocation3 + $0xc9] sm:$0xff] %v8882_v49  ;;  %v2780_v2 = vpop.permute.xlu0 %2779  ;;  %4543 = vmatmul.mubr.bf16.gmra.mrb[168].mxu0 %v8885_v16  ;;  %4397 = vmatprep.mubr.bf16.mxu1 %v3008_v27  ;;  %v3009_v27 = vpack.c.bf16 %v8832_v44, %v8824_v30  ;;  %v7054_v44 = vld [vmem:[%s9516_s3 + $0x1b8] sm:$0xff]  }
 0x304   : > { %v8898_v61 = vmul.f32 %v2780_v2, %v2699_v28  ;;  %4550 = vmatprep.mubr.bf16.mxu0 %v8893_v56  ;;  %6641 = vmatpush3.bf16.msra.mxu0 %v7047_v17  ;;  %v2703_v28 = vld [vmem:[%s7536_s13 + $0xa0] sm:$0xff] }
 0x305   : > { %v2782_v51 = vpop.permute.xlu1 %2781  ;;  %6642 = vmatprep.subr.bf16.mxu0 %v7048_v14  ;;  %v7053_v14 = vld [vmem:[%s9516_s3 + $0x1f8] sm:$0xff]  }
 0x306   : > { %2892 = vst [vmem:[#allocation3 + $0xd9] sm:$0xff] %v8898_v61  ;;  %v8909_v19 = vmul.f32 %v2782_v51, %v2700_v46  ;;  %v8930_v46 = vpack.c.bf16 %v3109_v42, %v3108_v47  ;;  %v2704_v51 = vld [vmem:[%s7536_s13 + $0xa8] sm:$0xff]  ;;  %v2706_v42 = vld [vmem:[%s7536_s13 + $0xb8] sm:$0xff]  ;;  %v3010_v47 = vpack.c.bf16 %v8846_v7, %v8839_v11 }
 0x307   : > { %v2784_v59 = vpop.permute.xlu0 %2783 }
 0x308   : > { %2893 = vst [vmem:[#allocation3 + $0xe1] sm:$0xff] %v8909_v19  ;;  %v8913_v12 = vmul.f32 %v2784_v59, %v2701_v43  ;;  %6643 = vmatpush3.bf16.msra.mxu0 %v7049_v26  ;;  %v3045_v59 = vld [vmem:[#allocation3 + $0x6a] sm:$0xff] }
 0x309   : > { %v2786_v17 = vpop.permute.xlu1 %2785  ;;  %6644 = vmatprep.subr.bf16.mxu0 %v7050_v45  ;;  %v2705_v45 = vld [vmem:[%s7536_s13 + $0xb0] sm:$0xff] }
 0x30a   : > { %2894 = vst [vmem:[#allocation3 + $0xf1] sm:$0xff] %v8913_v12  ;;  %v8927_v2 = vmul.f32 %v2786_v17, %v2702_v20  ;;  %4398 = vmatmul.mubr.bf16.gmra.mrb[144].mxu1 %v8893_v56  ;;  %v3111_v17 = vld [vmem:[#allocation3 + $0x98] sm:$0xff] }
 0x30b   : > { %v2788_v26 = vpop.permute.xlu0 %2787  ;;  %4551 = vmatmul.mubr.bf16.gmra.mrb[172].mxu0 %v8918_v23  ;;  %4405 = vmatprep.mubr.bf16.mxu1 %v3009_v27  ;;  %v8949_v27 = vpack.c.bf16 %v3045_v59, %v3044_v62  ;;  %v2709_v62 = vld [vmem:[%s7536_s13 + $0xd0] sm:$0xff] }
 0x30c   : > { %2895 = vst [vmem:[#allocation3 + $0xf9] sm:$0xff] %v8927_v2  ;;  %v8935_v30 = vmul.f32 %v2788_v26, %v2703_v28  ;;  %4558 = vmatprep.mubr.bf16.mxu0 %v8930_v46  ;;  %6645 = vmatpush3.bf16.msra.mxu0 %v7052_v32  ;;  %v3046_v59 = vld [vmem:[#allocation3 + $0x7a] sm:$0xff] }
 0x30d   : > { %v2790_v43 = vpop.permute.xlu1 %2789  ;;  %6646 = vmatprep.subr.bf16.mxu0 %v7053_v14  ;;  %v3110_v14 = vld [vmem:[#allocation3 + $0x90] sm:$0xff] }
 0x30e   : > { %2896 = vst [vmem:[#allocation3 + $0x109] sm:$0xff] %v8935_v30  ;;  %v8943_v40 = vmul.f32 %v2790_v43, %v2704_v51  ;;  %v2707_v51 = vld [vmem:[%s7536_s13 + $0xc0] sm:$0xff]  ;;  %v8958_v43 = vpack.c.bf16 %v3111_v17, %v3110_v14 }
 0x30f   : > { %v2792_v20 = vpop.permute.xlu0 %2791  ;;  %v3113_v17 = vld [vmem:[#allocation3 + $0xb0] sm:$0xff] }
 0x310   : > { %2897 = vst [vmem:[#allocation3 + $0x111] sm:$0xff] %v8943_v40  ;;  %v8947_v32 = vmul.f32 %v2792_v20, %v2705_v45  ;;  %6647 = vmatpush3.bf16.msra.mxu0 %v7054_v44  ;;  %v2708_v45 = vld [vmem:[%s7536_s13 + $0xc8] sm:$0xff]  ;;  %v3047_v20 = vld [vmem:[#allocation3 + $0x82] sm:$0xff] }
 0x311   : > { %v2794_v28 = vpop.permute.xlu1 %2793  ;;  %v8974_v58 = vpack.c.bf16 %v3047_v20, %v3046_v59  ;;  %v2712_v59 = vld [vmem:[%s7536_s13 + $0xe8] sm:$0xff]  ;;  %v2713_v20 = vld [vmem:[%s7536_s13 + $0xf0] sm:$0xff] }
 0x312   : > { %2898 = vst [vmem:[#allocation3 + $0x121] sm:$0xff] %v8947_v32  ;;  %v8954_v26 = vmul.f32 %v2794_v28, %v2706_v42  ;;  %4406 = vmatmul.mubr.bf16.gmra.mrb[148].mxu1 %v8930_v46 }
 0x313   : > { %4559 = vmatmul.mubr.bf16.gmra.mrb[176].mxu0 %v8949_v27  ;;  %4413 = vmatprep.mubr.bf16.mxu1 %v3010_v47  ;;  %v2710_v47 = vld [vmem:[%s7536_s13 + $0xd8] sm:$0xff] }
 0x314   : > { %2899 = vst [vmem:[#allocation3 + $0x129] sm:$0xff] %v8954_v26  ;;  %v2796_v44 = vpop.permute.xlu0 %2795  ;;  %4566 = vmatprep.mubr.bf16.mxu0 %v8958_v43 }
 0x315   : > { %v8964_v11 = vmul.f32 %v2796_v44, %v2707_v51  ;;  %v3011_v51 = vpack.c.bf16 %v8869_v15, %v8860_v36  ;;  %v3112_v44 = vld [vmem:[#allocation3 + $0xa8] sm:$0xff] }
 0x316   : > { %v2798_v7 = vpop.permute.xlu1 %2797 }
 0x317   : > { %2900 = vst [vmem:[#allocation3 + $0x139] sm:$0xff] %v8964_v11  ;;  %v8968_v42 = vmul.f32 %v2798_v7, %v2708_v45  ;;  %v8980_v45 = vpack.c.bf16 %v3113_v17, %v3112_v44  ;;  %v3048_v17 = vld [vmem:[#allocation3 + $0x92] sm:$0xff] }
 0x318   : > { %v2800_v28 = vpop.permute.xlu0 %2799 }
 0x319   : > { %2901 = vst [vmem:[#allocation3 + $0x141] sm:$0xff] %v8968_v42  ;;  %v8972_v14 = vmul.f32 %v2800_v28, %v2709_v62  ;;  %v3049_v28 = vld [vmem:[#allocation3 + $0x9a] sm:$0xff] }
 0x31a   : > { %v2802_v55 = vpop.permute.xlu1 %2801  ;;  %4414 = vmatmul.mubr.bf16.gmra.mrb[152].mxu1 %v8958_v43  ;;  %v8997_v48 = vpack.c.bf16 %v3049_v28, %v3048_v17  ;;  %v3117_v17 = vld [vmem:[#allocation3 + $0xe0] sm:$0xff] }
 0x31b   : > { %2902 = vst [vmem:[#allocation3 + $0x151] sm:$0xff] %v8972_v14  ;;  %v8983_v7 = vmul.f32 %v2802_v55, %v2710_v47  ;;  %4567 = vmatmul.mubr.bf16.gmra.mrb[180].mxu0 %v8974_v58  ;;  %4421 = vmatprep.mubr.bf16.mxu1 %v3011_v51  ;;  %v3115_v47 = vld [vmem:[#allocation3 + $0xc8] sm:$0xff] }
 0x31c   : > { %v2804_v62 = vpop.permute.xlu0 %2803  ;;  %4574 = vmatprep.mubr.bf16.mxu0 %v8980_v45 }
 0x31d   : > { %2903 = vst [vmem:[#allocation3 + $0x159] sm:$0xff] %v8983_v7  ;;  %v8989_v36 = vmul.f32 %v2804_v62, %v2711_v50  ;;  %v3012_v50 = vpack.c.bf16 %v8882_v49, %v8876_v13  ;;  %v3114_v62 = vld [vmem:[#allocation3 + $0xc0] sm:$0xff]  ;;  %v3013_v13 = vpack.c.bf16 %v8909_v19, %v8898_v61  ;;  %v3116_v49 = vld [vmem:[#allocation3 + $0xd8] sm:$0xff] }
 0x31e   : > { %v2806_v15 = vpop.permute.xlu1 %2805  ;;  %v9002_v57 = vpack.c.bf16 %v3115_v47, %v3114_v62  ;;  %v9011_v47 = vpack.c.bf16 %v3117_v17, %v3116_v49  ;;  %v3118_v62 = vld [vmem:[#allocation3 + $0xf0] sm:$0xff]  ;;  %v3054_v19 = vld [vmem:[#allocation3 + $0xda] sm:$0xff]  ;;  %v3015_v17 = vpack.c.bf16 %v8943_v40, %v8935_v30 }
 0x31f   : > { %2904 = vst [vmem:[#allocation3 + $0x169] sm:$0xff] %v8989_v36  ;;  %v8993_v55 = vmul.f32 %v2806_v15, %v2712_v59  ;;  %v3050_v15 = vld [vmem:[#allocation3 + $0xaa] sm:$0xff]  ;;  %v3057_v49 = vld [vmem:[#allocation3 + $0xfa] sm:$0xff] }
 0x320   : > { %v2808_v44 = vpop.permute.xlu0 %2807  ;;  %v3058_v40 = vld [vmem:[#allocation3 + $0x10a] sm:$0xff] }
 0x321   : > { %2905 = vst [vmem:[#allocation3 + $0x171] sm:$0xff] %v8993_v55  ;;  %v2873_v51 = vmul.f32 %v2808_v44, %v2713_v20  ;;  %v3051_v20 = vld [vmem:[#allocation3 + $0xb2] sm:$0xff] }
 0x322   : > { %v2810_v18 = vpop.permute.xlu1 %2809  ;;  %4422 = vmatmul.mubr.bf16.gmra.mrb[156].mxu1 %v8980_v45  ;;  %v9006_v28 = vpack.c.bf16 %v3051_v20, %v3050_v15  ;;  %v3119_v44 = vld [vmem:[#allocation3 + $0xf8] sm:$0xff]  ;;  %v3121_v15 = vld [vmem:[#allocation3 + $0x110] sm:$0xff] }
 0x323   : > { %2906 = vst [vmem:[#allocation3 + $0x181] sm:$0xff] %v2873_v51  ;;  %v2874_v59 = vmul.f32 %v2810_v18, %v2714_v35  ;;  %4575 = vmatmul.mubr.bf16.gmra.mrb[184].mxu0 %v8997_v48  ;;  %4429 = vmatprep.mubr.bf16.mxu1 %v3012_v50  ;;  %v3052_v18 = vld [vmem:[#allocation3 + $0xc2] sm:$0xff]  ;;  %v3053_v35 = vld [vmem:[#allocation3 + $0xca] sm:$0xff]  ;;  %v3014_v50 = vpack.c.bf16 %v8927_v2, %v8913_v12  ;;  %v3056_v2 = vld [vmem:[#allocation3 + $0xf2] sm:$0xff] }
 0x324   : > { %4582 = vmatprep.mubr.bf16.mxu0 %v9002_v57  ;;  %v9015_v51 = vpack.c.bf16 %v3053_v35, %v3052_v18  ;;  %v9020_v61 = vpack.c.bf16 %v3119_v44, %v3118_v62  ;;  %v3123_v18 = vld [vmem:[#allocation3 + $0x128] sm:$0xff]  ;;  %v9033_v35 = vpack.c.bf16 %v3057_v49, %v3056_v2  ;;  %v3016_v44 = vpack.c.bf16 %v8954_v26, %v8947_v32  ;;  %v3059_v62 = vld [vmem:[#allocation3 + $0x112] sm:$0xff] }
 0x325   : > { %2907 = vst [vmem:[#allocation3 + $0x189] sm:$0xff] %v2874_v59  ;;  %v3055_v59 = vld [vmem:[#allocation3 + $0xe2] sm:$0xff]  ;;  %v3127_v2 = vld [vmem:[#allocation3 + $0x158] sm:$0xff] }
 0x326   : > { %v9024_v20 = vpack.c.bf16 %v3055_v59, %v3054_v19  ;;  %v3125_v19 = vld [vmem:[#allocation3 + $0x140] sm:$0xff]  ;;  %v9042_v59 = vpack.c.bf16 %v3059_v62, %v3058_v40 }
 0x327   : > { %v3060_v26 = vld [vmem:[#allocation3 + $0x122] sm:$0xff] }
 0x328   : > { %v3129_v40 = vld [vmem:[#allocation3 + $0x170] sm:$0xff] }
 0x329   : > { %v3447_v0 = vld [vmem:[#allocation3 + $0x16a] sm:$0xff] }
 0x32a   : > { %4430 = vmatmul.mubr.bf16.gmra.mrb[160].mxu1 %v9002_v57 }
 0x32b   : > { %4583 = vmatmul.mubr.bf16.gmra.mrb[188].mxu0 %v9006_v28  ;;  %4437 = vmatprep.mubr.bf16.mxu1 %v3013_v13  ;;  %v3120_v13 = vld [vmem:[#allocation3 + $0x108] sm:$0xff] }
 0x32c   : > { %4590 = vmatprep.mubr.bf16.mxu0 %v9011_v47  ;;  %v9029_v12 = vpack.c.bf16 %v3121_v15, %v3120_v13  ;;  %v3017_v15 = vpack.c.bf16 %v8968_v42, %v8964_v11  ;;  %v3061_v13 = vld [vmem:[#allocation3 + $0x12a] sm:$0xff]  ;;  %v3062_v42 = vld [vmem:[#allocation3 + $0x13a] sm:$0xff] }
 0x32d   : > { %v9051_v49 = vpack.c.bf16 %v3061_v13, %v3060_v26  ;;  %v3131_v26 = vld [vmem:[#allocation3 + $0x188] sm:$0xff] }
 0x332   : > { %4438 = vmatmul.mubr.bf16.gmra.mrb[164].mxu1 %v9011_v47 }
 0x333   : > { %4591 = vmatmul.mubr.bf16.gmra.mrb[192].mxu0 %v9015_v51  ;;  %4445 = vmatprep.mubr.bf16.mxu1 %v3014_v50  ;;  %v3122_v50 = vld [vmem:[#allocation3 + $0x120] sm:$0xff] }
 0x334   : > { %4598 = vmatprep.mubr.bf16.mxu0 %v9020_v61  ;;  %v9038_v30 = vpack.c.bf16 %v3123_v18, %v3122_v50  ;;  %v3018_v18 = vpack.c.bf16 %v8983_v7, %v8972_v14  ;;  %v3063_v50 = vld [vmem:[#allocation3 + $0x142] sm:$0xff]  ;;  %v3064_v7 = vld [vmem:[#allocation3 + $0x152] sm:$0xff] }
 0x335   : > { %v9060_v62 = vpack.c.bf16 %v3063_v50, %v3062_v42  ;;  %v3164_v42 = vld [vmem:[#allocation3 + $0x19] sm:$0xff] }
 0x336   : > { %v3358_v50 = vld [vmem:[#allocation3 + $0x39] sm:$0xff] }
 0x33a   : > { %4446 = vmatmul.mubr.bf16.gmra.mrb[168].mxu1 %v9020_v61 }
 0x33b   : > { %4599 = vmatmul.mubr.bf16.gmra.mrb[196].mxu0 %v9024_v20  ;;  %4453 = vmatprep.mubr.bf16.mxu1 %v3015_v17  ;;  %v3124_v17 = vld [vmem:[#allocation3 + $0x138] sm:$0xff] }
 0x33c   : > { %4606 = vmatprep.mubr.bf16.mxu0 %v9029_v12  ;;  %v9047_v32 = vpack.c.bf16 %v3125_v19, %v3124_v17  ;;  %v3019_v19 = vpack.c.bf16 %v8993_v55, %v8989_v36  ;;  %v3065_v17 = vld [vmem:[#allocation3 + $0x15a] sm:$0xff]  ;;  %v3066_v55 = vld [vmem:[#allocation3 + $0x16a] sm:$0xff] }
 0x33d   : > { %v9069_v13 = vpack.c.bf16 %v3065_v17, %v3064_v7  ;;  %v3165_v36 = vld [vmem:[#allocation3 + $0x21] sm:$0xff] }
 0x33e   : > { %v7055_v7 = vld [vmem:[%s9516_s3 + $0x208] sm:$0xff]  }
 0x342   : > { %4454 = vmatmul.mubr.bf16.gmra.mrb[172].mxu1 %v9029_v12 }
 0x343   : > { %4607 = vmatmul.mubr.bf16.gmra.mrb[200].mxu0 %v9033_v35  ;;  %4461 = vmatprep.mubr.bf16.mxu1 %v3016_v44  ;;  %v3126_v44 = vld [vmem:[#allocation3 + $0x150] sm:$0xff] }
 0x344   : > { %4614 = vmatprep.mubr.bf16.mxu0 %v9038_v30  ;;  %v9056_v11 = vpack.c.bf16 %v3127_v2, %v3126_v44  ;;  %v3130_v2 = vld [vmem:[#allocation3 + $0x180] sm:$0xff]  ;;  %v3067_v44 = vld [vmem:[#allocation3 + $0x172] sm:$0xff] }
 0x34a   : > { %4462 = vmatmul.mubr.bf16.gmra.mrb[176].mxu1 %v9038_v30 }
 0x34b   : > { %4615 = vmatmul.mubr.bf16.gmra.mrb[204].mxu0 %v9042_v59  ;;  %4469 = vmatprep.mubr.bf16.mxu1 %v3017_v15  ;;  %v3128_v15 = vld [vmem:[#allocation3 + $0x168] sm:$0xff] }
 0x34c   : > { %4622 = vmatprep.mubr.bf16.mxu0 %v9047_v32  ;;  %v9065_v14 = vpack.c.bf16 %v3129_v40, %v3128_v15  ;;  %v3196_v40 = vpack.c.bf16 %v3165_v36, %v3164_v42  ;;  %v3357_v15 = vld [vmem:[#allocation3 + $0x31] sm:$0xff] }
 0x34d   : > { %v3389_v17 = vpack.c.bf16 %v3358_v50, %v3357_v15  ;;  %v3360_v36 = vld [vmem:[#allocation3 + $0x51] sm:$0xff]  ;;  %v3362_v50 = vld [vmem:[#allocation3 + $0x69] sm:$0xff] }
 0x34e   : > { %v7057_v42 = vld [vmem:[%s9516_s3 + $0x218] sm:$0xff]   ;;  %v7059_v15 = vld [vmem:[%s9516_s3 + $0x228] sm:$0xff]  }
 0x352   : > { %4470 = vmatmul.mubr.bf16.gmra.mrb[180].mxu1 %v9047_v32 }
 0x353   : > { %4623 = vmatmul.mubr.bf16.gmra.mrb[208].mxu0 %v9051_v49  ;;  %4477 = vmatprep.mubr.bf16.mxu1 %v3018_v18  ;;  %v9072_v18 = vpack.c.bf16 %v3131_v26, %v3130_v2  ;;  %v3232_v26 = vld [vmem:[#allocation3 + $0x4a] sm:$0xff]  ;;  %v3233_v2 = vld [vmem:[#allocation3 + $0x52] sm:$0xff] }
 0x354   : > { %4630 = vmatprep.mubr.bf16.mxu0 %v9056_v11 }
 0x35a   : > { %4478 = vmatmul.mubr.bf16.gmra.mrb[184].mxu1 %v9056_v11 }
 0x35b   : > { %4631 = vmatmul.mubr.bf16.gmra.mrb[212].mxu0 %v9060_v62  ;;  %4485 = vmatprep.mubr.bf16.mxu1 %v3019_v19  ;;  %v9077_v19 = vpack.c.bf16 %v3067_v44, %v3066_v55  ;;  %v3262_v55 = vpack.c.bf16 %v3233_v2, %v3232_v26  ;;  %v3359_v44 = vld [vmem:[#allocation3 + $0x49] sm:$0xff]  ;;  %v7061_v26 = vld [vmem:[%s9516_s3 + $0x238] sm:$0xff]  }
 0x35c   : > { %4638 = vmatprep.mubr.bf16.mxu0 %v9065_v14 }
 0x362   : > { %4486 = vmatmul.mubr.bf16.gmra.mrb[188].mxu1 %v9065_v14 }
 0x363   : > { %4639 = vmatmul.mubr.bf16.gmra.mrb[216].mxu0 %v9069_v13  ;;  %4687 = vmatprep.mubr.bf16.mxu1 %v8848_v24  ;;  %v7056_v24 = vld [vmem:[%s9516_s3 + $0x210] sm:$0xff]  }
 0x364   : > { %4646 = vmatprep.mubr.bf16.mxu0 %v9072_v18 }
 0x36a   : > { %4688 = vmatmul.mubr.bf16.vlgmr.msra.gmra.mrb[192].mxu1 %v3196_v40  ;;  %v3361_v40 = vld [vmem:[#allocation3 + $0x61] sm:$0xff] }
 0x36b   : > { %4647 = vmatmul.mubr.bf16.gmra.mrb[220].mxu0 %v9077_v19  ;;  %4695 = vmatprep.mubr.bf16.mxu1 %v8885_v16  ;;  %v3390_v16 = vpack.c.bf16 %v3360_v36, %v3359_v44  ;;  %v3367_v44 = vld [vmem:[#allocation3 + $0xa9] sm:$0xff] }
 0x36c   : > { %4848 = vmatprep.mubr.bf16.mxu0 %v3389_v17  ;;  %6817 = vmatpush3.bf16.msra.mxu1 %v8799_v60  ;;  %v7058_v60 = vld [vmem:[%s9516_s3 + $0x220] sm:$0xff]  }
 0x36d   : > { %6818 = vmatprep.subr.bf16.mxu1 %v7055_v7 }
 0x370   : > { %6819 = vmatpush3.bf16.msra.mxu1 %v7055_v7  ;;  %v3391_v7 = vpack.c.bf16 %v3362_v50, %v3361_v40 }
 0x371   : > { %6820 = vmatprep.subr.bf16.mxu1 %v7056_v24 }
 0x372   : > { %4696 = vmatmul.mubr.bf16.gmra.mrb[196].mxu1 %v3389_v17  ;;  %v3364_v17 = vld [vmem:[#allocation3 + $0x81] sm:$0xff] }
 0x373   : > { %4849 = vmatmul.mubr.bf16.vlgmr.msra.gmra.mrb[224].mxu0 %v8822_v33  ;;  %4703 = vmatprep.mubr.bf16.mxu1 %v3262_v55  ;;  %v7060_v33 = vld [vmem:[%s9516_s3 + $0x230] sm:$0xff]  }
 0x374   : > { %4856 = vmatprep.mubr.bf16.mxu0 %v3390_v16  ;;  %6821 = vmatpush3.bf16.msra.mxu1 %v7056_v24  ;;  %v3363_v24 = vld [vmem:[#allocation3 + $0x79] sm:$0xff]  ;;  %v3368_v55 = vld [vmem:[#allocation3 + $0xb1] sm:$0xff] }
 0x375   : > { %6822 = vmatprep.subr.bf16.mxu1 %v7057_v42  ;;  %v3392_v2 = vpack.c.bf16 %v3364_v17, %v3363_v24 }
 0x378   : > { %6823 = vmatpush3.bf16.msra.mxu1 %v7057_v42  ;;  %v3394_v42 = vpack.c.bf16 %v3368_v55, %v3367_v44 }
 0x379   : > { %6824 = vmatprep.subr.bf16.mxu1 %v7058_v60 }
 0x37a   : > { %4704 = vmatmul.mubr.bf16.gmra.mrb[200].mxu1 %v3390_v16 }
 0x37b   : > { %4857 = vmatmul.mubr.bf16.gmra.mrb[228].mxu0 %v8857_v1  ;;  %4711 = vmatprep.mubr.bf16.mxu1 %v8949_v27  ;;  %v3366_v1 = vld [vmem:[#allocation3 + $0x99] sm:$0xff]  ;;  %v3365_v27 = vld [vmem:[#allocation3 + $0x91] sm:$0xff] }
 0x37c   : > { %4864 = vmatprep.mubr.bf16.mxu0 %v3391_v7  ;;  %6825 = vmatpush3.bf16.msra.mxu1 %v7058_v60  ;;  %v3393_v36 = vpack.c.bf16 %v3366_v1, %v3365_v27  ;;  %v3382_v1 = vld [vmem:[#allocation3 + $0x159] sm:$0xff] }
 0x37d   : > { %6826 = vmatprep.subr.bf16.mxu1 %v7059_v15 }
 0x380   : > { %6827 = vmatpush3.bf16.msra.mxu1 %v7059_v15 }
 0x381   : > { %6828 = vmatprep.subr.bf16.mxu1 %v7060_v33 }
 0x382   : > { %4712 = vmatmul.mubr.bf16.gmra.mrb[204].mxu1 %v3391_v7 }
 0x383   : > { %4865 = vmatmul.mubr.bf16.gmra.mrb[232].mxu0 %v8893_v56  ;;  %4719 = vmatprep.mubr.bf16.mxu1 %v8974_v58  ;;  %v3370_v58 = vld [vmem:[#allocation3 + $0xc9] sm:$0xff]  ;;  %v3369_v56 = vld [vmem:[#allocation3 + $0xc1] sm:$0xff] }
 0x384   : > { %4872 = vmatprep.mubr.bf16.mxu0 %v3392_v2  ;;  %6829 = vmatpush3.bf16.msra.mxu1 %v7060_v33  ;;  %v3395_v16 = vpack.c.bf16 %v3370_v58, %v3369_v56 }
 0x385   : > { %6830 = vmatprep.subr.bf16.mxu1 %v7061_v26 }
 0x388   : > { %6831 = vmatpush3.bf16.msra.mxu1 %v7061_v26 }
 0x38a   : > { %4720 = vmatmul.mubr.bf16.gmra.mrb[208].mxu1 %v3392_v2 }
 0x38b   : > { %4873 = vmatmul.mubr.bf16.gmra.mrb[236].mxu0 %v8930_v46  ;;  %4727 = vmatprep.mubr.bf16.mxu1 %v8997_v48  ;;  %v3372_v48 = vld [vmem:[#allocation3 + $0xe1] sm:$0xff]  ;;  %v3371_v46 = vld [vmem:[#allocation3 + $0xd9] sm:$0xff] }
 0x38c   : > { %4880 = vmatprep.mubr.bf16.mxu0 %v3393_v36  ;;  %v3396_v60 = vpack.c.bf16 %v3372_v48, %v3371_v46 }
 0x392   : > { %4728 = vmatmul.mubr.bf16.gmra.mrb[212].mxu1 %v3393_v36 }
 0x393   : > { %4881 = vmatmul.mubr.bf16.gmra.mrb[240].mxu0 %v8958_v43  ;;  %4735 = vmatprep.mubr.bf16.mxu1 %v9006_v28  ;;  %v3374_v43 = vld [vmem:[#allocation3 + $0xf9] sm:$0xff]  ;;  %v3373_v28 = vld [vmem:[#allocation3 + $0xf1] sm:$0xff] }
 0x394   : > { %4888 = vmatprep.mubr.bf16.mxu0 %v3394_v42  ;;  %v3397_v50 = vpack.c.bf16 %v3374_v43, %v3373_v28 }
 0x39a   : > { %4736 = vmatmul.mubr.bf16.gmra.mrb[216].mxu1 %v3394_v42 }
 0x39b   : > { %4889 = vmatmul.mubr.bf16.gmra.mrb[244].mxu0 %v8980_v45  ;;  %4743 = vmatprep.mubr.bf16.mxu1 %v9015_v51  ;;  %v3376_v45 = vld [vmem:[#allocation3 + $0x111] sm:$0xff]  ;;  %v3375_v51 = vld [vmem:[#allocation3 + $0x109] sm:$0xff] }
 0x39c   : > { %4896 = vmatprep.mubr.bf16.mxu0 %v3395_v16  ;;  %v3398_v40 = vpack.c.bf16 %v3376_v45, %v3375_v51 }
 0x3a2   : > { %4744 = vmatmul.mubr.bf16.gmra.mrb[220].mxu1 %v3395_v16 }
 0x3a3   : > { %4897 = vmatmul.mubr.bf16.gmra.mrb[248].mxu0 %v9002_v57  ;;  %4751 = vmatprep.mubr.bf16.mxu1 %v9024_v20  ;;  %v3378_v57 = vld [vmem:[#allocation3 + $0x129] sm:$0xff]  ;;  %v3377_v20 = vld [vmem:[#allocation3 + $0x121] sm:$0xff] }
 0x3a4   : > { %4904 = vmatprep.mubr.bf16.mxu0 %v3396_v60  ;;  %v3399_v15 = vpack.c.bf16 %v3378_v57, %v3377_v20 }
 0x3aa   : > { %4752 = vmatmul.mubr.bf16.gmra.mrb[224].mxu1 %v3396_v60 }
 0x3ab   : > { %4905 = vmatmul.mubr.bf16.gmra.mrb[252].mxu0 %v9011_v47  ;;  %4759 = vmatprep.mubr.bf16.mxu1 %v9033_v35  ;;  %v3380_v47 = vld [vmem:[#allocation3 + $0x141] sm:$0xff]  ;;  %v3379_v35 = vld [vmem:[#allocation3 + $0x139] sm:$0xff] }
 0x3ac   : > { %4912 = vmatprep.mubr.bf16.mxu0 %v3397_v50  ;;  %v3400_v7 = vpack.c.bf16 %v3380_v47, %v3379_v35  ;;  %v3383_v35 = vld [vmem:[#allocation3 + $0x169] sm:$0xff] }
 0x3b2   : > { %4760 = vmatmul.mubr.bf16.gmra.mrb[228].mxu1 %v3397_v50 }
 0x3b3   : > { %4913 = vmatmul.mubr.bf16.gmra.mrb[0].mxu0 %v9020_v61  ;;  %4767 = vmatprep.mubr.bf16.mxu1 %v9042_v59  ;;  %v3806_v61 = vpop.permute.xlu0 %3805  ;;  %v3808_v59 = vpop.permute.xlu1 %3807 }
 0x3b4   : > { %4920 = vmatprep.mubr.bf16.mxu0 %v3398_v40 }
 0x3ba   : > { %4768 = vmatmul.mubr.bf16.gmra.mrb[232].mxu1 %v3398_v40 }
 0x3bb   : > { %4921 = vmatmul.mubr.bf16.gmra.mrb[4].mxu0 %v9029_v12  ;;  %4775 = vmatprep.mubr.bf16.mxu1 %v9051_v49  ;;  %v4368_v49 = vadd.f32 %v8667_v21, %v3806_v61  ;;  %v3810_v21 = vpop.permute.xlu0 %3809 }
 0x3bc   : > { %4928 = vmatprep.mubr.bf16.mxu0 %v3399_v15 }
 0x3c2   : > { %4776 = vmatmul.mubr.bf16.gmra.mrb[236].mxu1 %v3399_v15  ;;  %v3812_v15 = vpop.permute.xlu1 %3811 }
 0x3c3   : > { %4929 = vmatmul.mubr.bf16.gmra.mrb[8].mxu0 %v9038_v30  ;;  %4783 = vmatprep.mubr.bf16.mxu1 %v9060_v62  ;;  %v3381_v30 = vld [vmem:[#allocation3 + $0x151] sm:$0xff]  ;;  %v4371_v62 = vadd.f32 %v8673_v52, %v3808_v59 }
 0x3c4   : > { %4936 = vmatprep.mubr.bf16.mxu0 %v3400_v7  ;;  %v3401_v16 = vpack.c.bf16 %v3382_v1, %v3381_v30  ;;  %v3384_v52 = vld [vmem:[#allocation3 + $0x171] sm:$0xff] }
 0x3c5   : > { %v6318_v33 = vpop.f32.mrb[132].mxu1  ;;  %v3402_v59 = vpack.c.bf16 %v3384_v52, %v3383_v35  ;;  %v3259_v1 = vld [vmem:[#allocation3 + $0x18a] sm:$0xff] }
 0x3c6   : > { %v6424_v17 = vpop.f32.mrb[160].mxu0  ;;  %v6319_v24 = vpop.f32.mrb[133].mxu1 }
 0x3c7   : > { %v6320_v26 = vadd.f32 %v6319_v24, %v6318_v33  ;;  %v6425_v2 = vpop.f32.mrb[161].mxu0  ;;  %v6321_v12 = vpop.f32.mrb[134].mxu1 }
 0x3c8   : > { %v6426_v27 = vadd.f32 %v6425_v2, %v6424_v17  ;;  %v6427_v36 = vpop.f32.mrb[162].mxu0  ;;  %v6322_v55 = vpop.f32.mrb[135].mxu1 }
 0x3c9   : > { %v6323_v44 = vadd.f32 %v6322_v55, %v6321_v12  ;;  %v6428_v42 = vpop.f32.mrb[163].mxu0  ;;  %v4376_v51 = vadd.f32 %v6320_v26, %v3810_v21  ;;  %v3814_v17 = vpop.permute.xlu0 %3813  ;;  %v3258_v12 = vld [vmem:[#allocation3 + $0x182] sm:$0xff] }
 0x3ca   : > { %v9126_v58 = vadd.f32 %v6426_v27, %v4368_v49  ;;  %v6429_v56 = vadd.f32 %v6428_v42, %v6427_v36  ;;  %4784 = vmatmul.mubr.bf16.gmra.mrb[240].mxu1 %v3400_v7  ;;  %v3386_v55 = vld [vmem:[#allocation3 + $0x189] sm:$0xff]  ;;  %v3385_v21 = vld [vmem:[#allocation3 + $0x181] sm:$0xff] }
 0x3cb   : > { %4937 = vmatmul.mubr.bf16.gmra.mrb[12].mxu0 %v9047_v32  ;;  %4791 = vmatprep.mubr.bf16.mxu1 %v9069_v13  ;;  %v4379_v13 = vadd.f32 %v6323_v44, %v3812_v15  ;;  %v3421_v15 = vld [vmem:[#allocation3 + $0x32] sm:$0xff] }
 0x3cc   : > { %v9130_v48 = vadd.f32 %v6429_v56, %v4371_v62  ;;  %4944 = vmatprep.mubr.bf16.mxu0 %v3401_v16 }
 0x3cd   : > { %v6324_v46 = vpop.f32.mrb[136].mxu1 }
 0x3ce   : > { %v6430_v60 = vpop.f32.mrb[164].mxu0  ;;  %v6325_v43 = vpop.f32.mrb[137].mxu1 }
 0x3cf   : > { %v6326_v28 = vadd.f32 %v6325_v43, %v6324_v46  ;;  %v6431_v50 = vpop.f32.mrb[165].mxu0  ;;  %v6327_v45 = vpop.f32.mrb[138].mxu1 }
 0x3d0   : > { %v6432_v40 = vadd.f32 %v6431_v50, %v6430_v60  ;;  %v6433_v57 = vpop.f32.mrb[166].mxu0  ;;  %v6328_v20 = vpop.f32.mrb[139].mxu1  ;;  %v3403_v50 = vpack.c.bf16 %v3386_v55, %v3385_v21  ;;  %v3425_v21 = vld [vmem:[#allocation3 + $0x62] sm:$0xff] }
 0x3d1   : > { %v6329_v47 = vadd.f32 %v6328_v20, %v6327_v45  ;;  %v6434_v32 = vpop.f32.mrb[167].mxu0  ;;  %v4384_v44 = vadd.f32 %v6326_v28, %v3814_v17  ;;  %v3818_v45 = vpop.permute.xlu0 %3817 }
 0x3d2   : > { %v9132_v7 = vadd.f32 %v6432_v40, %v4376_v51  ;;  %v6435_v61 = vadd.f32 %v6434_v32, %v6433_v57  ;;  %4792 = vmatmul.mubr.bf16.gmra.mrb[244].mxu1 %v3401_v16  ;;  %v9138_v16 = vpack.c.bf16 %v3259_v1, %v3258_v12  ;;  %v3387_v51 = vld [vmem:[#allocation3 + $0x199] sm:$0xff]  ;;  %v3388_v40 = vld [vmem:[#allocation3 + $0x1a1] sm:$0xff] }
 0x3d3   : > { %4945 = vmatmul.mubr.bf16.gmra.mrb[16].mxu0 %v9056_v11  ;;  %4799 = vmatprep.mubr.bf16.mxu1 %v9077_v19  ;;  %v3816_v11 = vpop.permute.xlu1 %3815 }
 0x3d4   : > { %v9136_v33 = vadd.f32 %v6435_v61, %v4379_v13  ;;  %4952 = vmatprep.mubr.bf16.mxu0 %v3402_v59  ;;  %v4387_v46 = vadd.f32 %v6329_v47, %v3816_v11  ;;  %v3422_v47 = vld [vmem:[#allocation3 + $0x3a] sm:$0xff] }
 0x3d5   : > { %v6330_v24 = vpop.f32.mrb[140].mxu1  ;;  %v3453_v1 = vpack.c.bf16 %v3422_v47, %v3421_v15 }
 0x3d6   : > { %v6436_v26 = vpop.f32.mrb[168].mxu0  ;;  %v6331_v2 = vpop.f32.mrb[141].mxu1 }
 0x3d7   : > { %v6332_v49 = vadd.f32 %v6331_v2, %v6330_v24  ;;  %v6437_v27 = vpop.f32.mrb[169].mxu0  ;;  %v6333_v36 = vpop.f32.mrb[142].mxu1  ;;  %v3404_v24 = vpack.c.bf16 %v3388_v40, %v3387_v51 }
 0x3d8   : > { %v6438_v42 = vadd.f32 %v6437_v27, %v6436_v26  ;;  %v6439_v30 = vpop.f32.mrb[170].mxu0  ;;  %v6334_v62 = vpop.f32.mrb[143].mxu1 }
 0x3d9   : > { %v6335_v56 = vadd.f32 %v6334_v62, %v6333_v36  ;;  %v6440_v19 = vpop.f32.mrb[171].mxu0  ;;  %v4392_v61 = vadd.f32 %v6332_v49, %v3818_v45  ;;  %v3820_v26 = vpop.permute.xlu1 %3819  ;;  %v3323_v49 = vld [vmem:[#allocation3 + $0x198] sm:$0xff] }
 0x3da   : > { %v9140_v60 = vadd.f32 %v6438_v42, %v4384_v44  ;;  %v6441_v43 = vadd.f32 %v6440_v19, %v6439_v30  ;;  %4800 = vmatmul.mubr.bf16.gmra.mrb[248].mxu1 %v3402_v59  ;;  %v3324_v42 = vld [vmem:[#allocation3 + $0x1a0] sm:$0xff]  ;;  %v3822_v30 = vpop.permute.xlu0 %3821 }
 0x3db   : > { %4953 = vmatmul.mubr.bf16.gmra.mrb[20].mxu0 %v9065_v14  ;;  %4807 = vmatprep.mubr.bf16.mxu1 %v9138_v16  ;;  %v4395_v27 = vadd.f32 %v6335_v56, %v3820_v26 }
 0x3dc   : > { %v9144_v28 = vadd.f32 %v6441_v43, %v4387_v46  ;;  %4960 = vmatprep.mubr.bf16.mxu0 %v3403_v50  ;;  %v3426_v46 = vld [vmem:[#allocation3 + $0x6a] sm:$0xff] }
 0x3dd   : > { %v6336_v52 = vpop.f32.mrb[144].mxu1  ;;  %v3455_v47 = vpack.c.bf16 %v3426_v46, %v3425_v21 }
 0x3de   : > { %v6442_v57 = vpop.f32.mrb[172].mxu0  ;;  %v6337_v20 = vpop.f32.mrb[145].mxu1 }
 0x3df   : > { %v6338_v32 = vadd.f32 %v6337_v20, %v6336_v52  ;;  %v6443_v35 = vpop.f32.mrb[173].mxu0  ;;  %v6339_v13 = vpop.f32.mrb[146].mxu1  ;;  %v3340_v52 = vpack.c.bf16 %v3324_v42, %v3323_v49 }
 0x3e0   : > { %v6444_v59 = vadd.f32 %v6443_v35, %v6442_v57  ;;  %v6445_v17 = vpop.f32.mrb[174].mxu0  ;;  %v6340_v14 = vpop.f32.mrb[147].mxu1 }
 0x3e1   : > { %v6341_v2 = vadd.f32 %v6340_v14, %v6339_v13  ;;  %v6446_v12 = vpop.f32.mrb[175].mxu0  ;;  %v4400_v51 = vadd.f32 %v6338_v32, %v3822_v30  ;;  %v3824_v57 = vpop.permute.xlu1 %3823  ;;  %v3427_v32 = vld [vmem:[#allocation3 + $0x7a] sm:$0xff] }
 0x3e2   : > { %v9146_v36 = vadd.f32 %v6444_v59, %v4392_v61  ;;  %v6447_v55 = vadd.f32 %v6446_v12, %v6445_v17  ;;  %4808 = vmatmul.mubr.bf16.gmra.mrb[252].mxu1 %v3403_v50  ;;  %v3826_v17 = vpop.permute.xlu0 %3825 }
 0x3e3   : > { %4961 = vmatmul.mubr.bf16.gmra.mrb[24].mxu0 %v9072_v18  ;;  %6832 = vmatprep.mubr.bf16.mxu1 %v3453_v1  ;;  %v4403_v35 = vadd.f32 %v6341_v2, %v3824_v57  ;;  %v3429_v1 = vld [vmem:[#allocation3 + $0x92] sm:$0xff]  ;;  %v3431_v57 = vld [vmem:[#allocation3 + $0xaa] sm:$0xff] }
 0x3e4   : > { %v9149_v44 = vadd.f32 %v6447_v55, %v4395_v27  ;;  %4968 = vmatprep.mubr.bf16.mxu0 %v3404_v24  ;;  %v3428_v24 = vld [vmem:[#allocation3 + $0x82] sm:$0xff]  ;;  %v3430_v27 = vld [vmem:[#allocation3 + $0x9a] sm:$0xff] }
 0x3e5   : > { %v6342_v62 = vpop.f32.mrb[148].mxu1 }
 0x3e6   : > { %v6448_v11 = vpop.f32.mrb[176].mxu0  ;;  %v6343_v19 = vpop.f32.mrb[149].mxu1 }
 0x3e7   : > { %v6344_v43 = vadd.f32 %v6343_v19, %v6342_v62  ;;  %v6449_v56 = vpop.f32.mrb[177].mxu0  ;;  %v6345_v45 = vpop.f32.mrb[150].mxu1 }
 0x3e8   : > { %v6450_v50 = vadd.f32 %v6449_v56, %v6448_v11  ;;  %v6451_v40 = vpop.f32.mrb[178].mxu0  ;;  %v6346_v18 = vpop.f32.mrb[151].mxu1  ;;  %v3457_v56 = vpack.c.bf16 %v3430_v27, %v3429_v1 }
 0x3e9   : > { %v6347_v20 = vadd.f32 %v6346_v18, %v6345_v45  ;;  %v6452_v15 = vpop.f32.mrb[179].mxu0  ;;  %v4408_v42 = vadd.f32 %v6344_v43, %v3826_v17  ;;  %v3828_v19 = vpop.permute.xlu1 %3827  ;;  %v3432_v43 = vld [vmem:[#allocation3 + $0xb2] sm:$0xff] }
 0x3ea   : > { %v9151_v13 = vadd.f32 %v6450_v50, %v4400_v51  ;;  %v6453_v61 = vadd.f32 %v6452_v15, %v6451_v40  ;;  %6833 = vmatmul.mubr.bf16.vlgmr.msra.gmra.mrb[0].mxu1 %v8918_v23  ;;  %v3456_v23 = vpack.c.bf16 %v3428_v24, %v3427_v32  ;;  %v3830_v40 = vpop.permute.xlu0 %3829  ;;  %v3458_v1 = vpack.c.bf16 %v3432_v43, %v3431_v57 }
 0x3eb   : > { %4969 = vmatmul.mubr.bf16.gmra.mrb[28].mxu0 %v3340_v52  ;;  %6836 = vmatprep.mubr.bf16.mxu1 %v3455_v47  ;;  %v4411_v45 = vadd.f32 %v6347_v20, %v3828_v19 }
 0x3ec   : > { %v9154_v59 = vadd.f32 %v6453_v61, %v4403_v35  ;;  %v3433_v35 = vld [vmem:[#allocation3 + $0xc2] sm:$0xff]  ;;  %v3434_v61 = vld [vmem:[#allocation3 + $0xca] sm:$0xff] }
 0x3ed   : > { %v6348_v14 = vpop.f32.mrb[152].mxu1  ;;  %v3832_v27 = vpop.permute.xlu1 %3831 }
 0x3ee   : > { %v6454_v26 = vpop.f32.mrb[180].mxu0  ;;  %v6349_v12 = vpop.f32.mrb[153].mxu1 }
 0x3ef   : > { %v6350_v55 = vadd.f32 %v6349_v12, %v6348_v14  ;;  %v6455_v49 = vpop.f32.mrb[181].mxu0  ;;  %v6351_v2 = vpop.f32.mrb[154].mxu1 }
 0x3f0   : > { %v6456_v30 = vadd.f32 %v6455_v49, %v6454_v26  ;;  %v6457_v62 = vpop.f32.mrb[182].mxu0  ;;  %v6352_v11 = vpop.f32.mrb[155].mxu1 }
 0x3f1   : > { %v6353_v21 = vadd.f32 %v6352_v11, %v6351_v2  ;;  %v6458_v46 = vpop.f32.mrb[183].mxu0  ;;  %v4416_v24 = vadd.f32 %v6350_v55, %v3830_v40  ;;  %v3834_v19 = vpop.permute.xlu0 %3833  ;;  %v3436_v55 = vld [vmem:[#allocation3 + $0xe2] sm:$0xff]  ;;  %v3437_v40 = vld [vmem:[#allocation3 + $0xf2] sm:$0xff] }
 0x3f2   : > { %v9156_v52 = vadd.f32 %v6456_v30, %v4408_v42  ;;  %v6459_v51 = vadd.f32 %v6458_v46, %v6457_v62  ;;  %6837 = vmatmul.mubr.bf16.gmra.mrb[4].mxu1 %v3456_v23  ;;  %v3459_v42 = vpack.c.bf16 %v3434_v61, %v3433_v35 }
 0x3f3   : > { %6840 = vmatprep.mubr.bf16.mxu1 %v3457_v56  ;;  %v4419_v30 = vadd.f32 %v6353_v21, %v3832_v27  ;;  %v3435_v56 = vld [vmem:[#allocation3 + $0xda] sm:$0xff] }
 0x3f4   : > { %v9158_v50 = vadd.f32 %v6459_v51, %v4411_v45 }
 0x3f5   : > { %v6354_v18 = vpop.f32.mrb[156].mxu1 }
 0x3f6   : > { %v6460_v15 = vpop.f32.mrb[184].mxu0  ;;  %v6355_v47 = vpop.f32.mrb[157].mxu1 }
 0x3f7   : > { %v6356_v17 = vadd.f32 %v6355_v47, %v6354_v18  ;;  %v6461_v14 = vpop.f32.mrb[185].mxu0  ;;  %v6357_v32 = vpop.f32.mrb[158].mxu1  ;;  %v3438_v18 = vld [vmem:[#allocation3 + $0xfa] sm:$0xff] }
 0x3f8   : > { %v6462_v20 = vadd.f32 %v6461_v14, %v6460_v15  ;;  %v6463_v26 = vpop.f32.mrb[186].mxu0  ;;  %v6358_v12 = vpop.f32.mrb[159].mxu1  ;;  %v3460_v14 = vpack.c.bf16 %v3436_v55, %v3435_v56  ;;  %v3442_v56 = vld [vmem:[#allocation3 + $0x12a] sm:$0xff] }
 0x3f9   : > { %v6359_v49 = vadd.f32 %v6358_v12, %v6357_v32  ;;  %v6464_v2 = vpop.f32.mrb[187].mxu0  ;;  %v4424_v47 = vadd.f32 %v6356_v17, %v3834_v19  ;;  %v3836_v32 = vpop.permute.xlu1 %3835  ;;  %v3440_v17 = vld [vmem:[#allocation3 + $0x112] sm:$0xff] }
 0x3fa   : > { %v9160_v62 = vadd.f32 %v6462_v20, %v4416_v24  ;;  %v6465_v11 = vadd.f32 %v6464_v2, %v6463_v26  ;;  %6841 = vmatmul.mubr.bf16.gmra.mrb[8].mxu1 %v3458_v1  ;;  %v3461_v26 = vpack.c.bf16 %v3438_v18, %v3437_v40 }
 0x3fb   : > { %6844 = vmatprep.mubr.bf16.mxu1 %v3459_v42  ;;  %v4427_v12 = vadd.f32 %v6359_v49, %v3836_v32  ;;  %v3838_v42 = vpop.permute.xlu0 %3837 }
 0x3fc   : > { %v9162_v23 = vadd.f32 %v6465_v11, %v4419_v30  ;;  %v3439_v11 = vld [vmem:[#allocation3 + $0x10a] sm:$0xff] }
 0x3fd   : > { %v6360_v46 = vpop.f32.mrb[160].mxu1 }
 0x3fe   : > { %v6466_v45 = vpop.f32.mrb[188].mxu0  ;;  %v6361_v51 = vpop.f32.mrb[161].mxu1 }
 0x3ff   : > { %v6362_v57 = vadd.f32 %v6361_v51, %v6360_v46  ;;  %v6467_v43 = vpop.f32.mrb[189].mxu0  ;;  %v6363_v15 = vpop.f32.mrb[162].mxu1 }
 0x400   : > { %v6468_v21 = vadd.f32 %v6467_v43, %v6466_v45  ;;  %v6469_v35 = vpop.f32.mrb[190].mxu0  ;;  %v6364_v61 = vpop.f32.mrb[163].mxu1  ;;  %v3441_v45 = vld [vmem:[#allocation3 + $0x122] sm:$0xff] }
 0x401   : > { %v6365_v24 = vadd.f32 %v6364_v61, %v6363_v15  ;;  %v6470_v20 = vpop.f32.mrb[191].mxu0  ;;  %v4432_v40 = vadd.f32 %v6362_v57, %v3838_v42  ;;  %v3444_v57 = vld [vmem:[#allocation3 + $0x142] sm:$0xff] }
 0x402   : > { %v9164_v1 = vadd.f32 %v6468_v21, %v4424_v47  ;;  %v6471_v27 = vadd.f32 %v6470_v20, %v6469_v35  ;;  %6845 = vmatmul.mubr.bf16.gmra.mrb[12].mxu1 %v3460_v14  ;;  %v3462_v47 = vpack.c.bf16 %v3440_v17, %v3439_v11  ;;  %v3840_v21 = vpop.permute.xlu1 %3839  ;;  %v3463_v14 = vpack.c.bf16 %v3442_v56, %v3441_v45  ;;  %v3446_v11 = vld [vmem:[#allocation3 + $0x15a] sm:$0xff] }
 0x403   : > { %6848 = vmatprep.mubr.bf16.mxu1 %v3461_v26  ;;  %v4435_v32 = vadd.f32 %v6365_v24, %v3840_v21 }
 0x404   : > { %v9166_v2 = vadd.f32 %v6471_v27, %v4427_v12  ;;  %v3842_v27 = vpop.permute.xlu0 %3841 }
 0x405   : > { %v6366_v30 = vpop.f32.mrb[164].mxu1 }
 0x406   : > { %v6472_v19 = vpop.f32.mrb[192].mxu0  ;;  %v6367_v46 = vpop.f32.mrb[165].mxu1 }
 0x407   : > { %v6368_v55 = vadd.f32 %v6367_v46, %v6366_v30  ;;  %v6473_v51 = vpop.f32.mrb[193].mxu0  ;;  %v6369_v43 = vpop.f32.mrb[166].mxu1  ;;  %v3443_v46 = vld [vmem:[#allocation3 + $0x13a] sm:$0xff] }
 0x408   : > { %v6474_v49 = vadd.f32 %v6473_v51, %v6472_v19  ;;  %v6475_v18 = vpop.f32.mrb[194].mxu0  ;;  %v6370_v15 = vpop.f32.mrb[167].mxu1  ;;  %v3445_v51 = vld [vmem:[#allocation3 + $0x152] sm:$0xff] }
 0x409   : > { %v6371_v35 = vadd.f32 %v6370_v15, %v6369_v43  ;;  %v6476_v61 = vpop.f32.mrb[195].mxu0  ;;  %v4440_v45 = vadd.f32 %v6368_v55, %v3842_v27  ;;  %v3448_v55 = vld [vmem:[#allocation3 + $0x172] sm:$0xff] }
 0x40a   : > { %v9168_v20 = vadd.f32 %v6474_v49, %v4432_v40  ;;  %v6477_v26 = vadd.f32 %v6476_v61, %v6475_v18  ;;  %6849 = vmatmul.mubr.bf16.gmra.mrb[16].mxu1 %v3462_v47  ;;  %v3464_v49 = vpack.c.bf16 %v3444_v57, %v3443_v46  ;;  %v3844_v18 = vpop.permute.xlu1 %3843  ;;  %v3465_v61 = vpack.c.bf16 %v3446_v11, %v3445_v51 }
 0x40b   : > { %6852 = vmatprep.mubr.bf16.mxu1 %v3463_v14  ;;  %v4443_v14 = vadd.f32 %v6371_v35, %v3844_v18  ;;  %v3466_v11 = vpack.c.bf16 %v3448_v55, %v3447_v0 }
 0x40c   : > { %v9170_v12 = vadd.f32 %v6477_v26, %v4435_v32 }
 0x40d   : > { %v6372_v30 = vpop.f32.mrb[168].mxu1 }
 0x40e   : > { %v6478_v42 = vpop.f32.mrb[196].mxu0  ;;  %v6373_v19 = vpop.f32.mrb[169].mxu1 }
 0x40f   : > { %v6374_v17 = vadd.f32 %v6373_v19, %v6372_v30  ;;  %v6479_v43 = vpop.f32.mrb[197].mxu0  ;;  %v6375_v15 = vpop.f32.mrb[170].mxu1 }
 0x410   : > { %v6480_v24 = vadd.f32 %v6479_v43, %v6478_v42  ;;  %v6481_v56 = vpop.f32.mrb[198].mxu0  ;;  %v6376_v40 = vpop.f32.mrb[171].mxu1 }
 0x411   : > { %v6377_v47 = vadd.f32 %v6376_v40, %v6375_v15  ;;  %v6482_v21 = vpop.f32.mrb[199].mxu0  ;;  %v3846_v30 = vpop.permute.xlu0 %3845 }
 0x412   : > { %v9172_v32 = vadd.f32 %v6480_v24, %v4440_v45  ;;  %v6483_v26 = vadd.f32 %v6482_v21, %v6481_v56  ;;  %6853 = vmatmul.mubr.bf16.gmra.mrb[20].mxu1 %v3464_v49  ;;  %v4448_v15 = vadd.f32 %v6374_v17, %v3846_v30  ;;  %v3848_v45 = vpop.permute.xlu1 %3847 }
 0x413   : > { %6856 = vmatprep.mubr.bf16.mxu1 %v3465_v61  ;;  %v4451_v49 = vadd.f32 %v6377_v47, %v3848_v45  ;;  %v3451_v61 = vld [vmem:[#allocation3 + $0x19a] sm:$0xff] }
 0x414   : > { %v9174_v41 = vadd.f32 %v6483_v26, %v4443_v14  ;;  %v3452_v14 = vld [vmem:[#allocation3 + $0x1a2] sm:$0xff] }
 0x415   : > { %v6378_v19 = vpop.f32.mrb[172].mxu1 }
 0x416   : > { %v6484_v27 = vpop.f32.mrb[200].mxu0  ;;  %v6379_v42 = vpop.f32.mrb[173].mxu1 }
 0x417   : > { %v6380_v43 = vadd.f32 %v6379_v42, %v6378_v19  ;;  %v6485_v46 = vpop.f32.mrb[201].mxu0  ;;  %v6381_v57 = vpop.f32.mrb[174].mxu1  ;;  %v3468_v42 = vpack.c.bf16 %v3452_v14, %v3451_v61 }
 0x418   : > { %v6486_v40 = vadd.f32 %v6485_v46, %v6484_v27  ;;  %v6487_v51 = vpop.f32.mrb[202].mxu0  ;;  %v6382_v35 = vpop.f32.mrb[175].mxu1 }
 0x419   : > { %v6383_v24 = vadd.f32 %v6382_v35, %v6381_v57  ;;  %v6488_v56 = vpop.f32.mrb[203].mxu0  ;;  %v3850_v19 = vpop.permute.xlu0 %3849 }
 0x41a   : > { %v9176_v18 = vadd.f32 %v6486_v40, %v4448_v15  ;;  %v6489_v21 = vadd.f32 %v6488_v56, %v6487_v51  ;;  %6857 = vmatmul.mubr.bf16.gmra.mrb[24].mxu1 %v3466_v11  ;;  %v4456_v57 = vadd.f32 %v6380_v43, %v3850_v19  ;;  %v3852_v51 = vpop.permute.xlu1 %3851 }
 0x41b   : > { %6860 = vmatprep.mubr.bf16.mxu1 %v9138_v16  ;;  %v4459_v16 = vadd.f32 %v6383_v24, %v3852_v51 }
 0x41c   : > { %v9179_v26 = vadd.f32 %v6489_v21, %v4451_v49 }
 0x41d   : > { %v6384_v17 = vpop.f32.mrb[176].mxu1  ;;  %v3854_v21 = vpop.permute.xlu0 %3853 }
 0x41e   : > { %v6490_v30 = vpop.f32.mrb[204].mxu0  ;;  %v6385_v27 = vpop.f32.mrb[177].mxu1 }
 0x41f   : > { %v6386_v0 = vadd.f32 %v6385_v27, %v6384_v17  ;;  %v6491_v55 = vpop.f32.mrb[205].mxu0  ;;  %v6387_v46 = vpop.f32.mrb[178].mxu1 }
 0x420   : > { %v6492_v47 = vadd.f32 %v6491_v55, %v6490_v30  ;;  %v6493_v15 = vpop.f32.mrb[206].mxu0  ;;  %v6388_v40 = vpop.f32.mrb[179].mxu1 }
 0x421   : > { %v6389_v35 = vadd.f32 %v6388_v40, %v6387_v46  ;;  %v6494_v11 = vpop.f32.mrb[207].mxu0  ;;  %v4464_v19 = vadd.f32 %v6386_v0, %v3854_v21  ;;  %v3856_v46 = vpop.permute.xlu1 %3855 }
 0x422   : > { %v9181_v45 = vadd.f32 %v6492_v47, %v4456_v57  ;;  %v6495_v56 = vadd.f32 %v6494_v11, %v6493_v15  ;;  %6861 = vmatmul.mubr.bf16.gmra.mrb[28].mxu1 %v3468_v42  ;;  %v3858_v51 = vpop.permute.xlu0 %3857 }
 0x423   : > { %v4467_v57 = vadd.f32 %v6389_v35, %v3856_v46 }
 0x424   : > { %v9183_v49 = vadd.f32 %v6495_v56, %v4459_v16 }
 0x425   : > { %v6390_v5 = vpop.f32.mrb[180].mxu1  ;;  %v3860_v53 = vpop.permute.xlu1 %3859 }
 0x426   : > { %v6496_v61 = vpop.f32.mrb[208].mxu0  ;;  %v6391_v14 = vpop.f32.mrb[181].mxu1 }
 0x427   : > { %v6392_v17 = vadd.f32 %v6391_v14, %v6390_v5  ;;  %v6497_v27 = vpop.f32.mrb[209].mxu0  ;;  %v6393_v43 = vpop.f32.mrb[182].mxu1 }
 0x428   : > { %v6498_v30 = vadd.f32 %v6497_v27, %v6496_v61  ;;  %v6499_v55 = vpop.f32.mrb[210].mxu0  ;;  %v6394_v6 = vpop.f32.mrb[183].mxu1 }
 0x429   : > { %v6395_v40 = vadd.f32 %v6394_v6, %v6393_v43  ;;  %v6500_v24 = vpop.f32.mrb[211].mxu0  ;;  %v4472_v0 = vadd.f32 %v6392_v17, %v3858_v51  ;;  %v3862_v46 = vpop.permute.xlu0 %3861 }
 0x42a   : > { %v9185_v47 = vadd.f32 %v6498_v30, %v4464_v19  ;;  %v6501_v42 = vadd.f32 %v6500_v24, %v6499_v55  ;;  %v3864_v63 = vpop.permute.xlu1 %3863 }
 0x42b   : > { %v4475_v35 = vadd.f32 %v6395_v40, %v3860_v53 }
 0x42c   : > { %v9187_v15 = vadd.f32 %v6501_v42, %v4467_v57 }
 0x42d   : > { %v6396_v11 = vpop.f32.mrb[184].mxu1 }
 0x42e   : > { %v6502_v16 = vpop.f32.mrb[212].mxu0  ;;  %v6397_v56 = vpop.f32.mrb[185].mxu1 }
 0x42f   : > { %v6398_v5 = vadd.f32 %v6397_v56, %v6396_v11  ;;  %v6503_v14 = vpop.f32.mrb[213].mxu0  ;;  %v6399_v39 = vpop.f32.mrb[186].mxu1 }
 0x430   : > { %v6504_v21 = vadd.f32 %v6503_v14, %v6502_v16  ;;  %v6505_v61 = vpop.f32.mrb[214].mxu0  ;;  %v6400_v27 = vpop.f32.mrb[187].mxu1 }
 0x431   : > { %v6401_v6 = vadd.f32 %v6400_v27, %v6399_v39  ;;  %v6506_v43 = vpop.f32.mrb[215].mxu0  ;;  %v4480_v17 = vadd.f32 %v6398_v5, %v3862_v46  ;;  %v3868_v10 = vpop.permute.xlu1 %3867 }
 0x432   : > { %v9189_v19 = vadd.f32 %v6504_v21, %v4472_v0  ;;  %v6507_v30 = vadd.f32 %v6506_v43, %v6505_v61  ;;  %v3866_v61 = vpop.permute.xlu0 %3865 }
 0x433   : > { %v4483_v53 = vadd.f32 %v6401_v6, %v3864_v63 }
 0x434   : > { %v9191_v55 = vadd.f32 %v6507_v30, %v4475_v35 }
 0x435   : > { %v6402_v24 = vpop.f32.mrb[188].mxu1 }
 0x436   : > { %v6508_v57 = vpop.f32.mrb[216].mxu0  ;;  %v6403_v42 = vpop.f32.mrb[189].mxu1 }
 0x437   : > { %v6404_v11 = vadd.f32 %v6403_v42, %v6402_v24  ;;  %v6509_v56 = vpop.f32.mrb[217].mxu0  ;;  %v6405_v34 = vpop.f32.mrb[190].mxu1 }
 0x438   : > { %v6510_v51 = vadd.f32 %v6509_v56, %v6508_v57  ;;  %v6511_v16 = vpop.f32.mrb[218].mxu0  ;;  %v6406_v14 = vpop.f32.mrb[191].mxu1 }
 0x439   : > { %v6407_v39 = vadd.f32 %v6406_v14, %v6405_v34  ;;  %v6512_v27 = vpop.f32.mrb[219].mxu0  ;;  %v4488_v5 = vadd.f32 %v6404_v11, %v3866_v61 }
 0x43a   : > { %v9193_v40 = vadd.f32 %v6510_v51, %v4480_v17  ;;  %v6513_v0 = vadd.f32 %v6512_v27, %v6511_v16 }
 0x43b   : > { %v4491_v17 = vadd.f32 %v6407_v39, %v3868_v10 }
 0x43c   : > { %v9195_v21 = vadd.f32 %v6513_v0, %v4483_v53 }
 0x43d   : > { %v6536_v43 = vpop.f32.mrb[192].mxu1 }
 0x43e   : > { %v6514_v35 = vpop.f32.mrb[220].mxu0  ;;  %v6537_v30 = vpop.f32.mrb[193].mxu1 }
 0x43f   : > { %v6515_v24 = vpop.f32.mrb[221].mxu0  ;;  %v6538_v42 = vadd.f32 %v6537_v30, %v6536_v43  ;;  %v6539_v25 = vpop.f32.mrb[194].mxu1 }
 0x440   : > { %v6516_v46 = vadd.f32 %v6515_v24, %v6514_v35  ;;  %v6517_v57 = vpop.f32.mrb[222].mxu0  ;;  %v6540_v56 = vpop.f32.mrb[195].mxu1 }
 0x441   : > { %v4690_v34 = vadd.f32 %v6538_v42, %v9126_v58  ;;  %v6518_v63 = vpop.f32.mrb[223].mxu0  ;;  %v6541_v6 = vadd.f32 %v6540_v56, %v6539_v25 }
 0x442   : > { %v9198_v51 = vadd.f32 %v6516_v46, %v4488_v5  ;;  %v6519_v16 = vadd.f32 %v6518_v63, %v6517_v57 }
 0x443   : > { %v4693_v14 = vadd.f32 %v6541_v6, %v9130_v48 }
 0x444   : > { %v9201_v27 = vadd.f32 %v6519_v16, %v4491_v17 }
 0x445   : > { %v6542_v53 = vpop.f32.mrb[196].mxu1 }
 0x446   : > { %v6648_v0 = vpop.f32.mrb[224].mxu0  ;;  %v6543_v43 = vpop.f32.mrb[197].mxu1 }
 0x447   : > { %v6544_v11 = vadd.f32 %v6543_v43, %v6542_v53  ;;  %v6649_v61 = vpop.f32.mrb[225].mxu0  ;;  %v6545_v35 = vpop.f32.mrb[198].mxu1 }
 0x448   : > { %v6650_v30 = vadd.f32 %v6649_v61, %v6648_v0  ;;  %v6651_v24 = vpop.f32.mrb[226].mxu0  ;;  %v6546_v31 = vpop.f32.mrb[199].mxu1 }
 0x449   : > { %v4698_v58 = vadd.f32 %v6544_v11, %v9132_v7  ;;  %v6547_v25 = vadd.f32 %v6546_v31, %v6545_v35  ;;  %v6652_v10 = vpop.f32.mrb[227].mxu0 }
 0x44a   : > { %v6653_v39 = vadd.f32 %v6652_v10, %v6651_v24  ;;  %v9204_v42 = vadd.f32 %v6650_v30, %v4690_v34 }
 0x44b   : > { %v4701_v48 = vadd.f32 %v6547_v25, %v9136_v33 }
 0x44c   : > { %v9207_v5 = vadd.f32 %v6653_v39, %v4693_v14 }
 0x44d   : > { %v6548_v46 = vpop.f32.mrb[200].mxu1 }
 0x44e   : > { %v6654_v57 = vpop.f32.mrb[228].mxu0  ;;  %v6549_v56 = vpop.f32.mrb[201].mxu1 }
 0x44f   : > { %v6550_v63 = vadd.f32 %v6549_v56, %v6548_v46  ;;  %v6655_v6 = vpop.f32.mrb[229].mxu0  ;;  %v6551_v17 = vpop.f32.mrb[202].mxu1 }
 0x450   : > { %v6656_v16 = vadd.f32 %v6655_v6, %v6654_v57  ;;  %v6657_v53 = vpop.f32.mrb[230].mxu0  ;;  %v6552_v0 = vpop.f32.mrb[203].mxu1 }
 0x451   : > { %v4706_v7 = vadd.f32 %v6550_v63, %v9140_v60  ;;  %v6553_v31 = vadd.f32 %v6552_v0, %v6551_v17  ;;  %v6658_v43 = vpop.f32.mrb[231].mxu0 }
 0x452   : > { %v6659_v11 = vadd.f32 %v6658_v43, %v6657_v53  ;;  %v9210_v34 = vadd.f32 %v6656_v16, %v4698_v58 }
 0x453   : > { %v4709_v33 = vadd.f32 %v6553_v31, %v9144_v28 }
 0x454   : > { %v9213_v14 = vadd.f32 %v6659_v11, %v4701_v48 }
 0x455   : > { %v6554_v61 = vpop.f32.mrb[204].mxu1 }
 0x456   : > { %v6660_v35 = vpop.f32.mrb[232].mxu0  ;;  %v6555_v30 = vpop.f32.mrb[205].mxu1 }
 0x457   : > { %v6556_v24 = vadd.f32 %v6555_v30, %v6554_v61  ;;  %v6661_v25 = vpop.f32.mrb[233].mxu0  ;;  %v6557_v10 = vpop.f32.mrb[206].mxu1 }
 0x458   : > { %v6662_v39 = vadd.f32 %v6661_v25, %v6660_v35  ;;  %v6663_v46 = vpop.f32.mrb[234].mxu0  ;;  %v6558_v57 = vpop.f32.mrb[207].mxu1 }
 0x459   : > { %v4714_v60 = vadd.f32 %v6556_v24, %v9146_v36  ;;  %v6559_v56 = vadd.f32 %v6558_v57, %v6557_v10  ;;  %v6664_v63 = vpop.f32.mrb[235].mxu0 }
 0x45a   : > { %v6665_v6 = vadd.f32 %v6664_v63, %v6663_v46  ;;  %v9216_v58 = vadd.f32 %v6662_v39, %v4706_v7 }
 0x45b   : > { %v4717_v28 = vadd.f32 %v6559_v56, %v9149_v44 }
 0x45c   : > { %v9219_v48 = vadd.f32 %v6665_v6, %v4709_v33 }
 0x45d   : > { %v6560_v17 = vpop.f32.mrb[208].mxu1 }
 0x45e   : > { %v6666_v16 = vpop.f32.mrb[236].mxu0  ;;  %v6561_v53 = vpop.f32.mrb[209].mxu1 }
 0x45f   : > { %v6562_v0 = vadd.f32 %v6561_v53, %v6560_v17  ;;  %v6667_v31 = vpop.f32.mrb[237].mxu0  ;;  %v6563_v43 = vpop.f32.mrb[210].mxu1 }
 0x460   : > { %v6668_v11 = vadd.f32 %v6667_v31, %v6666_v16  ;;  %v6669_v61 = vpop.f32.mrb[238].mxu0  ;;  %v6564_v35 = vpop.f32.mrb[211].mxu1 }
 0x461   : > { %v4722_v36 = vadd.f32 %v6562_v0, %v9151_v13  ;;  %v6565_v30 = vadd.f32 %v6564_v35, %v6563_v43  ;;  %v6670_v24 = vpop.f32.mrb[239].mxu0 }
 0x462   : > { %v6671_v25 = vadd.f32 %v6670_v24, %v6669_v61  ;;  %v9222_v7 = vadd.f32 %v6668_v11, %v4714_v60 }
 0x463   : > { %v4725_v44 = vadd.f32 %v6565_v30, %v9154_v59 }
 0x464   : > { %v9225_v33 = vadd.f32 %v6671_v25, %v4717_v28 }
 0x465   : > { %v6566_v10 = vpop.f32.mrb[212].mxu1 }
 0x466   : > { %v6672_v39 = vpop.f32.mrb[240].mxu0  ;;  %v6567_v46 = vpop.f32.mrb[213].mxu1 }
 0x467   : > { %v6568_v57 = vadd.f32 %v6567_v46, %v6566_v10  ;;  %v6673_v56 = vpop.f32.mrb[241].mxu0  ;;  %v6569_v63 = vpop.f32.mrb[214].mxu1 }
 0x468   : > { %v6674_v6 = vadd.f32 %v6673_v56, %v6672_v39  ;;  %v6675_v17 = vpop.f32.mrb[242].mxu0  ;;  %v6570_v16 = vpop.f32.mrb[215].mxu1 }
 0x469   : > { %v4730_v13 = vadd.f32 %v6568_v57, %v9156_v52  ;;  %v6571_v53 = vadd.f32 %v6570_v16, %v6569_v63  ;;  %v6676_v0 = vpop.f32.mrb[243].mxu0 }
 0x46a   : > { %v6677_v31 = vadd.f32 %v6676_v0, %v6675_v17  ;;  %v9228_v60 = vadd.f32 %v6674_v6, %v4722_v36 }
 0x46b   : > { %v4733_v59 = vadd.f32 %v6571_v53, %v9158_v50 }
 0x46c   : > { %v9231_v28 = vadd.f32 %v6677_v31, %v4725_v44 }
 0x46d   : > { %v6572_v43 = vpop.f32.mrb[216].mxu1 }
 0x46e   : > { %v6678_v11 = vpop.f32.mrb[244].mxu0  ;;  %v6573_v61 = vpop.f32.mrb[217].mxu1 }
 0x46f   : > { %v6574_v35 = vadd.f32 %v6573_v61, %v6572_v43  ;;  %v6679_v30 = vpop.f32.mrb[245].mxu0  ;;  %v6575_v24 = vpop.f32.mrb[218].mxu1 }
 0x470   : > { %v6680_v25 = vadd.f32 %v6679_v30, %v6678_v11  ;;  %v6681_v10 = vpop.f32.mrb[246].mxu0  ;;  %v6576_v39 = vpop.f32.mrb[219].mxu1 }
 0x471   : > { %v4738_v52 = vadd.f32 %v6574_v35, %v9160_v62  ;;  %v6577_v46 = vadd.f32 %v6576_v39, %v6575_v24  ;;  %v6682_v57 = vpop.f32.mrb[247].mxu0 }
 0x472   : > { %v6683_v56 = vadd.f32 %v6682_v57, %v6681_v10  ;;  %v9234_v36 = vadd.f32 %v6680_v25, %v4730_v13 }
 0x473   : > { %v4741_v50 = vadd.f32 %v6577_v46, %v9162_v23 }
 0x474   : > { %v9237_v44 = vadd.f32 %v6683_v56, %v4733_v59 }
 0x475   : > { %v6578_v63 = vpop.f32.mrb[220].mxu1 }
 0x476   : > { %v6684_v6 = vpop.f32.mrb[248].mxu0  ;;  %v6579_v17 = vpop.f32.mrb[221].mxu1 }
 0x477   : > { %v6580_v16 = vadd.f32 %v6579_v17, %v6578_v63  ;;  %v6685_v53 = vpop.f32.mrb[249].mxu0  ;;  %v6581_v0 = vpop.f32.mrb[222].mxu1 }
 0x478   : > { %v6686_v31 = vadd.f32 %v6685_v53, %v6684_v6  ;;  %v6687_v43 = vpop.f32.mrb[250].mxu0  ;;  %v6582_v11 = vpop.f32.mrb[223].mxu1 }
 0x479   : > { %v4746_v62 = vadd.f32 %v6580_v16, %v9164_v1  ;;  %v6583_v61 = vadd.f32 %v6582_v11, %v6581_v0  ;;  %v6688_v35 = vpop.f32.mrb[251].mxu0 }
 0x47a   : > { %v6689_v30 = vadd.f32 %v6688_v35, %v6687_v43  ;;  %v9240_v13 = vadd.f32 %v6686_v31, %v4738_v52 }
 0x47b   : > { %v4749_v23 = vadd.f32 %v6583_v61, %v9166_v2 }
 0x47c   : > { %v9243_v59 = vadd.f32 %v6689_v30, %v4741_v50 }
 0x47d   : > { %v6584_v24 = vpop.f32.mrb[224].mxu1 }
 0x47e   : > { %v6690_v25 = vpop.f32.mrb[252].mxu0  ;;  %v6585_v10 = vpop.f32.mrb[225].mxu1 }
 0x47f   : > { %v6586_v39 = vadd.f32 %v6585_v10, %v6584_v24  ;;  %v6691_v46 = vpop.f32.mrb[253].mxu0  ;;  %v6587_v57 = vpop.f32.mrb[226].mxu1 }
 0x480   : > { %v6692_v56 = vadd.f32 %v6691_v46, %v6690_v25  ;;  %v6693_v63 = vpop.f32.mrb[254].mxu0  ;;  %v6588_v6 = vpop.f32.mrb[227].mxu1 }
 0x481   : > { %v4754_v1 = vadd.f32 %v6586_v39, %v9168_v20  ;;  %v6589_v17 = vadd.f32 %v6588_v6, %v6587_v57  ;;  %v6694_v16 = vpop.f32.mrb[255].mxu0 }
 0x482   : > { %v6695_v53 = vadd.f32 %v6694_v16, %v6693_v63  ;;  %v9246_v52 = vadd.f32 %v6692_v56, %v4746_v62 }
 0x483   : > { %v4757_v2 = vadd.f32 %v6589_v17, %v9170_v12 }
 0x484   : > { %v9249_v50 = vadd.f32 %v6695_v53, %v4749_v23 }
 0x485   : > { %v6590_v0 = vpop.f32.mrb[228].mxu1 }
 0x486   : > { %v6696_v31 = vpop.f32.mrb[0].mxu0  ;;  %v6591_v43 = vpop.f32.mrb[229].mxu1 }
 0x487   : > { %v6592_v11 = vadd.f32 %v6591_v43, %v6590_v0  ;;  %v6697_v61 = vpop.f32.mrb[1].mxu0  ;;  %v6593_v35 = vpop.f32.mrb[230].mxu1 }
 0x488   : > { %v6698_v30 = vadd.f32 %v6697_v61, %v6696_v31  ;;  %v6699_v24 = vpop.f32.mrb[2].mxu0  ;;  %v6594_v25 = vpop.f32.mrb[231].mxu1 }
 0x489   : > { %v4762_v20 = vadd.f32 %v6592_v11, %v9172_v32  ;;  %v6595_v10 = vadd.f32 %v6594_v25, %v6593_v35  ;;  %v6700_v39 = vpop.f32.mrb[3].mxu0 }
 0x48a   : > { %v6701_v46 = vadd.f32 %v6700_v39, %v6699_v24  ;;  %v9252_v62 = vadd.f32 %v6698_v30, %v4754_v1 }
 0x48b   : > { %v4765_v12 = vadd.f32 %v6595_v10, %v9174_v41 }
 0x48c   : > { %v9255_v23 = vadd.f32 %v6701_v46, %v4757_v2 }
 0x48d   : > { %v6596_v57 = vpop.f32.mrb[232].mxu1 }
 0x48e   : > { %v6702_v56 = vpop.f32.mrb[4].mxu0  ;;  %v6597_v63 = vpop.f32.mrb[233].mxu1 }
 0x48f   : > { %v6598_v6 = vadd.f32 %v6597_v63, %v6596_v57  ;;  %v6703_v17 = vpop.f32.mrb[5].mxu0  ;;  %v6599_v16 = vpop.f32.mrb[234].mxu1 }
 0x490   : > { %v6704_v53 = vadd.f32 %v6703_v17, %v6702_v56  ;;  %v6705_v0 = vpop.f32.mrb[6].mxu0  ;;  %v6600_v31 = vpop.f32.mrb[235].mxu1 }
 0x491   : > { %v4770_v32 = vadd.f32 %v6598_v6, %v9176_v18  ;;  %v6601_v43 = vadd.f32 %v6600_v31, %v6599_v16  ;;  %v6706_v11 = vpop.f32.mrb[7].mxu0 }
 0x492   : > { %v6707_v61 = vadd.f32 %v6706_v11, %v6705_v0  ;;  %v9258_v1 = vadd.f32 %v6704_v53, %v4762_v20 }
 0x493   : > { %v4773_v41 = vadd.f32 %v6601_v43, %v9179_v26 }
 0x494   : > { %v9261_v2 = vadd.f32 %v6707_v61, %v4765_v12 }
 0x495   : > { %v6602_v35 = vpop.f32.mrb[236].mxu1 }
 0x496   : > { %v6708_v30 = vpop.f32.mrb[8].mxu0  ;;  %v6603_v24 = vpop.f32.mrb[237].mxu1 }
 0x497   : > { %v6604_v25 = vadd.f32 %v6603_v24, %v6602_v35  ;;  %v6709_v10 = vpop.f32.mrb[9].mxu0  ;;  %v6605_v39 = vpop.f32.mrb[238].mxu1 }
 0x498   : > { %v6710_v46 = vadd.f32 %v6709_v10, %v6708_v30  ;;  %v6711_v57 = vpop.f32.mrb[10].mxu0  ;;  %v6606_v56 = vpop.f32.mrb[239].mxu1 }
 0x499   : > { %v4778_v18 = vadd.f32 %v6604_v25, %v9181_v45  ;;  %v6607_v63 = vadd.f32 %v6606_v56, %v6605_v39  ;;  %v6712_v6 = vpop.f32.mrb[11].mxu0 }
 0x49a   : > { %v6713_v17 = vadd.f32 %v6712_v6, %v6711_v57  ;;  %v9264_v20 = vadd.f32 %v6710_v46, %v4770_v32 }
 0x49b   : > { %v4781_v26 = vadd.f32 %v6607_v63, %v9183_v49 }
 0x49c   : > { %v9267_v12 = vadd.f32 %v6713_v17, %v4773_v41 }
 0x49d   : > { %v6608_v16 = vpop.f32.mrb[240].mxu1 }
 0x49e   : > { %v6714_v53 = vpop.f32.mrb[12].mxu0  ;;  %v6609_v0 = vpop.f32.mrb[241].mxu1 }
 0x49f   : > { %v6610_v31 = vadd.f32 %v6609_v0, %v6608_v16  ;;  %v6715_v43 = vpop.f32.mrb[13].mxu0  ;;  %v6611_v11 = vpop.f32.mrb[242].mxu1 }
 0x4a0   : > { %v6716_v61 = vadd.f32 %v6715_v43, %v6714_v53  ;;  %v6717_v35 = vpop.f32.mrb[14].mxu0  ;;  %v6612_v30 = vpop.f32.mrb[243].mxu1 }
 0x4a1   : > { %v4786_v45 = vadd.f32 %v6610_v31, %v9185_v47  ;;  %v6613_v24 = vadd.f32 %v6612_v30, %v6611_v11  ;;  %v6718_v25 = vpop.f32.mrb[15].mxu0 }
 0x4a2   : > { %v6719_v10 = vadd.f32 %v6718_v25, %v6717_v35  ;;  %v9270_v32 = vadd.f32 %v6716_v61, %v4778_v18 }
 0x4a3   : > { %v4789_v49 = vadd.f32 %v6613_v24, %v9187_v15 }
 0x4a4   : > { %v9273_v41 = vadd.f32 %v6719_v10, %v4781_v26 }
 0x4a5   : > { %v6614_v39 = vpop.f32.mrb[244].mxu1 }
 0x4a6   : > { %v6720_v46 = vpop.f32.mrb[16].mxu0  ;;  %v6615_v57 = vpop.f32.mrb[245].mxu1 }
 0x4a7   : > { %v6616_v56 = vadd.f32 %v6615_v57, %v6614_v39  ;;  %v6721_v63 = vpop.f32.mrb[17].mxu0  ;;  %v6617_v6 = vpop.f32.mrb[246].mxu1 }
 0x4a8   : > { %v6722_v17 = vadd.f32 %v6721_v63, %v6720_v46  ;;  %v6723_v16 = vpop.f32.mrb[18].mxu0  ;;  %v6618_v53 = vpop.f32.mrb[247].mxu1 }
 0x4a9   : > { %v4794_v47 = vadd.f32 %v6616_v56, %v9189_v19  ;;  %v6619_v0 = vadd.f32 %v6618_v53, %v6617_v6  ;;  %v6724_v31 = vpop.f32.mrb[19].mxu0 }
 0x4aa   : > { %v6725_v43 = vadd.f32 %v6724_v31, %v6723_v16  ;;  %v9276_v18 = vadd.f32 %v6722_v17, %v4786_v45 }
 0x4ab   : > { %v4797_v15 = vadd.f32 %v6619_v0, %v9191_v55 }
 0x4ac   : > { %v9279_v26 = vadd.f32 %v6725_v43, %v4789_v49 }
 0x4ad   : > { %v6620_v11 = vpop.f32.mrb[248].mxu1 }
 0x4ae   : > { %v6726_v61 = vpop.f32.mrb[20].mxu0  ;;  %v6621_v35 = vpop.f32.mrb[249].mxu1 }
 0x4af   : > { %v6622_v30 = vadd.f32 %v6621_v35, %v6620_v11  ;;  %v6727_v24 = vpop.f32.mrb[21].mxu0  ;;  %v6623_v25 = vpop.f32.mrb[250].mxu1 }
 0x4b0   : > { %v6728_v10 = vadd.f32 %v6727_v24, %v6726_v61  ;;  %v6729_v39 = vpop.f32.mrb[22].mxu0  ;;  %v6624_v46 = vpop.f32.mrb[251].mxu1 }
 0x4b1   : > { %v4802_v19 = vadd.f32 %v6622_v30, %v9193_v40  ;;  %v6625_v57 = vadd.f32 %v6624_v46, %v6623_v25  ;;  %v6730_v56 = vpop.f32.mrb[23].mxu0 }
 0x4b2   : > { %v6731_v63 = vadd.f32 %v6730_v56, %v6729_v39  ;;  %v9282_v45 = vadd.f32 %v6728_v10, %v4794_v47  ;;  %v9296_v10 = vld [vmem:[%s9518_s5] ss:$0 sm:$0xff] }
 0x4b3   : > { %v4805_v55 = vadd.f32 %v6625_v57, %v9195_v21 }
 0x4b4   : > { %v9285_v49 = vadd.f32 %v6731_v63, %v4797_v15 }
 0x4b5   : > { %v6626_v6 = vpop.f32.mrb[252].mxu1 }
 0x4b6   : > { %v6732_v17 = vpop.f32.mrb[24].mxu0  ;;  %v6627_v16 = vpop.f32.mrb[253].mxu1 }
 0x4b7   : > { %v6628_v53 = vadd.f32 %v6627_v16, %v6626_v6  ;;  %v6733_v0 = vpop.f32.mrb[25].mxu0  ;;  %v6629_v31 = vpop.f32.mrb[254].mxu1 }
 0x4b8   : > { %v6734_v43 = vadd.f32 %v6733_v0, %v6732_v17  ;;  %v6735_v11 = vpop.f32.mrb[26].mxu0  ;;  %v6630_v61 = vpop.f32.mrb[255].mxu1 }
 0x4b9   : > { %v4810_v40 = vadd.f32 %v6628_v53, %v9198_v51  ;;  %v6631_v35 = vadd.f32 %v6630_v61, %v6629_v31  ;;  %v6736_v30 = vpop.f32.mrb[27].mxu0 }
 0x4ba   : > { %v6737_v24 = vadd.f32 %v6736_v30, %v6735_v11  ;;  %v9288_v47 = vadd.f32 %v6734_v43, %v4802_v19 }
 0x4bb   : > { %v4813_v21 = vadd.f32 %v6631_v35, %v9201_v27 }
 0x4bc   : > { %v9291_v15 = vadd.f32 %v6737_v24, %v4805_v55 }
 0x4bd   : > { %v6834_v25 = vpop.f32.mrb[0].mxu1 }
 0x4be   : > { %v6738_v39 = vpop.f32.mrb[28].mxu0  ;;  %v5020_v46 = vadd.f32 %v6834_v25, %v9210_v34  ;;  %v5011_v57 = vpop.f32.mrb[1].mxu1 }
 0x4bf   : > { %v6739_v51 = vpop.f32.mrb[29].mxu0  ;;  %v5012_v56 = vadd.f32 %v5011_v57, %v9204_v42  ;;  %v6835_v63 = vpop.f32.mrb[2].mxu1 }
 0x4c0   : > { %v5147_v19 = vadd.f32 %v9296_v10, %v5020_v46  ;;  %v6740_v6 = vadd.f32 %v6739_v51, %v6738_v39  ;;  %v6741_v27 = vpop.f32.mrb[30].mxu0  ;;  %v5023_v55 = vadd.f32 %v6835_v63, %v9213_v14  ;;  %v5014_v17 = vpop.f32.mrb[3].mxu1  ;;  %v7254_v51 = vld [vmem:[%s7536_s13 + $0x10] sm:$0xff] }
 0x4c1   : > { %v5145_v16 = vadd.f32 %v9296_v10, %v5012_v56  ;;  %v6742_v53 = vpop.f32.mrb[31].mxu0  ;;  %v5015_v0 = vadd.f32 %v5014_v17, %v9207_v5 }
 0x4c2   : > { %7190 = vtanh.f32 %v5147_v19  ;;  %v5148_v34 = vadd.f32 %v9296_v10, %v5023_v55  ;;  %v6743_v31 = vadd.f32 %v6742_v53, %v6741_v27  ;;  %v9305_v43 = vadd.f32 %v6740_v6, %v4810_v40  ;;  %v7255_v19 = vld [vmem:[%s7536_s13] sm:$0xff] }
 0x4c3   : > { %7192 = vtanh.f32 %v5145_v16  ;;  %v5146_v42 = vadd.f32 %v9296_v10, %v5015_v0  ;;  %v7256_v16 = vld [vmem:[%s7536_s13 + $0x18] sm:$0xff] }
 0x4c4   : > { %7194 = vtanh.f32 %v5148_v34  ;;  %v9308_v11 = vadd.f32 %v6743_v31, %v4813_v21 }
 0x4c5   : > { %7196 = vtanh.f32 %v5146_v42  ;;  %v6838_v14 = vpop.f32.mrb[4].mxu1  ;;  %v7257_v42 = vld [vmem:[%s7536_s13 + $0x8] sm:$0xff] }
 0x4c6   : > { %v5036_v61 = vadd.f32 %v6838_v14, %v9222_v7  ;;  %v5027_v35 = vpop.f32.mrb[5].mxu1 }
 0x4c7   : > { %v5028_v5 = vadd.f32 %v5027_v35, %v9216_v58  ;;  %v6839_v30 = vpop.f32.mrb[6].mxu1 }
 0x4c8   : > { %v5151_v24 = vadd.f32 %v9296_v10, %v5036_v61  ;;  %v5039_v40 = vadd.f32 %v6839_v30, %v9225_v33  ;;  %v5030_v25 = vpop.f32.mrb[7].mxu1 }
 0x4c9   : > { %v5149_v39 = vadd.f32 %v9296_v10, %v5028_v5  ;;  %v5031_v21 = vadd.f32 %v5030_v25, %v9219_v48 }
 0x4ca   : > { %7198 = vtanh.f32 %v5151_v24  ;;  %v5152_v46 = vadd.f32 %v9296_v10, %v5039_v40 }
 0x4cb   : > { %7200 = vtanh.f32 %v5149_v39  ;;  %v5150_v7 = vadd.f32 %v9296_v10, %v5031_v21 }
 0x4cc   : > { %v7191_v57 = vpop.eup %7190  ;;  %7202 = vtanh.f32 %v5152_v46 }
 0x4cd   : > { %v7193_v58 = vpop.eup %7192  ;;  %v5211_v56 = vsub.f32 %v7191_v57, %v7254_v51  ;;  %7204 = vtanh.f32 %v5150_v7  ;;  %v6842_v33 = vpop.f32.mrb[8].mxu1  ;;  %v7259_v57 = vld [vmem:[%s7536_s13 + $0x20] sm:$0xff] }
 0x4ce   : > { %v7195_v63 = vpop.eup %7194  ;;  %v5209_v6 = vsub.f32 %v7193_v58, %v7255_v19  ;;  %v5052_v48 = vadd.f32 %v6842_v33, %v9234_v36  ;;  %v5043_v27 = vpop.f32.mrb[9].mxu1 }
 0x4cf   : > { %v7197_v55 = vpop.eup %7196  ;;  %v5243_v17 = vmul.f32 %v8453_v4, %v5211_v56  ;;  %v5212_v53 = vsub.f32 %v7195_v63, %v7256_v16  ;;  %v5044_v0 = vadd.f32 %v5043_v27, %v9228_v60  ;;  %v6843_v34 = vpop.f32.mrb[10].mxu1 }
 0x4d0   : > { %v5241_v31 = vmul.f32 %v8460_v38, %v5209_v6  ;;  %v5210_v14 = vsub.f32 %v7197_v55, %v7257_v42  ;;  %v5155_v61 = vadd.f32 %v9296_v10, %v5052_v48  ;;  %v5055_v35 = vadd.f32 %v6843_v34, %v9237_v44  ;;  %v5046_v36 = vpop.f32.mrb[11].mxu1 }
 0x4d1   : > { %v5275_v5 = vadd.f32 %v7254_v51, %v5243_v17  ;;  %v5244_v30 = vmul.f32 %v8464_v37, %v5212_v53  ;;  %v5153_v4 = vadd.f32 %v9296_v10, %v5044_v0  ;;  %v5047_v60 = vadd.f32 %v5046_v36, %v9231_v28  ;;  %v7258_v28 = vld [vmem:[%s7536_s13 + $0x30] sm:$0xff]  ;;  %v7261_v17 = vld [vmem:[%s7536_s13 + $0x28] sm:$0xff] }
 0x4d2   : > { %v5273_v24 = vadd.f32 %v7255_v19, %v5241_v31  ;;  %v5242_v38 = vmul.f32 %v8468_v54, %v5210_v14  ;;  %7206 = vtanh.f32 %v5155_v61  ;;  %v5156_v40 = vadd.f32 %v9296_v10, %v5055_v35  ;;  %v7260_v19 = vld [vmem:[%s7536_s13 + $0x38] sm:$0xff] }
 0x4d3   : > { %5307 = vst [vmem:[%s7549_s14 + $0x10] sm:$0xff] %v5275_v5  ;;  %v5276_v44 = vadd.f32 %v7256_v16, %v5244_v30  ;;  %7208 = vtanh.f32 %v5153_v4  ;;  %v5154_v25 = vadd.f32 %v9296_v10, %v5047_v60  ;;  %v7263_v4 = vld [vmem:[%s7536_s13 + $0x40] sm:$0xff] }
 0x4d4   : > { %v7199_v37 = vpop.eup %7198  ;;  %5305 = vst [vmem:[%s7549_s14] sm:$0xff] %v5273_v24  ;;  %v5274_v39 = vadd.f32 %v7257_v42, %v5242_v38  ;;  %7210 = vtanh.f32 %v5156_v40 }
 0x4d5   : > { %v7201_v21 = vpop.eup %7200  ;;  %5308 = vst [vmem:[%s7549_s14 + $0x18] sm:$0xff] %v5276_v44  ;;  %v5215_v46 = vsub.f32 %v7199_v37, %v7258_v28  ;;  %7212 = vtanh.f32 %v5154_v25  ;;  %v6846_v54 = vpop.f32.mrb[12].mxu1  ;;  %v7264_v25 = vld [vmem:[%s7536_s13 + $0x58] sm:$0xff] }
 0x4d6   : > { %v7203_v7 = vpop.eup %7202  ;;  %5306 = vst [vmem:[%s7549_s14 + $0x8] sm:$0xff] %v5274_v39  ;;  %v5213_v58 = vsub.f32 %v7201_v21, %v7259_v57  ;;  %v5068_v51 = vadd.f32 %v6846_v54, %v9246_v52  ;;  %v5059_v56 = vpop.f32.mrb[13].mxu1  ;;  %v7265_v54 = vld [vmem:[%s7536_s13 + $0x48] sm:$0xff] }
 0x4d7   : > { %v7205_v33 = vpop.eup %7204  ;;  %v5247_v63 = vmul.f32 %v8498_v3, %v5215_v46  ;;  %v5216_v6 = vsub.f32 %v7203_v7, %v7260_v19  ;;  %v5060_v48 = vadd.f32 %v5059_v56, %v9240_v13  ;;  %v6847_v27 = vpop.f32.mrb[14].mxu1  ;;  %v9573_v56 = vld [vmem:[#allocation11_spill] sm:$0xff] }
 0x4d8   : > { %v5245_v55 = vmul.f32 %v8502_v8, %v5213_v58  ;;  %v5214_v16 = vsub.f32 %v7205_v33, %v7261_v17  ;;  %v5159_v53 = vadd.f32 %v9296_v10, %v5068_v51  ;;  %v5071_v0 = vadd.f32 %v6847_v27, %v9249_v50  ;;  %v5062_v52 = vpop.f32.mrb[15].mxu1 }
 0x4d9   : > { %v5279_v34 = vadd.f32 %v7258_v28, %v5247_v63  ;;  %v5248_v31 = vmul.f32 %v8507_v22, %v5216_v6  ;;  %v5157_v3 = vadd.f32 %v9296_v10, %v5060_v48  ;;  %v5063_v13 = vadd.f32 %v5062_v52, %v9243_v59  ;;  %v7262_v59 = vld [vmem:[%s7536_s13 + $0x50] sm:$0xff]  ;;  %v9572_v28 = vld [vmem:[#allocation10_spill] sm:$0xff] }
 0x4da   : > { %v5277_v42 = vadd.f32 %v7259_v57, %v5245_v55  ;;  %v5246_v8 = vmul.f32 %v8511_v29, %v5214_v16  ;;  %7214 = vtanh.f32 %v5159_v53  ;;  %v5160_v14 = vadd.f32 %v9296_v10, %v5071_v0 }
 0x4db   : > { %5311 = vst [vmem:[%s7549_s14 + $0x30] sm:$0xff] %v5279_v34  ;;  %v5280_v50 = vadd.f32 %v7260_v19, %v5248_v31  ;;  %7216 = vtanh.f32 %v5157_v3  ;;  %v5158_v61 = vadd.f32 %v9296_v10, %v5063_v13  ;;  %v9574_v19 = vld [vmem:[#allocation12_spill] sm:$0xff]  ;;  %v7267_v34 = vld [vmem:[%s7536_s13 + $0x60] sm:$0xff] }
 0x4dc   : > { %v7207_v22 = vpop.eup %7206  ;;  %5309 = vst [vmem:[%s7549_s14 + $0x20] sm:$0xff] %v5277_v42  ;;  %v5278_v35 = vadd.f32 %v7261_v17, %v5246_v8  ;;  %7218 = vtanh.f32 %v5160_v14  ;;  %v9575_v8 = vld [vmem:[#allocation13_spill] sm:$0xff] }
 0x4dd   : > { %v7209_v36 = vpop.eup %7208  ;;  %5312 = vst [vmem:[%s7549_s14 + $0x38] sm:$0xff] %v5280_v50  ;;  %v5219_v5 = vsub.f32 %v7207_v22, %v7262_v59  ;;  %7220 = vtanh.f32 %v5158_v61  ;;  %v6850_v29 = vpop.f32.mrb[16].mxu1  ;;  %v7268_v50 = vld [vmem:[%s7536_s13 + $0x78] sm:$0xff] }
 0x4de   : > { %v7211_v30 = vpop.eup %7210  ;;  %5310 = vst [vmem:[%s7549_s14 + $0x28] sm:$0xff] %v5278_v35  ;;  %v5217_v60 = vsub.f32 %v7209_v36, %v7263_v4  ;;  %v5084_v24 = vadd.f32 %v6850_v29, %v9258_v1  ;;  %v5075_v38 = vpop.f32.mrb[17].mxu1  ;;  %v9576_v36 = vld [vmem:[#allocation14_spill] sm:$0xff] }
 0x4df   : > { %v7213_v40 = vpop.eup %7212  ;;  %v5251_v44 = vmul.f32 %v8542_v9, %v5219_v5  ;;  %v5220_v37 = vsub.f32 %v7211_v30, %v7264_v25  ;;  %v5076_v39 = vadd.f32 %v5075_v38, %v9252_v62  ;;  %v6851_v21 = vpop.f32.mrb[18].mxu1  ;;  %v7269_v5 = vld [vmem:[%s7536_s13 + $0x68] sm:$0xff] }
 0x4e0   : > { %v5249_v46 = vmul.f32 %v9572_v28, %v5217_v60  ;;  %v5218_v7 = vsub.f32 %v7213_v40, %v7265_v54  ;;  %v5163_v57 = vadd.f32 %v9296_v10, %v5084_v24  ;;  %v5087_v58 = vadd.f32 %v6851_v21, %v9261_v2  ;;  %v5078_v1 = vpop.f32.mrb[19].mxu1  ;;  %v9577_v24 = vld [vmem:[#allocation15_spill] sm:$0xff] }
 0x4e1   : > { %v5283_v51 = vadd.f32 %v7262_v59, %v5251_v44  ;;  %v5252_v33 = vmul.f32 %v9573_v56, %v5220_v37  ;;  %v5161_v9 = vadd.f32 %v9296_v10, %v5076_v39  ;;  %v5079_v62 = vadd.f32 %v5078_v1, %v9255_v23  ;;  %v7266_v23 = vld [vmem:[%s7536_s13 + $0x70] sm:$0xff]  ;;  %v7271_v1 = vld [vmem:[%s7536_s13 + $0x80] sm:$0xff] }
 0x4e2   : > { %v5281_v63 = vadd.f32 %v7263_v4, %v5249_v46  ;;  %v5250_v6 = vmul.f32 %v9574_v19, %v5218_v7  ;;  %7222 = vtanh.f32 %v5163_v57  ;;  %v5164_v48 = vadd.f32 %v9296_v10, %v5087_v58  ;;  %v7272_v19 = vld [vmem:[%s7536_s13 + $0x98] sm:$0xff] }
 0x4e3   : > { %5315 = vst [vmem:[%s7549_s14 + $0x50] sm:$0xff] %v5283_v51  ;;  %v5284_v2 = vadd.f32 %v7264_v25, %v5252_v33  ;;  %7224 = vtanh.f32 %v5161_v9  ;;  %v5162_v27 = vadd.f32 %v9296_v10, %v5079_v62  ;;  %v9578_v25 = vld [vmem:[#allocation16_spill] sm:$0xff]  ;;  %v9579_v62 = vld [vmem:[#allocation17_spill] sm:$0xff] }
 0x4e4   : > { %v7215_v55 = vpop.eup %7214  ;;  %5313 = vst [vmem:[%s7549_s14 + $0x40] sm:$0xff] %v5281_v63  ;;  %v5282_v17 = vadd.f32 %v7265_v54, %v5250_v6  ;;  %7226 = vtanh.f32 %v5164_v48 }
 0x4e5   : > { %v7217_v16 = vpop.eup %7216  ;;  %5316 = vst [vmem:[%s7549_s14 + $0x58] sm:$0xff] %v5284_v2  ;;  %v5223_v53 = vsub.f32 %v7215_v55, %v7266_v23  ;;  %7228 = vtanh.f32 %v5162_v27  ;;  %v6854_v0 = vpop.f32.mrb[20].mxu1  ;;  %v9580_v27 = vld [vmem:[#allocation18_spill] sm:$0xff] }
 0x4e6   : > { %v7219_v52 = vpop.eup %7218  ;;  %5314 = vst [vmem:[%s7549_s14 + $0x48] sm:$0xff] %v5282_v17  ;;  %v5221_v31 = vsub.f32 %v7217_v16, %v7267_v34  ;;  %v5100_v3 = vadd.f32 %v6854_v0, %v9270_v32  ;;  %v5091_v13 = vpop.f32.mrb[21].mxu1  ;;  %v7273_v17 = vld [vmem:[%s7536_s13 + $0x88] sm:$0xff] }
 0x4e7   : > { %v7221_v42 = vpop.eup %7220  ;;  %v5255_v14 = vmul.f32 %v9575_v8, %v5223_v53  ;;  %v5224_v61 = vsub.f32 %v7219_v52, %v7268_v50  ;;  %v5092_v22 = vadd.f32 %v5091_v13, %v9264_v20  ;;  %v6855_v35 = vpop.f32.mrb[22].mxu1  ;;  %v9581_v52 = vld [vmem:[#allocation19_spill] sm:$0xff]  ;;  %v9582_v13 = vld [vmem:[#allocation20_spill] sm:$0xff] }
 0x4e8   : > { %v5253_v59 = vmul.f32 %v9576_v36, %v5221_v31  ;;  %v5222_v29 = vsub.f32 %v7221_v42, %v7269_v5  ;;  %v5167_v30 = vadd.f32 %v9296_v10, %v5100_v3  ;;  %v5103_v4 = vadd.f32 %v6855_v35, %v9273_v41  ;;  %v5094_v32 = vpop.f32.mrb[23].mxu1 }
 0x4e9   : > { %v5287_v60 = vadd.f32 %v7266_v23, %v5255_v14  ;;  %v5256_v38 = vmul.f32 %v9577_v24, %v5224_v61  ;;  %v5165_v40 = vadd.f32 %v9296_v10, %v5092_v22  ;;  %v5095_v20 = vadd.f32 %v5094_v32, %v9267_v12  ;;  %v7270_v12 = vld [vmem:[%s7536_s13 + $0x90] sm:$0xff] }
 0x4ea   : > { %v5285_v44 = vadd.f32 %v7267_v34, %v5253_v59  ;;  %v5254_v37 = vmul.f32 %v9578_v25, %v5222_v29  ;;  %7230 = vtanh.f32 %v5167_v30  ;;  %v5168_v39 = vadd.f32 %v9296_v10, %v5103_v4  ;;  %v9584_v25 = vld [vmem:[#allocation22_spill] sm:$0xff] }
 0x4eb   : > { %5319 = vst [vmem:[%s7549_s14 + $0x70] sm:$0xff] %v5287_v60  ;;  %v5288_v41 = vadd.f32 %v7268_v50, %v5256_v38  ;;  %7232 = vtanh.f32 %v5165_v40  ;;  %v5166_v21 = vadd.f32 %v9296_v10, %v5095_v20  ;;  %v9583_v60 = vld [vmem:[#allocation21_spill] sm:$0xff] }
 0x4ec   : > { %v7223_v28 = vpop.eup %7222  ;;  %5317 = vst [vmem:[%s7549_s14 + $0x60] sm:$0xff] %v5285_v44  ;;  %v5286_v46 = vadd.f32 %v7269_v5, %v5254_v37  ;;  %7234 = vtanh.f32 %v5168_v39  ;;  %v7275_v5 = vld [vmem:[%s7536_s13 + $0xa0] sm:$0xff]  ;;  %v7276_v38 = vld [vmem:[%s7536_s13 + $0xb8] sm:$0xff]  ;;  %v7277_v39 = vld [vmem:[%s7536_s13 + $0xa8] sm:$0xff] }
 0x4ed   : > { %v7225_v54 = vpop.eup %7224  ;;  %5320 = vst [vmem:[%s7549_s14 + $0x78] sm:$0xff] %v5288_v41  ;;  %v5227_v7 = vsub.f32 %v7223_v28, %v7270_v12  ;;  %7236 = vtanh.f32 %v5166_v21  ;;  %v6858_v57 = vpop.f32.mrb[24].mxu1 }
 0x4ee   : > { %v7227_v58 = vpop.eup %7226  ;;  %5318 = vst [vmem:[%s7549_s14 + $0x68] sm:$0xff] %v5286_v46  ;;  %v5225_v51 = vsub.f32 %v7225_v54, %v7271_v1  ;;  %v5116_v56 = vadd.f32 %v6858_v57, %v9282_v45  ;;  %v5107_v33 = vpop.f32.mrb[25].mxu1  ;;  %v9585_v54 = vld [vmem:[#allocation23_spill] sm:$0xff] }
 0x4ef   : > { %v7229_v9 = vpop.eup %7228  ;;  %v5259_v63 = vmul.f32 %v9579_v62, %v5227_v7  ;;  %v5228_v6 = vsub.f32 %v7227_v58, %v7272_v19  ;;  %v5108_v48 = vadd.f32 %v5107_v33, %v9276_v18  ;;  %v6859_v2 = vpop.f32.mrb[26].mxu1  ;;  %v9586_v58 = vld [vmem:[#allocation24_spill] sm:$0xff] }
 0x4f0   : > { %v5257_v55 = vmul.f32 %v9580_v27, %v5225_v51  ;;  %v5226_v16 = vsub.f32 %v7229_v9, %v7273_v17  ;;  %v5171_v23 = vadd.f32 %v9296_v10, %v5116_v56  ;;  %v5119_v53 = vadd.f32 %v6859_v2, %v9285_v49  ;;  %v5110_v45 = vpop.f32.mrb[27].mxu1  ;;  %v7278_v62 = vld [vmem:[%s7536_s13 + $0xd0] sm:$0xff]  ;;  %v9587_v27 = vld [vmem:[#allocation27_spill] sm:$0xff] }
 0x4f1   : > { %v5291_v0 = vadd.f32 %v7270_v12, %v5259_v63  ;;  %v5260_v34 = vmul.f32 %v9581_v52, %v5228_v6  ;;  %v5169_v31 = vadd.f32 %v9296_v10, %v5108_v48  ;;  %v5111_v18 = vadd.f32 %v5110_v45, %v9279_v26  ;;  %v7274_v26 = vld [vmem:[%s7536_s13 + $0xb0] sm:$0xff]  ;;  %v7279_v6 = vld [vmem:[%s7536_s13 + $0xc0] sm:$0xff] }
 0x4f2   : > { %v5289_v3 = vadd.f32 %v7271_v1, %v5257_v55  ;;  %v5258_v42 = vmul.f32 %v9582_v13, %v5226_v16  ;;  %7238 = vtanh.f32 %v5171_v23  ;;  %v5172_v8 = vadd.f32 %v9296_v10, %v5119_v53  ;;  %v7280_v55 = vld [vmem:[%s7536_s13 + $0xd8] sm:$0xff]  ;;  %v7281_v53 = vld [vmem:[%s7536_s13 + $0xc8] sm:$0xff]  ;;  %v9589_v52 = vld [vmem:[#allocation28_spill] sm:$0xff] }
 0x4f3   : > { %5323 = vst [vmem:[%s7549_s14 + $0x90] sm:$0xff] %v5291_v0  ;;  %v5292_v49 = vadd.f32 %v7272_v19, %v5260_v34  ;;  %7240 = vtanh.f32 %v5169_v31  ;;  %v5170_v14 = vadd.f32 %v9296_v10, %v5111_v18  ;;  %v9588_v16 = vld [vmem:[#allocation25_spill] sm:$0xff]  ;;  %v9590_v18 = vld [vmem:[#allocation26_spill] sm:$0xff] }
 0x4f4   : > { %v7231_v50 = vpop.eup %7230  ;;  %5321 = vst [vmem:[%s7549_s14 + $0x80] sm:$0xff] %v5289_v3  ;;  %v5290_v61 = vadd.f32 %v7273_v17, %v5258_v42  ;;  %7242 = vtanh.f32 %v5172_v8 }
 0x4f5   : > { %v7233_v22 = vpop.eup %7232  ;;  %5324 = vst [vmem:[%s7549_s14 + $0x98] sm:$0xff] %v5292_v49  ;;  %v5231_v35 = vsub.f32 %v7231_v50, %v7274_v26  ;;  %7244 = vtanh.f32 %v5170_v14  ;;  %v6862_v36 = vpop.f32.mrb[28].mxu1  ;;  %v7282_v14 = vld [vmem:[%s7536_s13 + $0xf0] sm:$0xff] }
 0x4f6   : > { %v7235_v59 = vpop.eup %7234  ;;  %5322 = vst [vmem:[%s7549_s14 + $0x88] sm:$0xff] %v5290_v61  ;;  %v5229_v29 = vsub.f32 %v7233_v22, %v7275_v5  ;;  %v5132_v30 = vadd.f32 %v6862_v36, %v9305_v43  ;;  %v5123_v4 = vpop.f32.mrb[29].mxu1  ;;  %v7283_v22 = vld [vmem:[%s7536_s13 + $0xe0] sm:$0xff]  ;;  %v9591_v36 = vld [vmem:[#allocation31_spill] sm:$0xff] }
 0x4f7   : > { %v7237_v32 = vpop.eup %7236  ;;  %v5263_v24 = vmul.f32 %v9583_v60, %v5231_v35  ;;  %v5232_v40 = vsub.f32 %v7235_v59, %v7276_v38  ;;  %v5124_v20 = vadd.f32 %v5123_v4, %v9288_v47  ;;  %v6863_v44 = vpop.f32.mrb[30].mxu1 }
 0x4f8   : > { %v5261_v37 = vmul.f32 %v9584_v25, %v5229_v29  ;;  %v5230_v41 = vsub.f32 %v7237_v32, %v7277_v39  ;;  %v5175_v21 = vadd.f32 %v9296_v10, %v5132_v30  ;;  %v5135_v28 = vadd.f32 %v6863_v44, %v9308_v11  ;;  %v5126_v43 = vpop.f32.mrb[31].mxu1  ;;  %v9592_v30 = vld [vmem:[#allocation29_spill] sm:$0xff]  ;;  %v7285_v32 = vld [vmem:[%s7536_s13 + $0xe8] sm:$0xff]  ;;  %v9594_v44 = vld [vmem:[#allocation30_spill] sm:$0xff] }
 0x4f9   : > { %v5295_v46 = vadd.f32 %v7274_v26, %v5263_v24  ;;  %v5264_v12 = vmul.f32 %v9585_v54, %v5232_v40  ;;  %v5173_v7 = vadd.f32 %v9296_v10, %v5124_v20  ;;  %v5127_v47 = vadd.f32 %v5126_v43, %v9291_v15 }
 0x4fa   : > { %v5293_v57 = vadd.f32 %v7275_v5, %v5261_v37  ;;  %v5262_v1 = vmul.f32 %v9586_v58, %v5230_v41  ;;  %7246 = vtanh.f32 %v5175_v21  ;;  %v5176_v51 = vadd.f32 %v9296_v10, %v5135_v28  ;;  %v7284_v5 = vld [vmem:[%s7536_s13 + $0xf8] sm:$0xff]  ;;  %s7316_s13 = scalar_lea.vmem %s9466_s19, 4096 }
 0x4fb   : > { %5327 = vst [vmem:[%s7549_s14 + $0xb0] sm:$0xff] %v5295_v46  ;;  %v5296_v11 = vadd.f32 %v7276_v38, %v5264_v12  ;;  %7248 = vtanh.f32 %v5173_v7  ;;  %v5174_v56 = vadd.f32 %v9296_v10, %v5127_v47  ;;  %v9593_v38 = vld [vmem:[#allocation32_spill] sm:$0xff]  ;;  %p7317_p6 = scmp.ne.s32.totalorder %s9466_s19, %s7316_s13  ;;  %p7324_p2 = scmp.lt.s32.totalorder %s7322_s26, %s7316_s13 }
 0x4fc   : > { %v7239_v33 = vpop.eup %7238  ;;  %5325 = vst [vmem:[%s7549_s14 + $0xa0] sm:$0xff] %v5293_v57  ;;  %v5294_v9 = vadd.f32 %v7277_v39, %v5262_v1  ;;  %7250 = vtanh.f32 %v5176_v51 }
 0x4fd   : > { %v7241_v15 = vpop.eup %7240  ;;  %5328 = vst [vmem:[%s7549_s14 + $0xb8] sm:$0xff] %v5296_v11  ;;  %v5235_v63 = vsub.f32 %v7239_v33, %v7278_v62  ;;  %7252 = vtanh.f32 %v5174_v56  ;;  %p7318_p8 = pnand %p7317_p6, %p9595_p13  ;;  %p7325_p4 = por %p7324_p2, %p7323_p0 }
 0x4fe   : > { %v7243_v19 = vpop.eup %7242  ;;  %5326 = vst [vmem:[%s7549_s14 + $0xa8] sm:$0xff] %v5294_v9  ;;  %v5233_v48 = vsub.f32 %v7241_v15, %v7279_v6 }
 0x4ff   : > { %v7245_v2 = vpop.eup %7244  ;;  %v5267_v10 = vmul.f32 %v9587_v27, %v5235_v63  ;;  %v5236_v17 = vsub.f32 %v7243_v19, %v7280_v55  ;;  %p7319_p10 = pneg %p7318_p8 }
 0x500   : > { %v5265_v23 = vmul.f32 %v9588_v16, %v5233_v48  ;;  %v5234_v45 = vsub.f32 %v7245_v2, %v7281_v53 }
 0x501   : > { %v5299_v0 = vadd.f32 %v7278_v62, %v5267_v10  ;;  %v5268_v34 = vmul.f32 %v9589_v52, %v5236_v17  ;;  %p7326_p5 = pnand %p7325_p4, %p7319_p10 }
 0x502   : > { %v5297_v31 = vadd.f32 %v7279_v6, %v5265_v23  ;;  %v5266_v3 = vmul.f32 %v9590_v18, %v5234_v45 }
 0x503   : > { %5331 = vst [vmem:[%s7549_s14 + $0xd0] sm:$0xff] %v5299_v0  ;;  %v5300_v13 = vadd.f32 %v7280_v55, %v5268_v34 }
 0x504   : > { %v7247_v42 = vpop.eup %7246  ;;  %5329 = vst [vmem:[%s7549_s14 + $0xc0] sm:$0xff] %v5297_v31  ;;  %v5298_v8 = vadd.f32 %v7281_v53, %v5266_v3 }
 0x505   : > { %v7249_v49 = vpop.eup %7248  ;;  %5332 = vst [vmem:[%s7549_s14 + $0xd8] sm:$0xff] %v5300_v13  ;;  %v5239_v50 = vsub.f32 %v7247_v42, %v7282_v14 }
 0x506   : > { %v7251_v61 = vpop.eup %7250  ;;  %5330 = vst [vmem:[%s7549_s14 + $0xc8] sm:$0xff] %v5298_v8  ;;  %v5237_v26 = vsub.f32 %v7249_v49, %v7283_v22 }
 0x507   : > { %v7253_v35 = vpop.eup %7252  ;;  %v5271_v59 = vmul.f32 %v9591_v36, %v5239_v50  ;;  %v5240_v29 = vsub.f32 %v7251_v61, %v7284_v5 }
 0x508   : > { %v5269_v4 = vmul.f32 %v9592_v30, %v5237_v26  ;;  %v5238_v60 = vsub.f32 %v7253_v35, %v7285_v32 }
 0x509   : > { %v5303_v24 = vadd.f32 %v7282_v14, %v5271_v59  ;;  %v5272_v40 = vmul.f32 %v9593_v38, %v5240_v29 }
 0x50a   : > { %v5301_v20 = vadd.f32 %v7283_v22, %v5269_v4  ;;  %v5270_v25 = vmul.f32 %v9594_v44, %v5238_v60 }
 0x50b   : > { %5335 = vst [vmem:[%s7549_s14 + $0xf0] sm:$0xff] %v5303_v24  ;;  %v5304_v37 = vadd.f32 %v7284_v5, %v5272_v40 }
 0x50c   : > { %5333 = vst [vmem:[%s7549_s14 + $0xe0] sm:$0xff] %v5301_v20  ;;  %v5302_v39 = vadd.f32 %v7285_v32, %v5270_v25 }
 0x50d   : > { %5336 = vst [vmem:[%s7549_s14 + $0xf8] sm:$0xff] %v5304_v37 }
 0x50e   : > { %5334 = vst [vmem:[%s7549_s14 + $0xe8] sm:$0xff] %v5302_v39 }
 0x50f   : > { %7329 = shalt.err (!%p7326_p5)
}
 0x510   : > { %s7330_s14 = scalar_lea.hbm %s9464_s15, 4096  ;;  %s7334_s16 = scalar_lea.hbm %s9519_s6, 8192 }
 0x511   : > { %p7331_p7 = scmp.ne.s32.totalorder %s9464_s15, %s7330_s14  ;;  %p7335_p3 = scmp.lt.u32.totalorder %s9464_s15, %s9519_s6 }
 0x512   : > { %p7336_p11 = scmp.lt.u32.totalorder %s7334_s16, %s7330_s14  ;;  %p7338_p6 = scmp.lt.u32.totalorder %s7330_s14, %s9464_s15 }
 0x513   : > { %p7332_p9 = pnand %p7331_p7, %p9595_p13 }
 0x514   : > { %p7337_p12 = por %p7336_p11, %p7335_p3 }
 0x515   : > { %p7333_p1 = pneg %p7332_p9 }
 0x516   : > { %p7339_p8 = por %p7338_p6, %p7337_p12 }
 0x518   : > { %p7340_p10 = pnand %p7339_p8, %p7333_p1 }
 0x51a   : > { %7343 = shalt.err (!%p7340_p10)
}
 0x51b   : > { %s7391_s20 = smov 128   ;;  %s7392_s8 = smov 8  }
 0x51c   : > { %6867 = dma.vmem_to_hbm [thread:$0]  (%p9595_p13), %s9466_s19, 4096, %s9464_s15, %s5338_s25, %s7391_s20, %s7391_s20, %s7392_s8  }
 0x51d PF: > { %s5366_s13 = sand.u32 1, %s7370_s21   ;;  %p9596_p0 = scmp.ne.s32.totalorder %s9547_s10, 0 }
 0x51e   : > { %p9597_p2 = scmp.ge.s32.totalorder %s7382_s24, 2  ;;  %s5367_s17 = scalar_lea.sflag [#allocation6], %s5366_s13 }
 0x520   : > { %p6874_p4 = pnand %p9597_p2, %p9596_p0 }
 0x522   : > { %7365 = dma.done.wait (!%p6874_p4), %s5367_s17, 4096  }
 0x523   : > { %7367 = vsyncadd (!%p6874_p4), %s5367_s17, 4294963200  ;;  %p19_p5 = scmp.ge.s32.totalorder %s7453_s27, 4   ;;  %s9598_s21 = smov %s7374_s22 }
 0x524   : > { %s9599_s22 = smov %s7378_s23  ;;  %s9600_s23 = smov %s7465_s30 }
 0x525   : > { %s9601_s24 = smov %s7453_s27  ;;  %21 = sbr.rel (!%p19_p5) target bundleno = 5 (0x5), region = 100 }
 0x52c   :  { %5372 = vsyncpa [#allocation5], 1 }
 0x52d   :  { %5374 = vsyncpa [#allocation5 + $0x1], 1 }
 0x52e   :  { %5375 = vsyncpa [#allocation6], 1 }
 0x52f   :  { %5377 = vsyncpa [#allocation6 + $0x1], 1 }

</bundles_post_ra>
